<compile_context>
chip_gen: v7x
topology: tpu7x:2x2x1
jax: 0.10.0
libtpu: 0.0.40
codegen_flags: <defaults>
</compile_context>

<pallas_src>
import functools

import jax
import jax.numpy as jnp
import numpy as np
from jax.experimental import pallas as pl
from jax.experimental.pallas import tpu as pltpu


def _round_up(x, m):
    return ((x + m - 1) // m) * m


def _chunk_vmem_bytes(tile_t, Bp, Hp, E):
    """Rough per-grid-step VMEM working set."""
    io = 2 * 2 * tile_t * Bp * (E + Hp) * 2        # emb-in + out, 2 dirs, 2 bufs, bf16
    gates = 2 * tile_t * Bp * 3 * Hp * 4           # gi_f / gi_b f32 temporaries
    weights = 2 * 2 * (E + Hp) * 3 * Hp * 2        # W_ih + W_hh, 2 dirs, 2 bufs, bf16
    misc = 2 * 2 * 2 * 3 * Hp * 4 + 2 * Bp * Hp * 4  # biases + h scratch
    return io + gates + weights + misc


def _pick_tile_t(T, Bp, Hp, E, vmem_budget=20 << 20):
    """Timesteps per grid step: amortize the ~0.35us per-step pipeline overhead
    while keeping the chunk working set under ~20 MiB (safe w.r.t. the 32 MiB
    scoped-VMEM default everywhere, including v7x's 64 MiB physical VMEM)."""
    tt = min(32, max(8, _round_up(T, 8)))
    while tt > 4 and _chunk_vmem_bytes(tt, Bp, Hp, E) > vmem_budget:
        tt //= 2
    return max(tt, 1)


# ---------------------------------------------------------------------------
# Pallas kernel: fused bidirectional GRU (input projection + recurrence).
# ---------------------------------------------------------------------------
def _bigru_kernel(embf_ref, embb_ref, wih_ref, bih_ref, whh_ref, bhh_ref,
                  outf_ref, outb_ref, hfin_ref, hf_scr, hb_scr,
                  *, hidden_pad, tile_t, seq_len, seq_pad):
    """Grid = (time_chunk,), sequential.  Forward chunk c and backward chunk
    nc-1-c are processed in the same grid step with interleaved step bodies."""
    c = pl.program_id(0)
    nc = pl.num_programs(0)
    Hp = hidden_pad
    Bp = hf_scr.shape[0]
    need_mask = seq_pad > seq_len   # static

    @pl.when(c == 0)
    def _init():                    # hidden=None -> zeros, per direction
        hf_scr[...] = jnp.zeros_like(hf_scr)
        hb_scr[...] = jnp.zeros_like(hb_scr)

    # Fused, chunk-level input projection: one MXU-shaped matmul per direction
    # (M = tile_t*Bp rows) instead of streaming precomputed gi from HBM.
    gi_f = jnp.dot(embf_ref[0], wih_ref[0],
                   preferred_element_type=jnp.float32) + bih_ref[0]
    gi_b = jnp.dot(embb_ref[0], wih_ref[1],
                   preferred_element_type=jnp.float32) + bih_ref[1]

    whh_f = whh_ref[0]              # (Hp, 3Hp) bf16
    whh_b = whh_ref[1]
    bhh_f = bhh_ref[0]              # (1, 3Hp) f32
    bhh_b = bhh_ref[1]

    def gru_step(gi, h, w_hh, b_hh):
        gh = jnp.dot(h.astype(w_hh.dtype), w_hh,
                     preferred_element_type=jnp.float32) + b_hh
        # Lane-aligned gate slices (Hp is a multiple of 128); gate math in f32.
        r = jax.nn.sigmoid(gi[:, 0:Hp] + gh[:, 0:Hp])
        z = jax.nn.sigmoid(gi[:, Hp:2 * Hp] + gh[:, Hp:2 * Hp])
        n = jnp.tanh(gi[:, 2 * Hp:] + r * gh[:, 2 * Hp:])
        return (1.0 - z) * n + z * h

    # Unrolled over the chunk; the fwd and bwd chains are independent, so the
    # scheduler interleaves them (hides the latency-bound recurrence chain).
    for lt in range(tile_t):
        ltb = tile_t - 1 - lt       # backward walks its chunk in reverse

        hf = hf_scr[...]
        hb = hb_scr[...]
        hf_new = gru_step(gi_f[lt * Bp:(lt + 1) * Bp, :], hf, whh_f, bhh_f)
        hb_new = gru_step(gi_b[ltb * Bp:(ltb + 1) * Bp, :], hb, whh_b, bhh_b)

        if need_mask:
            # Keep h unchanged on padded timesteps (global t >= seq_len).
            vf = ((c * tile_t + lt) < seq_len).astype(jnp.float32)
            vb = (((nc - 1 - c) * tile_t + ltb) < seq_len).astype(jnp.float32)
            hf_new = hf + vf * (hf_new - hf)
            hb_new = hb + vb * (hb_new - hb)

        hf_scr[...] = hf_new
        hb_scr[...] = hb_new
        outf_ref[0, lt * Bp:(lt + 1) * Bp, :] = hf_new.astype(outf_ref.dtype)
        outb_ref[0, ltb * Bp:(ltb + 1) * Bp, :] = hb_new.astype(outb_ref.dtype)

    @pl.when(c == nc - 1)
    def _final():
        hfin_ref[0] = hf_scr[...].astype(hfin_ref.dtype)
        hfin_ref[1] = hb_scr[...].astype(hfin_ref.dtype)


def bigru_pallas(emb_chunks, w_ih, b_ih, w_hh, b_hh, *, hidden_pad, tile_t,
                 seq_len, seq_pad, out_dtype=jnp.bfloat16):
    """emb_chunks: (nc, tile_t*Bp, E) bf16 (row lt*Bp+b == time chunk_start+lt).
    w_ih: (2, E, 3Hp) bf16, w_hh: (2, Hp, 3Hp) bf16, biases: (2, 1, 3Hp) f32.
    Returns (out_fwd, out_bwd) each (nc, tile_t*Bp, Hp) and h_final (2, Bp, Hp)."""
    nc, tbp, E = emb_chunks.shape
    Hp = hidden_pad
    Bp = tbp // tile_t

    kernel = functools.partial(_bigru_kernel, hidden_pad=Hp, tile_t=tile_t,
                               seq_len=seq_len, seq_pad=seq_pad)

    out_f, out_b, hfin = pl.pallas_call(
        kernel,
        out_shape=(jax.ShapeDtypeStruct((nc, tbp, Hp), out_dtype),
                   jax.ShapeDtypeStruct((nc, tbp, Hp), out_dtype),
                   jax.ShapeDtypeStruct((2, Bp, Hp), jnp.float32)),
        grid=(nc,),
        in_specs=[
            pl.BlockSpec((1, tbp, E), lambda c: (c, 0, 0)),              # fwd chunk
            pl.BlockSpec((1, tbp, E), lambda c: (nc - 1 - c, 0, 0)),     # bwd chunk
            pl.BlockSpec((2, E, 3 * Hp), lambda c: (0, 0, 0)),           # W_ih
            pl.BlockSpec((2, 1, 3 * Hp), lambda c: (0, 0, 0)),           # b_ih
            pl.BlockSpec((2, Hp, 3 * Hp), lambda c: (0, 0, 0)),          # W_hh
            pl.BlockSpec((2, 1, 3 * Hp), lambda c: (0, 0, 0)),           # b_hh
        ],
        out_specs=(
            pl.BlockSpec((1, tbp, Hp), lambda c: (c, 0, 0)),
            pl.BlockSpec((1, tbp, Hp), lambda c: (nc - 1 - c, 0, 0)),
            pl.BlockSpec((2, Bp, Hp), lambda c: (0, 0, 0)),
        ),
        scratch_shapes=[pltpu.VMEM((Bp, Hp), jnp.float32),
                        pltpu.VMEM((Bp, Hp), jnp.float32)],
        compiler_params=pltpu.CompilerParams(
            dimension_semantics=("arbitrary",)),
    )(emb_chunks, emb_chunks, w_ih, b_ih, w_hh, b_hh)
    return out_f, out_b, hfin


# ---------------------------------------------------------------------------
# Module wrapper
# ---------------------------------------------------------------------------
def _pad_gates_last(w, H, Hp):
    """Zero-pad each of the 3 gate blocks along the last axis from H to Hp."""
    pads = [(0, 0)] * (w.ndim - 1) + [(0, Hp - H)]
    gates = [jnp.pad(w[..., g * H:(g + 1) * H], pads) for g in range(3)]
    return jnp.concatenate(gates, axis=-1)


class EncoderRNNPallas:
    """JAX/Pallas port of EncoderRNN (n_layers=1, bidirectional GRU)."""

    def __init__(self, hidden_size, embedding_size, vocab_size, key):
        self.hidden_size = hidden_size
        self.embedding_size = embedding_size
        self.hidden_pad = _round_up(hidden_size, 128)      # lane-aligned gates
        keys = jax.random.split(key, 9)

        # Embedding table (deterministic stand-in for glove init).
        scale_emb = 0.04 * np.sqrt(12) / 2
        self.emb = jax.random.uniform(
            keys[0], (vocab_size, embedding_size),
            minval=-scale_emb, maxval=scale_emb, dtype=jnp.float32)

        # GRU params, PyTorch-style uniform(-1/sqrt(H), 1/sqrt(H)), gate order r,z,n.
        k = 1.0 / np.sqrt(hidden_size)

        def u(rk, shape):
            return jax.random.uniform(rk, shape, minval=-k, maxval=k,
                                      dtype=jnp.float32)

        H, Hp, E = hidden_size, self.hidden_pad, embedding_size
        # Stored already transposed: (in, 3H).  f32 masters kept for reference.
        self.w_ih_f = u(keys[1], (E, 3 * H))
        self.w_hh_f = u(keys[2], (H, 3 * H))
        self.b_ih_f = u(keys[3], (1, 3 * H))
        self.b_hh_f = u(keys[4], (1, 3 * H))
        self.w_ih_b = u(keys[5], (E, 3 * H))
        self.w_hh_b = u(keys[6], (H, 3 * H))
        self.b_ih_b = u(keys[7], (1, 3 * H))
        self.b_hh_b = u(keys[8], (1, 3 * H))

        # Gate-padded, direction-stacked parameters used by the kernel.
        # Matmul operands in bf16 (native MXU rate on v6e/v7x, half VMEM);
        # biases stay f32 (added after the f32-accumulated dot).
        self.w_ih_pad = jnp.stack(
            [_pad_gates_last(self.w_ih_f, H, Hp),
             _pad_gates_last(self.w_ih_b, H, Hp)],
            axis=0).astype(jnp.bfloat16)                                # (2,E,3Hp)
        self.b_ih_pad = jnp.stack(
            [_pad_gates_last(self.b_ih_f, H, Hp),
             _pad_gates_last(self.b_ih_b, H, Hp)], axis=0)              # (2,1,3Hp)
        whh_f = jnp.pad(_pad_gates_last(self.w_hh_f, H, Hp), ((0, Hp - H), (0, 0)))
        whh_b = jnp.pad(_pad_gates_last(self.w_hh_b, H, Hp), ((0, Hp - H), (0, 0)))
        self.w_hh_pad = jnp.stack([whh_f, whh_b],
                                  axis=0).astype(jnp.bfloat16)          # (2,Hp,3Hp)
        self.b_hh_pad = jnp.stack(
            [_pad_gates_last(self.b_hh_f, H, Hp),
             _pad_gates_last(self.b_hh_b, H, Hp)], axis=0)              # (2,1,3Hp)

    def __call__(self, input_seq, input_lengths=None, hidden=None, *, tile_t=None):
        # input_seq: (T, B) int32.  Embedding lookup is glue (plain JAX gather).
        # TODO(synk): input_lengths (pack_padded_sequence) ignored; full-length assumed.
        T, B = input_seq.shape
        H, Hp, E = self.hidden_size, self.hidden_pad, self.embedding_size
        Bp = _round_up(max(B, 16), 16)              # bf16-sublane-aligned batch
        if tile_t is None:
            tile_t = _pick_tile_t(T, Bp, Hp, E)
        Tp = _round_up(T, tile_t)
        nc = Tp // tile_t

        embedded = self.emb[input_seq]              # (T, B, E) f32
        emb_pad = jnp.pad(embedded, ((0, Tp - T), (0, Bp - B), (0, 0)))
        # (nc, tile_t*Bp, E): row lt*Bp+b == timestep chunk_start+lt, batch b.
        emb_chunks = emb_pad.astype(jnp.bfloat16).reshape(nc, tile_t * Bp, E)

        out_f, out_b, hfin = bigru_pallas(
            emb_chunks, self.w_ih_pad, self.b_ih_pad,
            self.w_hh_pad, self.b_hh_pad,
            hidden_pad=Hp, tile_t=tile_t, seq_len=T, seq_pad=Tp)

        # fwd + bwd sum epilogue (bf16 streams halve the extra HBM round trip).
        out_sum = out_f.astype(jnp.float32) + out_b.astype(jnp.float32)
        outputs = out_sum.reshape(Tp, Bp, Hp)[:T, :B, :H]   # (T, B, H)
        hidden_out = hfin[:, :B, :H]                        # (2, B, H)
        return outputs, hidden_out


# ---------------------------------------------------------------------------
# Pure-JAX reference for validation
# ---------------------------------------------------------------------------
def _gru_reference(x, w_ih, w_hh, b_ih, b_hh):
    T, B, E = x.shape
    H = w_hh.shape[0]

    def step(h, xt):
        gi = xt @ w_ih + b_ih
        gh = h @ w_hh + b_hh
        i_r, i_z, i_n = gi[:, :H], gi[:, H:2 * H], gi[:, 2 * H:]
        h_r, h_z, h_n = gh[:, :H], gh[:, H:2 * H], gh[:, 2 * H:]
        r = jax.nn.sigmoid(i_r + h_r)
        z = jax.nn.sigmoid(i_z + h_z)
        n = jnp.tanh(i_n + r * h_n)
        h_new = (1.0 - z) * n + z * h
        return h_new, h_new

    h0 = jnp.zeros((B, H), jnp.float32)
    hT, outs = jax.lax.scan(step, h0, x)
    return outs, hT


if __name__ == "__main__":
    VOCAB = 64
    EMB = 32
    HIDDEN = 32
    T, B = 10, 2          # T not a multiple of tile_t -> exercises padded-tail masking

    key = jax.random.PRNGKey(0)
    k_model, k_data = jax.random.split(key)

    enc = EncoderRNNPallas(HIDDEN, EMB, VOCAB, k_model)

    input_seq = jax.random.randint(k_data, (T, B), 0, VOCAB, dtype=jnp.int32)
    input_lengths = jnp.full((B,), T, dtype=jnp.int32)

    # tile_t=4 -> 3 time chunks: exercises chunked recurrence carry, reversed
    # backward chunk indexing and masked padded timesteps.
    outputs, hidden = enc(input_seq, input_lengths, tile_t=4)
    outputs = jax.block_until_ready(outputs)
    hidden = jax.block_until_ready(hidden)

    # Validate against a pure-JAX f32 scan reference (unpadded weights).
    embedded = enc.emb[input_seq]
    ref_f, ref_hf = _gru_reference(embedded, enc.w_ih_f, enc.w_hh_f,
                                   enc.b_ih_f, enc.b_hh_f)
    ref_b_rev, ref_hb = _gru_reference(embedded[::-1], enc.w_ih_b, enc.w_hh_b,
                                       enc.b_ih_b, enc.b_hh_b)
    ref_out = ref_f + ref_b_rev[::-1]
    ref_hidden = jnp.stack([ref_hf, ref_hb], axis=0)

    assert outputs.shape == (T, B, HIDDEN)
    assert hidden.shape == (2, B, HIDDEN)
    # bf16 matmul operands / output streams -> relaxed tolerance vs f32 reference.
    np.testing.assert_allclose(np.asarray(outputs), np.asarray(ref_out),
                               rtol=2.5e-2, atol=2.5e-2)
    np.testing.assert_allclose(np.asarray(hidden), np.asarray(ref_hidden),
                               rtol=2.5e-2, atol=2.5e-2)
    print("KERNEL_OK")
</pallas_src>

<mosaic_0001>
module attributes {stable_mosaic.version = 11 : i64} {
  func.func @_bigru_kernel(%arg0: i32, %arg1: memref<1x64x32xbf16, #tpu.memory_space<vmem>>, %arg2: memref<1x64x32xbf16, #tpu.memory_space<vmem>>, %arg3: memref<2x32x384xbf16, #tpu.memory_space<vmem>>, %arg4: memref<2x1x384xf32, #tpu.memory_space<vmem>>, %arg5: memref<2x128x384xbf16, #tpu.memory_space<vmem>>, %arg6: memref<2x1x384xf32, #tpu.memory_space<vmem>>, %arg7: memref<1x64x128xbf16, #tpu.memory_space<vmem>>, %arg8: memref<1x64x128xbf16, #tpu.memory_space<vmem>>, %arg9: memref<2x16x128xf32, #tpu.memory_space<vmem>>, %arg10: memref<16x128xf32, #tpu.memory_space<vmem>>, %arg11: memref<16x128xf32, #tpu.memory_space<vmem>>) attributes {dimension_semantics = [#tpu.dimension_semantics<arbitrary>], iteration_bounds = array<i64: 3>, scalar_prefetch = 0 : i64, scratch_operands = 2 : i64, tpu.core_type = #tpu.core_type<tc>, window_params = [{transform_indices = @transform_0, window_bounds = array<i64: 1, 64, 32>}, {transform_indices = @transform_1, window_bounds = array<i64: 1, 64, 32>}, {pipeline_mode = #tpu.pipeline_mode<synchronous>, transform_indices = @transform_2, window_bounds = array<i64: 2, 32, 384>}, {pipeline_mode = #tpu.pipeline_mode<synchronous>, transform_indices = @transform_3, window_bounds = array<i64: 2, 1, 384>}, {pipeline_mode = #tpu.pipeline_mode<synchronous>, transform_indices = @transform_4, window_bounds = array<i64: 2, 128, 384>}, {pipeline_mode = #tpu.pipeline_mode<synchronous>, transform_indices = @transform_5, window_bounds = array<i64: 2, 1, 384>}, {transform_indices = @transform_6, window_bounds = array<i64: 1, 64, 128>}, {transform_indices = @transform_7, window_bounds = array<i64: 1, 64, 128>}, {pipeline_mode = #tpu.pipeline_mode<synchronous>, transform_indices = @transform_8, window_bounds = array<i64: 2, 16, 128>}]} {
    %c0_i32 = arith.constant 0 : i32
    %0 = arith.cmpi eq, %arg0, %c0_i32 : i32
    %1 = arith.extui %0 : i1 to i32
    %c0_i32_0 = arith.constant 0 : i32
    %2 = arith.cmpi ne, %1, %c0_i32_0 : i32
    scf.if %2 {
      %cst_140 = arith.constant 0.000000e+00 : f32
      %404 = vector.broadcast %cst_140 : f32 to vector<16x128xf32>
      %c0_141 = arith.constant 0 : index
      %c0_142 = arith.constant 0 : index
      %405 = vector.load %arg10[%c0_141, %c0_142] : memref<16x128xf32, #tpu.memory_space<vmem>>, vector<16x128xf32>
      tpu.vector_store %arg10[%c0_141, %c0_142], %404 {strides = array<i32>} : memref<16x128xf32, #tpu.memory_space<vmem>>, vector<16x128xf32>,
      %cst_143 = arith.constant 0.000000e+00 : f32
      %406 = vector.broadcast %cst_143 : f32 to vector<16x128xf32>
      %c0_144 = arith.constant 0 : index
      %c0_145 = arith.constant 0 : index
      %407 = vector.load %arg11[%c0_144, %c0_145] : memref<16x128xf32, #tpu.memory_space<vmem>>, vector<16x128xf32>
      tpu.vector_store %arg11[%c0_144, %c0_145], %406 {strides = array<i32>} : memref<16x128xf32, #tpu.memory_space<vmem>>, vector<16x128xf32>,
    } else {
    }
    %c0 = arith.constant 0 : index
    %c0_1 = arith.constant 0 : index
    %c0_2 = arith.constant 0 : index
    %3 = vector.load %arg1[%c0, %c0_1, %c0_2] : memref<1x64x32xbf16, #tpu.memory_space<vmem>>, vector<1x64x32xbf16>
    %4 = vector.shape_cast %3 : vector<1x64x32xbf16> to vector<64x32xbf16>
    %c0_3 = arith.constant 0 : index
    %c0_4 = arith.constant 0 : index
    %c0_5 = arith.constant 0 : index
    %5 = vector.load %arg3[%c0_3, %c0_4, %c0_5] : memref<2x32x384xbf16, #tpu.memory_space<vmem>>, vector<1x32x384xbf16>
    %6 = vector.shape_cast %5 : vector<1x32x384xbf16> to vector<32x384xbf16>
    %cst = arith.constant dense<0.000000e+00> : vector<64x384xf32>
    %7 = tpu.matmul %4, %6, %cst {dimension_numbers = #tpu.dot_dimension_numbers<[1], [0], [0], [1], [0, 0, 1, 1], [], []>} : vector<64x32xbf16>, vector<32x384xbf16>, vector<64x384xf32> -> vector<64x384xf32>
    %c0_6 = arith.constant 0 : index
    %c0_7 = arith.constant 0 : index
    %c0_8 = arith.constant 0 : index
    %8 = vector.load %arg4[%c0_6, %c0_7, %c0_8] : memref<2x1x384xf32, #tpu.memory_space<vmem>>, vector<1x1x384xf32>
    %9 = vector.shape_cast %8 : vector<1x1x384xf32> to vector<1x384xf32>
    %10 = vector.broadcast %9 : vector<1x384xf32> to vector<64x384xf32>
    %11 = arith.addf %7, %10 : vector<64x384xf32>
    %c0_9 = arith.constant 0 : index
    %c0_10 = arith.constant 0 : index
    %c0_11 = arith.constant 0 : index
    %12 = vector.load %arg2[%c0_9, %c0_10, %c0_11] : memref<1x64x32xbf16, #tpu.memory_space<vmem>>, vector<1x64x32xbf16>
    %13 = vector.shape_cast %12 : vector<1x64x32xbf16> to vector<64x32xbf16>
    %c1 = arith.constant 1 : index
    %c0_12 = arith.constant 0 : index
    %c0_13 = arith.constant 0 : index
    %14 = vector.load %arg3[%c1, %c0_12, %c0_13] : memref<2x32x384xbf16, #tpu.memory_space<vmem>>, vector<1x32x384xbf16>
    %15 = vector.shape_cast %14 : vector<1x32x384xbf16> to vector<32x384xbf16>
    %cst_14 = arith.constant dense<0.000000e+00> : vector<64x384xf32>
    %16 = tpu.matmul %13, %15, %cst_14 {dimension_numbers = #tpu.dot_dimension_numbers<[1], [0], [0], [1], [0, 0, 1, 1], [], []>} : vector<64x32xbf16>, vector<32x384xbf16>, vector<64x384xf32> -> vector<64x384xf32>
    %c1_15 = arith.constant 1 : index
    %c0_16 = arith.constant 0 : index
    %c0_17 = arith.constant 0 : index
    %17 = vector.load %arg4[%c1_15, %c0_16, %c0_17] : memref<2x1x384xf32, #tpu.memory_space<vmem>>, vector<1x1x384xf32>
    %18 = vector.shape_cast %17 : vector<1x1x384xf32> to vector<1x384xf32>
    %19 = vector.broadcast %18 : vector<1x384xf32> to vector<64x384xf32>
    %20 = arith.addf %16, %19 : vector<64x384xf32>
    %c0_18 = arith.constant 0 : index
    %c0_19 = arith.constant 0 : index
    %c0_20 = arith.constant 0 : index
    %21 = vector.load %arg5[%c0_18, %c0_19, %c0_20] : memref<2x128x384xbf16, #tpu.memory_space<vmem>>, vector<1x128x384xbf16>
    %22 = vector.shape_cast %21 : vector<1x128x384xbf16> to vector<128x384xbf16>
    %c1_21 = arith.constant 1 : index
    %c0_22 = arith.constant 0 : index
    %c0_23 = arith.constant 0 : index
    %23 = vector.load %arg5[%c1_21, %c0_22, %c0_23] : memref<2x128x384xbf16, #tpu.memory_space<vmem>>, vector<1x128x384xbf16>
    %24 = vector.shape_cast %23 : vector<1x128x384xbf16> to vector<128x384xbf16>
    %c0_24 = arith.constant 0 : index
    %c0_25 = arith.constant 0 : index
    %c0_26 = arith.constant 0 : index
    %25 = vector.load %arg6[%c0_24, %c0_25, %c0_26] : memref<2x1x384xf32, #tpu.memory_space<vmem>>, vector<1x1x384xf32>
    %26 = vector.shape_cast %25 : vector<1x1x384xf32> to vector<1x384xf32>
    %c1_27 = arith.constant 1 : index
    %c0_28 = arith.constant 0 : index
    %c0_29 = arith.constant 0 : index
    %27 = vector.load %arg6[%c1_27, %c0_28, %c0_29] : memref<2x1x384xf32, #tpu.memory_space<vmem>>, vector<1x1x384xf32>
    %28 = vector.shape_cast %27 : vector<1x1x384xf32> to vector<1x384xf32>
    %c0_30 = arith.constant 0 : index
    %c0_31 = arith.constant 0 : index
    %29 = vector.load %arg10[%c0_30, %c0_31] : memref<16x128xf32, #tpu.memory_space<vmem>>, vector<16x128xf32>
    %c0_32 = arith.constant 0 : index
    %c0_33 = arith.constant 0 : index
    %30 = vector.load %arg11[%c0_32, %c0_33] : memref<16x128xf32, #tpu.memory_space<vmem>>, vector<16x128xf32>
    %31 = vector.extract_strided_slice %11 {offsets = [0, 0], sizes = [16, 384], strides = [1, 1]} : vector<64x384xf32> to vector<16x384xf32>
    %32 = arith.truncf %29 : vector<16x128xf32> to vector<16x128xbf16>
    %cst_34 = arith.constant dense<0.000000e+00> : vector<16x384xf32>
    %33 = tpu.matmul %32, %22, %cst_34 {dimension_numbers = #tpu.dot_dimension_numbers<[1], [0], [0], [1], [0, 0, 1, 1], [], []>} : vector<16x128xbf16>, vector<128x384xbf16>, vector<16x384xf32> -> vector<16x384xf32>
    %34 = vector.broadcast %26 : vector<1x384xf32> to vector<16x384xf32>
    %35 = arith.addf %33, %34 : vector<16x384xf32>
    %36 = vector.extract_strided_slice %31 {offsets = [0, 0], sizes = [16, 128], strides = [1, 1]} : vector<16x384xf32> to vector<16x128xf32>
    %37 = vector.extract_strided_slice %35 {offsets = [0, 0], sizes = [16, 128], strides = [1, 1]} : vector<16x384xf32> to vector<16x128xf32>
    %38 = arith.addf %36, %37 : vector<16x128xf32>
    %39 = arith.negf %38 : vector<16x128xf32>
    %40 = math.exp %39 : vector<16x128xf32>
    %cst_35 = arith.constant 1.000000e+00 : f32
    %41 = vector.broadcast %cst_35 : f32 to vector<16x128xf32>
    %42 = arith.addf %41, %40 : vector<16x128xf32>
    %43 = arith.divf %41, %42 : vector<16x128xf32>
    %44 = vector.extract_strided_slice %31 {offsets = [0, 128], sizes = [16, 128], strides = [1, 1]} : vector<16x384xf32> to vector<16x128xf32>
    %45 = vector.extract_strided_slice %35 {offsets = [0, 128], sizes = [16, 128], strides = [1, 1]} : vector<16x384xf32> to vector<16x128xf32>
    %46 = arith.addf %44, %45 : vector<16x128xf32>
    %47 = arith.negf %46 : vector<16x128xf32>
    %48 = math.exp %47 : vector<16x128xf32>
    %cst_36 = arith.constant 1.000000e+00 : f32
    %49 = vector.broadcast %cst_36 : f32 to vector<16x128xf32>
    %50 = arith.addf %49, %48 : vector<16x128xf32>
    %51 = arith.divf %49, %50 : vector<16x128xf32>
    %52 = vector.extract_strided_slice %31 {offsets = [0, 256], sizes = [16, 128], strides = [1, 1]} : vector<16x384xf32> to vector<16x128xf32>
    %53 = vector.extract_strided_slice %35 {offsets = [0, 256], sizes = [16, 128], strides = [1, 1]} : vector<16x384xf32> to vector<16x128xf32>
    %54 = arith.mulf %43, %53 : vector<16x128xf32>
    %55 = arith.addf %52, %54 : vector<16x128xf32>
    %56 = math.tanh %55 : vector<16x128xf32>
    %cst_37 = arith.constant 1.000000e+00 : f32
    %57 = vector.broadcast %cst_37 : f32 to vector<16x128xf32>
    %58 = arith.subf %57, %51 : vector<16x128xf32>
    %59 = arith.mulf %58, %56 : vector<16x128xf32>
    %60 = arith.mulf %51, %29 : vector<16x128xf32>
    %61 = arith.addf %59, %60 : vector<16x128xf32>
    %62 = vector.extract_strided_slice %20 {offsets = [48, 0], sizes = [16, 384], strides = [1, 1]} : vector<64x384xf32> to vector<16x384xf32>
    %63 = arith.truncf %30 : vector<16x128xf32> to vector<16x128xbf16>
    %cst_38 = arith.constant dense<0.000000e+00> : vector<16x384xf32>
    %64 = tpu.matmul %63, %24, %cst_38 {dimension_numbers = #tpu.dot_dimension_numbers<[1], [0], [0], [1], [0, 0, 1, 1], [], []>} : vector<16x128xbf16>, vector<128x384xbf16>, vector<16x384xf32> -> vector<16x384xf32>
    %65 = vector.broadcast %28 : vector<1x384xf32> to vector<16x384xf32>
    %66 = arith.addf %64, %65 : vector<16x384xf32>
    %67 = vector.extract_strided_slice %62 {offsets = [0, 0], sizes = [16, 128], strides = [1, 1]} : vector<16x384xf32> to vector<16x128xf32>
    %68 = vector.extract_strided_slice %66 {offsets = [0, 0], sizes = [16, 128], strides = [1, 1]} : vector<16x384xf32> to vector<16x128xf32>
    %69 = arith.addf %67, %68 : vector<16x128xf32>
    %70 = arith.negf %69 : vector<16x128xf32>
    %71 = math.exp %70 : vector<16x128xf32>
    %cst_39 = arith.constant 1.000000e+00 : f32
    %72 = vector.broadcast %cst_39 : f32 to vector<16x128xf32>
    %73 = arith.addf %72, %71 : vector<16x128xf32>
    %74 = arith.divf %72, %73 : vector<16x128xf32>
    %75 = vector.extract_strided_slice %62 {offsets = [0, 128], sizes = [16, 128], strides = [1, 1]} : vector<16x384xf32> to vector<16x128xf32>
    %76 = vector.extract_strided_slice %66 {offsets = [0, 128], sizes = [16, 128], strides = [1, 1]} : vector<16x384xf32> to vector<16x128xf32>
    %77 = arith.addf %75, %76 : vector<16x128xf32>
    %78 = arith.negf %77 : vector<16x128xf32>
    %79 = math.exp %78 : vector<16x128xf32>
    %cst_40 = arith.constant 1.000000e+00 : f32
    %80 = vector.broadcast %cst_40 : f32 to vector<16x128xf32>
    %81 = arith.addf %80, %79 : vector<16x128xf32>
    %82 = arith.divf %80, %81 : vector<16x128xf32>
    %83 = vector.extract_strided_slice %62 {offsets = [0, 256], sizes = [16, 128], strides = [1, 1]} : vector<16x384xf32> to vector<16x128xf32>
    %84 = vector.extract_strided_slice %66 {offsets = [0, 256], sizes = [16, 128], strides = [1, 1]} : vector<16x384xf32> to vector<16x128xf32>
    %85 = arith.mulf %74, %84 : vector<16x128xf32>
    %86 = arith.addf %83, %85 : vector<16x128xf32>
    %87 = math.tanh %86 : vector<16x128xf32>
    %cst_41 = arith.constant 1.000000e+00 : f32
    %88 = vector.broadcast %cst_41 : f32 to vector<16x128xf32>
    %89 = arith.subf %88, %82 : vector<16x128xf32>
    %90 = arith.mulf %89, %87 : vector<16x128xf32>
    %91 = arith.mulf %82, %30 : vector<16x128xf32>
    %92 = arith.addf %90, %91 : vector<16x128xf32>
    %c4_i32 = arith.constant 4 : i32
    %93 = arith.muli %arg0, %c4_i32 : i32
    %c0_i32_42 = arith.constant 0 : i32
    %94 = arith.addi %93, %c0_i32_42 : i32
    %c10_i32 = arith.constant 10 : i32
    %95 = arith.cmpi slt, %94, %c10_i32 : i32
    %96 = arith.extui %95 : i1 to i32
    %97 = arith.sitofp %96 : i32 to f32
    %c2_i32 = arith.constant 2 : i32
    %98 = arith.subi %c2_i32, %arg0 : i32
    %c4_i32_43 = arith.constant 4 : i32
    %99 = arith.muli %98, %c4_i32_43 : i32
    %c3_i32 = arith.constant 3 : i32
    %100 = arith.addi %99, %c3_i32 : i32
    %c10_i32_44 = arith.constant 10 : i32
    %101 = arith.cmpi slt, %100, %c10_i32_44 : i32
    %102 = arith.extui %101 : i1 to i32
    %103 = arith.sitofp %102 : i32 to f32
    %104 = arith.subf %61, %29 : vector<16x128xf32>
    %105 = vector.broadcast %97 : f32 to vector<16x128xf32>
    %106 = arith.mulf %105, %104 : vector<16x128xf32>
    %107 = arith.addf %29, %106 : vector<16x128xf32>
    %108 = arith.subf %92, %30 : vector<16x128xf32>
    %109 = vector.broadcast %103 : f32 to vector<16x128xf32>
    %110 = arith.mulf %109, %108 : vector<16x128xf32>
    %111 = arith.addf %30, %110 : vector<16x128xf32>
    %c0_45 = arith.constant 0 : index
    %c0_46 = arith.constant 0 : index
    %112 = vector.load %arg10[%c0_45, %c0_46] : memref<16x128xf32, #tpu.memory_space<vmem>>, vector<16x128xf32>
    tpu.vector_store %arg10[%c0_45, %c0_46], %107 {strides = array<i32>} : memref<16x128xf32, #tpu.memory_space<vmem>>, vector<16x128xf32>,
    %c0_47 = arith.constant 0 : index
    %c0_48 = arith.constant 0 : index
    %113 = vector.load %arg11[%c0_47, %c0_48] : memref<16x128xf32, #tpu.memory_space<vmem>>, vector<16x128xf32>
    tpu.vector_store %arg11[%c0_47, %c0_48], %111 {strides = array<i32>} : memref<16x128xf32, #tpu.memory_space<vmem>>, vector<16x128xf32>,
    %114 = arith.truncf %107 : vector<16x128xf32> to vector<16x128xbf16>
    %c0_49 = arith.constant 0 : index
    %c0_50 = arith.constant 0 : index
    %c0_51 = arith.constant 0 : index
    %115 = vector.load %arg7[%c0_49, %c0_50, %c0_51] : memref<1x64x128xbf16, #tpu.memory_space<vmem>>, vector<1x16x128xbf16>
    %116 = vector.shape_cast %115 : vector<1x16x128xbf16> to vector<16x128xbf16>
    %117 = vector.shape_cast %114 : vector<16x128xbf16> to vector<1x16x128xbf16>
    tpu.vector_store %arg7[%c0_49, %c0_50, %c0_51], %117 {strides = array<i32>} : memref<1x64x128xbf16, #tpu.memory_space<vmem>>, vector<1x16x128xbf16>,
    %118 = arith.truncf %111 : vector<16x128xf32> to vector<16x128xbf16>
    %c0_52 = arith.constant 0 : index
    %c48 = arith.constant 48 : index
    %c0_53 = arith.constant 0 : index
    %119 = vector.load %arg8[%c0_52, %c48, %c0_53] : memref<1x64x128xbf16, #tpu.memory_space<vmem>>, vector<1x16x128xbf16>
    %120 = vector.shape_cast %119 : vector<1x16x128xbf16> to vector<16x128xbf16>
    %121 = vector.shape_cast %118 : vector<16x128xbf16> to vector<1x16x128xbf16>
    tpu.vector_store %arg8[%c0_52, %c48, %c0_53], %121 {strides = array<i32>} : memref<1x64x128xbf16, #tpu.memory_space<vmem>>, vector<1x16x128xbf16>,
    %c0_54 = arith.constant 0 : index
    %c0_55 = arith.constant 0 : index
    %122 = vector.load %arg10[%c0_54, %c0_55] : memref<16x128xf32, #tpu.memory_space<vmem>>, vector<16x128xf32>
    %c0_56 = arith.constant 0 : index
    %c0_57 = arith.constant 0 : index
    %123 = vector.load %arg11[%c0_56, %c0_57] : memref<16x128xf32, #tpu.memory_space<vmem>>, vector<16x128xf32>
    %124 = vector.extract_strided_slice %11 {offsets = [16, 0], sizes = [16, 384], strides = [1, 1]} : vector<64x384xf32> to vector<16x384xf32>
    %125 = arith.truncf %122 : vector<16x128xf32> to vector<16x128xbf16>
    %cst_58 = arith.constant dense<0.000000e+00> : vector<16x384xf32>
    %126 = tpu.matmul %125, %22, %cst_58 {dimension_numbers = #tpu.dot_dimension_numbers<[1], [0], [0], [1], [0, 0, 1, 1], [], []>} : vector<16x128xbf16>, vector<128x384xbf16>, vector<16x384xf32> -> vector<16x384xf32>
    %127 = vector.broadcast %26 : vector<1x384xf32> to vector<16x384xf32>
    %128 = arith.addf %126, %127 : vector<16x384xf32>
    %129 = vector.extract_strided_slice %124 {offsets = [0, 0], sizes = [16, 128], strides = [1, 1]} : vector<16x384xf32> to vector<16x128xf32>
    %130 = vector.extract_strided_slice %128 {offsets = [0, 0], sizes = [16, 128], strides = [1, 1]} : vector<16x384xf32> to vector<16x128xf32>
    %131 = arith.addf %129, %130 : vector<16x128xf32>
    %132 = arith.negf %131 : vector<16x128xf32>
    %133 = math.exp %132 : vector<16x128xf32>
    %cst_59 = arith.constant 1.000000e+00 : f32
    %134 = vector.broadcast %cst_59 : f32 to vector<16x128xf32>
    %135 = arith.addf %134, %133 : vector<16x128xf32>
    %136 = arith.divf %134, %135 : vector<16x128xf32>
    %137 = vector.extract_strided_slice %124 {offsets = [0, 128], sizes = [16, 128], strides = [1, 1]} : vector<16x384xf32> to vector<16x128xf32>
    %138 = vector.extract_strided_slice %128 {offsets = [0, 128], sizes = [16, 128], strides = [1, 1]} : vector<16x384xf32> to vector<16x128xf32>
    %139 = arith.addf %137, %138 : vector<16x128xf32>
    %140 = arith.negf %139 : vector<16x128xf32>
    %141 = math.exp %140 : vector<16x128xf32>
    %cst_60 = arith.constant 1.000000e+00 : f32
    %142 = vector.broadcast %cst_60 : f32 to vector<16x128xf32>
    %143 = arith.addf %142, %141 : vector<16x128xf32>
    %144 = arith.divf %142, %143 : vector<16x128xf32>
    %145 = vector.extract_strided_slice %124 {offsets = [0, 256], sizes = [16, 128], strides = [1, 1]} : vector<16x384xf32> to vector<16x128xf32>
    %146 = vector.extract_strided_slice %128 {offsets = [0, 256], sizes = [16, 128], strides = [1, 1]} : vector<16x384xf32> to vector<16x128xf32>
    %147 = arith.mulf %136, %146 : vector<16x128xf32>
    %148 = arith.addf %145, %147 : vector<16x128xf32>
    %149 = math.tanh %148 : vector<16x128xf32>
    %cst_61 = arith.constant 1.000000e+00 : f32
    %150 = vector.broadcast %cst_61 : f32 to vector<16x128xf32>
    %151 = arith.subf %150, %144 : vector<16x128xf32>
    %152 = arith.mulf %151, %149 : vector<16x128xf32>
    %153 = arith.mulf %144, %122 : vector<16x128xf32>
    %154 = arith.addf %152, %153 : vector<16x128xf32>
    %155 = vector.extract_strided_slice %20 {offsets = [32, 0], sizes = [16, 384], strides = [1, 1]} : vector<64x384xf32> to vector<16x384xf32>
    %156 = arith.truncf %123 : vector<16x128xf32> to vector<16x128xbf16>
    %cst_62 = arith.constant dense<0.000000e+00> : vector<16x384xf32>
    %157 = tpu.matmul %156, %24, %cst_62 {dimension_numbers = #tpu.dot_dimension_numbers<[1], [0], [0], [1], [0, 0, 1, 1], [], []>} : vector<16x128xbf16>, vector<128x384xbf16>, vector<16x384xf32> -> vector<16x384xf32>
    %158 = vector.broadcast %28 : vector<1x384xf32> to vector<16x384xf32>
    %159 = arith.addf %157, %158 : vector<16x384xf32>
    %160 = vector.extract_strided_slice %155 {offsets = [0, 0], sizes = [16, 128], strides = [1, 1]} : vector<16x384xf32> to vector<16x128xf32>
    %161 = vector.extract_strided_slice %159 {offsets = [0, 0], sizes = [16, 128], strides = [1, 1]} : vector<16x384xf32> to vector<16x128xf32>
    %162 = arith.addf %160, %161 : vector<16x128xf32>
    %163 = arith.negf %162 : vector<16x128xf32>
    %164 = math.exp %163 : vector<16x128xf32>
    %cst_63 = arith.constant 1.000000e+00 : f32
    %165 = vector.broadcast %cst_63 : f32 to vector<16x128xf32>
    %166 = arith.addf %165, %164 : vector<16x128xf32>
    %167 = arith.divf %165, %166 : vector<16x128xf32>
    %168 = vector.extract_strided_slice %155 {offsets = [0, 128], sizes = [16, 128], strides = [1, 1]} : vector<16x384xf32> to vector<16x128xf32>
    %169 = vector.extract_strided_slice %159 {offsets = [0, 128], sizes = [16, 128], strides = [1, 1]} : vector<16x384xf32> to vector<16x128xf32>
    %170 = arith.addf %168, %169 : vector<16x128xf32>
    %171 = arith.negf %170 : vector<16x128xf32>
    %172 = math.exp %171 : vector<16x128xf32>
    %cst_64 = arith.constant 1.000000e+00 : f32
    %173 = vector.broadcast %cst_64 : f32 to vector<16x128xf32>
    %174 = arith.addf %173, %172 : vector<16x128xf32>
    %175 = arith.divf %173, %174 : vector<16x128xf32>
    %176 = vector.extract_strided_slice %155 {offsets = [0, 256], sizes = [16, 128], strides = [1, 1]} : vector<16x384xf32> to vector<16x128xf32>
    %177 = vector.extract_strided_slice %159 {offsets = [0, 256], sizes = [16, 128], strides = [1, 1]} : vector<16x384xf32> to vector<16x128xf32>
    %178 = arith.mulf %167, %177 : vector<16x128xf32>
    %179 = arith.addf %176, %178 : vector<16x128xf32>
    %180 = math.tanh %179 : vector<16x128xf32>
    %cst_65 = arith.constant 1.000000e+00 : f32
    %181 = vector.broadcast %cst_65 : f32 to vector<16x128xf32>
    %182 = arith.subf %181, %175 : vector<16x128xf32>
    %183 = arith.mulf %182, %180 : vector<16x128xf32>
    %184 = arith.mulf %175, %123 : vector<16x128xf32>
    %185 = arith.addf %183, %184 : vector<16x128xf32>
    %c4_i32_66 = arith.constant 4 : i32
    %186 = arith.muli %arg0, %c4_i32_66 : i32
    %c1_i32 = arith.constant 1 : i32
    %187 = arith.addi %186, %c1_i32 : i32
    %c10_i32_67 = arith.constant 10 : i32
    %188 = arith.cmpi slt, %187, %c10_i32_67 : i32
    %189 = arith.extui %188 : i1 to i32
    %190 = arith.sitofp %189 : i32 to f32
    %c2_i32_68 = arith.constant 2 : i32
    %191 = arith.subi %c2_i32_68, %arg0 : i32
    %c4_i32_69 = arith.constant 4 : i32
    %192 = arith.muli %191, %c4_i32_69 : i32
    %c2_i32_70 = arith.constant 2 : i32
    %193 = arith.addi %192, %c2_i32_70 : i32
    %c10_i32_71 = arith.constant 10 : i32
    %194 = arith.cmpi slt, %193, %c10_i32_71 : i32
    %195 = arith.extui %194 : i1 to i32
    %196 = arith.sitofp %195 : i32 to f32
    %197 = arith.subf %154, %122 : vector<16x128xf32>
    %198 = vector.broadcast %190 : f32 to vector<16x128xf32>
    %199 = arith.mulf %198, %197 : vector<16x128xf32>
    %200 = arith.addf %122, %199 : vector<16x128xf32>
    %201 = arith.subf %185, %123 : vector<16x128xf32>
    %202 = vector.broadcast %196 : f32 to vector<16x128xf32>
    %203 = arith.mulf %202, %201 : vector<16x128xf32>
    %204 = arith.addf %123, %203 : vector<16x128xf32>
    %c0_72 = arith.constant 0 : index
    %c0_73 = arith.constant 0 : index
    %205 = vector.load %arg10[%c0_72, %c0_73] : memref<16x128xf32, #tpu.memory_space<vmem>>, vector<16x128xf32>
    tpu.vector_store %arg10[%c0_72, %c0_73], %200 {strides = array<i32>} : memref<16x128xf32, #tpu.memory_space<vmem>>, vector<16x128xf32>,
    %c0_74 = arith.constant 0 : index
    %c0_75 = arith.constant 0 : index
    %206 = vector.load %arg11[%c0_74, %c0_75] : memref<16x128xf32, #tpu.memory_space<vmem>>, vector<16x128xf32>
    tpu.vector_store %arg11[%c0_74, %c0_75], %204 {strides = array<i32>} : memref<16x128xf32, #tpu.memory_space<vmem>>, vector<16x128xf32>,
    %207 = arith.truncf %200 : vector<16x128xf32> to vector<16x128xbf16>
    %c0_76 = arith.constant 0 : index
    %c16 = arith.constant 16 : index
    %c0_77 = arith.constant 0 : index
    %208 = vector.load %arg7[%c0_76, %c16, %c0_77] : memref<1x64x128xbf16, #tpu.memory_space<vmem>>, vector<1x16x128xbf16>
    %209 = vector.shape_cast %208 : vector<1x16x128xbf16> to vector<16x128xbf16>
    %210 = vector.shape_cast %207 : vector<16x128xbf16> to vector<1x16x128xbf16>
    tpu.vector_store %arg7[%c0_76, %c16, %c0_77], %210 {strides = array<i32>} : memref<1x64x128xbf16, #tpu.memory_space<vmem>>, vector<1x16x128xbf16>,
    %211 = arith.truncf %204 : vector<16x128xf32> to vector<16x128xbf16>
    %c0_78 = arith.constant 0 : index
    %c32 = arith.constant 32 : index
    %c0_79 = arith.constant 0 : index
    %212 = vector.load %arg8[%c0_78, %c32, %c0_79] : memref<1x64x128xbf16, #tpu.memory_space<vmem>>, vector<1x16x128xbf16>
    %213 = vector.shape_cast %212 : vector<1x16x128xbf16> to vector<16x128xbf16>
    %214 = vector.shape_cast %211 : vector<16x128xbf16> to vector<1x16x128xbf16>
    tpu.vector_store %arg8[%c0_78, %c32, %c0_79], %214 {strides = array<i32>} : memref<1x64x128xbf16, #tpu.memory_space<vmem>>, vector<1x16x128xbf16>,
    %c0_80 = arith.constant 0 : index
    %c0_81 = arith.constant 0 : index
    %215 = vector.load %arg10[%c0_80, %c0_81] : memref<16x128xf32, #tpu.memory_space<vmem>>, vector<16x128xf32>
    %c0_82 = arith.constant 0 : index
    %c0_83 = arith.constant 0 : index
    %216 = vector.load %arg11[%c0_82, %c0_83] : memref<16x128xf32, #tpu.memory_space<vmem>>, vector<16x128xf32>
    %217 = vector.extract_strided_slice %11 {offsets = [32, 0], sizes = [16, 384], strides = [1, 1]} : vector<64x384xf32> to vector<16x384xf32>
    %218 = arith.truncf %215 : vector<16x128xf32> to vector<16x128xbf16>
    %cst_84 = arith.constant dense<0.000000e+00> : vector<16x384xf32>
    %219 = tpu.matmul %218, %22, %cst_84 {dimension_numbers = #tpu.dot_dimension_numbers<[1], [0], [0], [1], [0, 0, 1, 1], [], []>} : vector<16x128xbf16>, vector<128x384xbf16>, vector<16x384xf32> -> vector<16x384xf32>
    %220 = vector.broadcast %26 : vector<1x384xf32> to vector<16x384xf32>
    %221 = arith.addf %219, %220 : vector<16x384xf32>
    %222 = vector.extract_strided_slice %217 {offsets = [0, 0], sizes = [16, 128], strides = [1, 1]} : vector<16x384xf32> to vector<16x128xf32>
    %223 = vector.extract_strided_slice %221 {offsets = [0, 0], sizes = [16, 128], strides = [1, 1]} : vector<16x384xf32> to vector<16x128xf32>
    %224 = arith.addf %222, %223 : vector<16x128xf32>
    %225 = arith.negf %224 : vector<16x128xf32>
    %226 = math.exp %225 : vector<16x128xf32>
    %cst_85 = arith.constant 1.000000e+00 : f32
    %227 = vector.broadcast %cst_85 : f32 to vector<16x128xf32>
    %228 = arith.addf %227, %226 : vector<16x128xf32>
    %229 = arith.divf %227, %228 : vector<16x128xf32>
    %230 = vector.extract_strided_slice %217 {offsets = [0, 128], sizes = [16, 128], strides = [1, 1]} : vector<16x384xf32> to vector<16x128xf32>
    %231 = vector.extract_strided_slice %221 {offsets = [0, 128], sizes = [16, 128], strides = [1, 1]} : vector<16x384xf32> to vector<16x128xf32>
    %232 = arith.addf %230, %231 : vector<16x128xf32>
    %233 = arith.negf %232 : vector<16x128xf32>
    %234 = math.exp %233 : vector<16x128xf32>
    %cst_86 = arith.constant 1.000000e+00 : f32
    %235 = vector.broadcast %cst_86 : f32 to vector<16x128xf32>
    %236 = arith.addf %235, %234 : vector<16x128xf32>
    %237 = arith.divf %235, %236 : vector<16x128xf32>
    %238 = vector.extract_strided_slice %217 {offsets = [0, 256], sizes = [16, 128], strides = [1, 1]} : vector<16x384xf32> to vector<16x128xf32>
    %239 = vector.extract_strided_slice %221 {offsets = [0, 256], sizes = [16, 128], strides = [1, 1]} : vector<16x384xf32> to vector<16x128xf32>
    %240 = arith.mulf %229, %239 : vector<16x128xf32>
    %241 = arith.addf %238, %240 : vector<16x128xf32>
    %242 = math.tanh %241 : vector<16x128xf32>
    %cst_87 = arith.constant 1.000000e+00 : f32
    %243 = vector.broadcast %cst_87 : f32 to vector<16x128xf32>
    %244 = arith.subf %243, %237 : vector<16x128xf32>
    %245 = arith.mulf %244, %242 : vector<16x128xf32>
    %246 = arith.mulf %237, %215 : vector<16x128xf32>
    %247 = arith.addf %245, %246 : vector<16x128xf32>
    %248 = vector.extract_strided_slice %20 {offsets = [16, 0], sizes = [16, 384], strides = [1, 1]} : vector<64x384xf32> to vector<16x384xf32>
    %249 = arith.truncf %216 : vector<16x128xf32> to vector<16x128xbf16>
    %cst_88 = arith.constant dense<0.000000e+00> : vector<16x384xf32>
    %250 = tpu.matmul %249, %24, %cst_88 {dimension_numbers = #tpu.dot_dimension_numbers<[1], [0], [0], [1], [0, 0, 1, 1], [], []>} : vector<16x128xbf16>, vector<128x384xbf16>, vector<16x384xf32> -> vector<16x384xf32>
    %251 = vector.broadcast %28 : vector<1x384xf32> to vector<16x384xf32>
    %252 = arith.addf %250, %251 : vector<16x384xf32>
    %253 = vector.extract_strided_slice %248 {offsets = [0, 0], sizes = [16, 128], strides = [1, 1]} : vector<16x384xf32> to vector<16x128xf32>
    %254 = vector.extract_strided_slice %252 {offsets = [0, 0], sizes = [16, 128], strides = [1, 1]} : vector<16x384xf32> to vector<16x128xf32>
    %255 = arith.addf %253, %254 : vector<16x128xf32>
    %256 = arith.negf %255 : vector<16x128xf32>
    %257 = math.exp %256 : vector<16x128xf32>
    %cst_89 = arith.constant 1.000000e+00 : f32
    %258 = vector.broadcast %cst_89 : f32 to vector<16x128xf32>
    %259 = arith.addf %258, %257 : vector<16x128xf32>
    %260 = arith.divf %258, %259 : vector<16x128xf32>
    %261 = vector.extract_strided_slice %248 {offsets = [0, 128], sizes = [16, 128], strides = [1, 1]} : vector<16x384xf32> to vector<16x128xf32>
    %262 = vector.extract_strided_slice %252 {offsets = [0, 128], sizes = [16, 128], strides = [1, 1]} : vector<16x384xf32> to vector<16x128xf32>
    %263 = arith.addf %261, %262 : vector<16x128xf32>
    %264 = arith.negf %263 : vector<16x128xf32>
    %265 = math.exp %264 : vector<16x128xf32>
    %cst_90 = arith.constant 1.000000e+00 : f32
    %266 = vector.broadcast %cst_90 : f32 to vector<16x128xf32>
    %267 = arith.addf %266, %265 : vector<16x128xf32>
    %268 = arith.divf %266, %267 : vector<16x128xf32>
    %269 = vector.extract_strided_slice %248 {offsets = [0, 256], sizes = [16, 128], strides = [1, 1]} : vector<16x384xf32> to vector<16x128xf32>
    %270 = vector.extract_strided_slice %252 {offsets = [0, 256], sizes = [16, 128], strides = [1, 1]} : vector<16x384xf32> to vector<16x128xf32>
    %271 = arith.mulf %260, %270 : vector<16x128xf32>
    %272 = arith.addf %269, %271 : vector<16x128xf32>
    %273 = math.tanh %272 : vector<16x128xf32>
    %cst_91 = arith.constant 1.000000e+00 : f32
    %274 = vector.broadcast %cst_91 : f32 to vector<16x128xf32>
    %275 = arith.subf %274, %268 : vector<16x128xf32>
    %276 = arith.mulf %275, %273 : vector<16x128xf32>
    %277 = arith.mulf %268, %216 : vector<16x128xf32>
    %278 = arith.addf %276, %277 : vector<16x128xf32>
    %c4_i32_92 = arith.constant 4 : i32
    %279 = arith.muli %arg0, %c4_i32_92 : i32
    %c2_i32_93 = arith.constant 2 : i32
    %280 = arith.addi %279, %c2_i32_93 : i32
    %c10_i32_94 = arith.constant 10 : i32
    %281 = arith.cmpi slt, %280, %c10_i32_94 : i32
    %282 = arith.extui %281 : i1 to i32
    %283 = arith.sitofp %282 : i32 to f32
    %c2_i32_95 = arith.constant 2 : i32
    %284 = arith.subi %c2_i32_95, %arg0 : i32
    %c4_i32_96 = arith.constant 4 : i32
    %285 = arith.muli %284, %c4_i32_96 : i32
    %c1_i32_97 = arith.constant 1 : i32
    %286 = arith.addi %285, %c1_i32_97 : i32
    %c10_i32_98 = arith.constant 10 : i32
    %287 = arith.cmpi slt, %286, %c10_i32_98 : i32
    %288 = arith.extui %287 : i1 to i32
    %289 = arith.sitofp %288 : i32 to f32
    %290 = arith.subf %247, %215 : vector<16x128xf32>
    %291 = vector.broadcast %283 : f32 to vector<16x128xf32>
    %292 = arith.mulf %291, %290 : vector<16x128xf32>
    %293 = arith.addf %215, %292 : vector<16x128xf32>
    %294 = arith.subf %278, %216 : vector<16x128xf32>
    %295 = vector.broadcast %289 : f32 to vector<16x128xf32>
    %296 = arith.mulf %295, %294 : vector<16x128xf32>
    %297 = arith.addf %216, %296 : vector<16x128xf32>
    %c0_99 = arith.constant 0 : index
    %c0_100 = arith.constant 0 : index
    %298 = vector.load %arg10[%c0_99, %c0_100] : memref<16x128xf32, #tpu.memory_space<vmem>>, vector<16x128xf32>
    tpu.vector_store %arg10[%c0_99, %c0_100], %293 {strides = array<i32>} : memref<16x128xf32, #tpu.memory_space<vmem>>, vector<16x128xf32>,
    %c0_101 = arith.constant 0 : index
    %c0_102 = arith.constant 0 : index
    %299 = vector.load %arg11[%c0_101, %c0_102] : memref<16x128xf32, #tpu.memory_space<vmem>>, vector<16x128xf32>
    tpu.vector_store %arg11[%c0_101, %c0_102], %297 {strides = array<i32>} : memref<16x128xf32, #tpu.memory_space<vmem>>, vector<16x128xf32>,
    %300 = arith.truncf %293 : vector<16x128xf32> to vector<16x128xbf16>
    %c0_103 = arith.constant 0 : index
    %c32_104 = arith.constant 32 : index
    %c0_105 = arith.constant 0 : index
    %301 = vector.load %arg7[%c0_103, %c32_104, %c0_105] : memref<1x64x128xbf16, #tpu.memory_space<vmem>>, vector<1x16x128xbf16>
    %302 = vector.shape_cast %301 : vector<1x16x128xbf16> to vector<16x128xbf16>
    %303 = vector.shape_cast %300 : vector<16x128xbf16> to vector<1x16x128xbf16>
    tpu.vector_store %arg7[%c0_103, %c32_104, %c0_105], %303 {strides = array<i32>} : memref<1x64x128xbf16, #tpu.memory_space<vmem>>, vector<1x16x128xbf16>,
    %304 = arith.truncf %297 : vector<16x128xf32> to vector<16x128xbf16>
    %c0_106 = arith.constant 0 : index
    %c16_107 = arith.constant 16 : index
    %c0_108 = arith.constant 0 : index
    %305 = vector.load %arg8[%c0_106, %c16_107, %c0_108] : memref<1x64x128xbf16, #tpu.memory_space<vmem>>, vector<1x16x128xbf16>
    %306 = vector.shape_cast %305 : vector<1x16x128xbf16> to vector<16x128xbf16>
    %307 = vector.shape_cast %304 : vector<16x128xbf16> to vector<1x16x128xbf16>
    tpu.vector_store %arg8[%c0_106, %c16_107, %c0_108], %307 {strides = array<i32>} : memref<1x64x128xbf16, #tpu.memory_space<vmem>>, vector<1x16x128xbf16>,
    %c0_109 = arith.constant 0 : index
    %c0_110 = arith.constant 0 : index
    %308 = vector.load %arg10[%c0_109, %c0_110] : memref<16x128xf32, #tpu.memory_space<vmem>>, vector<16x128xf32>
    %c0_111 = arith.constant 0 : index
    %c0_112 = arith.constant 0 : index
    %309 = vector.load %arg11[%c0_111, %c0_112] : memref<16x128xf32, #tpu.memory_space<vmem>>, vector<16x128xf32>
    %310 = vector.extract_strided_slice %11 {offsets = [48, 0], sizes = [16, 384], strides = [1, 1]} : vector<64x384xf32> to vector<16x384xf32>
    %311 = arith.truncf %308 : vector<16x128xf32> to vector<16x128xbf16>
    %cst_113 = arith.constant dense<0.000000e+00> : vector<16x384xf32>
    %312 = tpu.matmul %311, %22, %cst_113 {dimension_numbers = #tpu.dot_dimension_numbers<[1], [0], [0], [1], [0, 0, 1, 1], [], []>} : vector<16x128xbf16>, vector<128x384xbf16>, vector<16x384xf32> -> vector<16x384xf32>
    %313 = vector.broadcast %26 : vector<1x384xf32> to vector<16x384xf32>
    %314 = arith.addf %312, %313 : vector<16x384xf32>
    %315 = vector.extract_strided_slice %310 {offsets = [0, 0], sizes = [16, 128], strides = [1, 1]} : vector<16x384xf32> to vector<16x128xf32>
    %316 = vector.extract_strided_slice %314 {offsets = [0, 0], sizes = [16, 128], strides = [1, 1]} : vector<16x384xf32> to vector<16x128xf32>
    %317 = arith.addf %315, %316 : vector<16x128xf32>
    %318 = arith.negf %317 : vector<16x128xf32>
    %319 = math.exp %318 : vector<16x128xf32>
    %cst_114 = arith.constant 1.000000e+00 : f32
    %320 = vector.broadcast %cst_114 : f32 to vector<16x128xf32>
    %321 = arith.addf %320, %319 : vector<16x128xf32>
    %322 = arith.divf %320, %321 : vector<16x128xf32>
    %323 = vector.extract_strided_slice %310 {offsets = [0, 128], sizes = [16, 128], strides = [1, 1]} : vector<16x384xf32> to vector<16x128xf32>
    %324 = vector.extract_strided_slice %314 {offsets = [0, 128], sizes = [16, 128], strides = [1, 1]} : vector<16x384xf32> to vector<16x128xf32>
    %325 = arith.addf %323, %324 : vector<16x128xf32>
    %326 = arith.negf %325 : vector<16x128xf32>
    %327 = math.exp %326 : vector<16x128xf32>
    %cst_115 = arith.constant 1.000000e+00 : f32
    %328 = vector.broadcast %cst_115 : f32 to vector<16x128xf32>
    %329 = arith.addf %328, %327 : vector<16x128xf32>
    %330 = arith.divf %328, %329 : vector<16x128xf32>
    %331 = vector.extract_strided_slice %310 {offsets = [0, 256], sizes = [16, 128], strides = [1, 1]} : vector<16x384xf32> to vector<16x128xf32>
    %332 = vector.extract_strided_slice %314 {offsets = [0, 256], sizes = [16, 128], strides = [1, 1]} : vector<16x384xf32> to vector<16x128xf32>
    %333 = arith.mulf %322, %332 : vector<16x128xf32>
    %334 = arith.addf %331, %333 : vector<16x128xf32>
    %335 = math.tanh %334 : vector<16x128xf32>
    %cst_116 = arith.constant 1.000000e+00 : f32
    %336 = vector.broadcast %cst_116 : f32 to vector<16x128xf32>
    %337 = arith.subf %336, %330 : vector<16x128xf32>
    %338 = arith.mulf %337, %335 : vector<16x128xf32>
    %339 = arith.mulf %330, %308 : vector<16x128xf32>
    %340 = arith.addf %338, %339 : vector<16x128xf32>
    %341 = vector.extract_strided_slice %20 {offsets = [0, 0], sizes = [16, 384], strides = [1, 1]} : vector<64x384xf32> to vector<16x384xf32>
    %342 = arith.truncf %309 : vector<16x128xf32> to vector<16x128xbf16>
    %cst_117 = arith.constant dense<0.000000e+00> : vector<16x384xf32>
    %343 = tpu.matmul %342, %24, %cst_117 {dimension_numbers = #tpu.dot_dimension_numbers<[1], [0], [0], [1], [0, 0, 1, 1], [], []>} : vector<16x128xbf16>, vector<128x384xbf16>, vector<16x384xf32> -> vector<16x384xf32>
    %344 = vector.broadcast %28 : vector<1x384xf32> to vector<16x384xf32>
    %345 = arith.addf %343, %344 : vector<16x384xf32>
    %346 = vector.extract_strided_slice %341 {offsets = [0, 0], sizes = [16, 128], strides = [1, 1]} : vector<16x384xf32> to vector<16x128xf32>
    %347 = vector.extract_strided_slice %345 {offsets = [0, 0], sizes = [16, 128], strides = [1, 1]} : vector<16x384xf32> to vector<16x128xf32>
    %348 = arith.addf %346, %347 : vector<16x128xf32>
    %349 = arith.negf %348 : vector<16x128xf32>
    %350 = math.exp %349 : vector<16x128xf32>
    %cst_118 = arith.constant 1.000000e+00 : f32
    %351 = vector.broadcast %cst_118 : f32 to vector<16x128xf32>
    %352 = arith.addf %351, %350 : vector<16x128xf32>
    %353 = arith.divf %351, %352 : vector<16x128xf32>
    %354 = vector.extract_strided_slice %341 {offsets = [0, 128], sizes = [16, 128], strides = [1, 1]} : vector<16x384xf32> to vector<16x128xf32>
    %355 = vector.extract_strided_slice %345 {offsets = [0, 128], sizes = [16, 128], strides = [1, 1]} : vector<16x384xf32> to vector<16x128xf32>
    %356 = arith.addf %354, %355 : vector<16x128xf32>
    %357 = arith.negf %356 : vector<16x128xf32>
    %358 = math.exp %357 : vector<16x128xf32>
    %cst_119 = arith.constant 1.000000e+00 : f32
    %359 = vector.broadcast %cst_119 : f32 to vector<16x128xf32>
    %360 = arith.addf %359, %358 : vector<16x128xf32>
    %361 = arith.divf %359, %360 : vector<16x128xf32>
    %362 = vector.extract_strided_slice %341 {offsets = [0, 256], sizes = [16, 128], strides = [1, 1]} : vector<16x384xf32> to vector<16x128xf32>
    %363 = vector.extract_strided_slice %345 {offsets = [0, 256], sizes = [16, 128], strides = [1, 1]} : vector<16x384xf32> to vector<16x128xf32>
    %364 = arith.mulf %353, %363 : vector<16x128xf32>
    %365 = arith.addf %362, %364 : vector<16x128xf32>
    %366 = math.tanh %365 : vector<16x128xf32>
    %cst_120 = arith.constant 1.000000e+00 : f32
    %367 = vector.broadcast %cst_120 : f32 to vector<16x128xf32>
    %368 = arith.subf %367, %361 : vector<16x128xf32>
    %369 = arith.mulf %368, %366 : vector<16x128xf32>
    %370 = arith.mulf %361, %309 : vector<16x128xf32>
    %371 = arith.addf %369, %370 : vector<16x128xf32>
    %c4_i32_121 = arith.constant 4 : i32
    %372 = arith.muli %arg0, %c4_i32_121 : i32
    %c3_i32_122 = arith.constant 3 : i32
    %373 = arith.addi %372, %c3_i32_122 : i32
    %c10_i32_123 = arith.constant 10 : i32
    %374 = arith.cmpi slt, %373, %c10_i32_123 : i32
    %375 = arith.extui %374 : i1 to i32
    %376 = arith.sitofp %375 : i32 to f32
    %c2_i32_124 = arith.constant 2 : i32
    %377 = arith.subi %c2_i32_124, %arg0 : i32
    %c4_i32_125 = arith.constant 4 : i32
    %378 = arith.muli %377, %c4_i32_125 : i32
    %c0_i32_126 = arith.constant 0 : i32
    %379 = arith.addi %378, %c0_i32_126 : i32
    %c10_i32_127 = arith.constant 10 : i32
    %380 = arith.cmpi slt, %379, %c10_i32_127 : i32
    %381 = arith.extui %380 : i1 to i32
    %382 = arith.sitofp %381 : i32 to f32
    %383 = arith.subf %340, %308 : vector<16x128xf32>
    %384 = vector.broadcast %376 : f32 to vector<16x128xf32>
    %385 = arith.mulf %384, %383 : vector<16x128xf32>
    %386 = arith.addf %308, %385 : vector<16x128xf32>
    %387 = arith.subf %371, %309 : vector<16x128xf32>
    %388 = vector.broadcast %382 : f32 to vector<16x128xf32>
    %389 = arith.mulf %388, %387 : vector<16x128xf32>
    %390 = arith.addf %309, %389 : vector<16x128xf32>
    %c0_128 = arith.constant 0 : index
    %c0_129 = arith.constant 0 : index
    %391 = vector.load %arg10[%c0_128, %c0_129] : memref<16x128xf32, #tpu.memory_space<vmem>>, vector<16x128xf32>
    tpu.vector_store %arg10[%c0_128, %c0_129], %386 {strides = array<i32>} : memref<16x128xf32, #tpu.memory_space<vmem>>, vector<16x128xf32>,
    %c0_130 = arith.constant 0 : index
    %c0_131 = arith.constant 0 : index
    %392 = vector.load %arg11[%c0_130, %c0_131] : memref<16x128xf32, #tpu.memory_space<vmem>>, vector<16x128xf32>
    tpu.vector_store %arg11[%c0_130, %c0_131], %390 {strides = array<i32>} : memref<16x128xf32, #tpu.memory_space<vmem>>, vector<16x128xf32>,
    %393 = arith.truncf %386 : vector<16x128xf32> to vector<16x128xbf16>
    %c0_132 = arith.constant 0 : index
    %c48_133 = arith.constant 48 : index
    %c0_134 = arith.constant 0 : index
    %394 = vector.load %arg7[%c0_132, %c48_133, %c0_134] : memref<1x64x128xbf16, #tpu.memory_space<vmem>>, vector<1x16x128xbf16>
    %395 = vector.shape_cast %394 : vector<1x16x128xbf16> to vector<16x128xbf16>
    %396 = vector.shape_cast %393 : vector<16x128xbf16> to vector<1x16x128xbf16>
    tpu.vector_store %arg7[%c0_132, %c48_133, %c0_134], %396 {strides = array<i32>} : memref<1x64x128xbf16, #tpu.memory_space<vmem>>, vector<1x16x128xbf16>,
    %397 = arith.truncf %390 : vector<16x128xf32> to vector<16x128xbf16>
    %c0_135 = arith.constant 0 : index
    %c0_136 = arith.constant 0 : index
    %c0_137 = arith.constant 0 : index
    %398 = vector.load %arg8[%c0_135, %c0_136, %c0_137] : memref<1x64x128xbf16, #tpu.memory_space<vmem>>, vector<1x16x128xbf16>
    %399 = vector.shape_cast %398 : vector<1x16x128xbf16> to vector<16x128xbf16>
    %400 = vector.shape_cast %397 : vector<16x128xbf16> to vector<1x16x128xbf16>
    tpu.vector_store %arg8[%c0_135, %c0_136, %c0_137], %400 {strides = array<i32>} : memref<1x64x128xbf16, #tpu.memory_space<vmem>>, vector<1x16x128xbf16>,
    %c2_i32_138 = arith.constant 2 : i32
    %401 = arith.cmpi eq, %arg0, %c2_i32_138 : i32
    %402 = arith.extui %401 : i1 to i32
    %c0_i32_139 = arith.constant 0 : i32
    %403 = arith.cmpi ne, %402, %c0_i32_139 : i32
    scf.if %403 {
      %c0_140 = arith.constant 0 : index
      %c0_141 = arith.constant 0 : index
      %404 = vector.load %arg10[%c0_140, %c0_141] : memref<16x128xf32, #tpu.memory_space<vmem>>, vector<16x128xf32>
      %c0_142 = arith.constant 0 : index
      %c0_143 = arith.constant 0 : index
      %c0_144 = arith.constant 0 : index
      %405 = vector.load %arg9[%c0_142, %c0_143, %c0_144] : memref<2x16x128xf32, #tpu.memory_space<vmem>>, vector<1x16x128xf32>
      %406 = vector.shape_cast %405 : vector<1x16x128xf32> to vector<16x128xf32>
      %407 = vector.shape_cast %404 : vector<16x128xf32> to vector<1x16x128xf32>
      tpu.vector_store %arg9[%c0_142, %c0_143, %c0_144], %407 {strides = array<i32>} : memref<2x16x128xf32, #tpu.memory_space<vmem>>, vector<1x16x128xf32>,
      %c0_145 = arith.constant 0 : index
      %c0_146 = arith.constant 0 : index
      %408 = vector.load %arg11[%c0_145, %c0_146] : memref<16x128xf32, #tpu.memory_space<vmem>>, vector<16x128xf32>
      %c1_147 = arith.constant 1 : index
      %c0_148 = arith.constant 0 : index
      %c0_149 = arith.constant 0 : index
      %409 = vector.load %arg9[%c1_147, %c0_148, %c0_149] : memref<2x16x128xf32, #tpu.memory_space<vmem>>, vector<1x16x128xf32>
      %410 = vector.shape_cast %409 : vector<1x16x128xf32> to vector<16x128xf32>
      %411 = vector.shape_cast %408 : vector<16x128xf32> to vector<1x16x128xf32>
      tpu.vector_store %arg9[%c1_147, %c0_148, %c0_149], %411 {strides = array<i32>} : memref<2x16x128xf32, #tpu.memory_space<vmem>>, vector<1x16x128xf32>,
    } else {
    }
    return
  }
  func.func @transform_0(%arg0: i32) -> (i32, i32, i32) {
    %c0_i32 = arith.constant 0 : i32
    %c0_i32_0 = arith.constant 0 : i32
    %c0_i32_1 = arith.constant 0 : i32
    return %arg0, %c0_i32, %c0_i32_0 : i32, i32, i32
  }
  func.func @transform_1(%arg0: i32) -> (i32, i32, i32) {
    %c2_i32 = arith.constant 2 : i32
    %0 = arith.subi %c2_i32, %arg0 : i32
    %c0_i32 = arith.constant 0 : i32
    %c0_i32_0 = arith.constant 0 : i32
    %c0_i32_1 = arith.constant 0 : i32
    return %0, %c0_i32, %c0_i32_0 : i32, i32, i32
  }
  func.func @transform_2(%arg0: i32) -> (i32, i32, i32) {
    %c0_i32 = arith.constant 0 : i32
    %c0_i32_0 = arith.constant 0 : i32
    %c0_i32_1 = arith.constant 0 : i32
    %c0_i32_2 = arith.constant 0 : i32
    return %c0_i32, %c0_i32_0, %c0_i32_1 : i32, i32, i32
  }
  func.func @transform_3(%arg0: i32) -> (i32, i32, i32) {
    %c0_i32 = arith.constant 0 : i32
    %c0_i32_0 = arith.constant 0 : i32
    %c0_i32_1 = arith.constant 0 : i32
    %c0_i32_2 = arith.constant 0 : i32
    return %c0_i32, %c0_i32_0, %c0_i32_1 : i32, i32, i32
  }
  func.func @transform_4(%arg0: i32) -> (i32, i32, i32) {
    %c0_i32 = arith.constant 0 : i32
    %c0_i32_0 = arith.constant 0 : i32
    %c0_i32_1 = arith.constant 0 : i32
    %c0_i32_2 = arith.constant 0 : i32
    return %c0_i32, %c0_i32_0, %c0_i32_1 : i32, i32, i32
  }
  func.func @transform_5(%arg0: i32) -> (i32, i32, i32) {
    %c0_i32 = arith.constant 0 : i32
    %c0_i32_0 = arith.constant 0 : i32
    %c0_i32_1 = arith.constant 0 : i32
    %c0_i32_2 = arith.constant 0 : i32
    return %c0_i32, %c0_i32_0, %c0_i32_1 : i32, i32, i32
  }
  func.func @transform_6(%arg0: i32) -> (i32, i32, i32) {
    %c0_i32 = arith.constant 0 : i32
    %c0_i32_0 = arith.constant 0 : i32
    %c0_i32_1 = arith.constant 0 : i32
    return %arg0, %c0_i32, %c0_i32_0 : i32, i32, i32
  }
  func.func @transform_7(%arg0: i32) -> (i32, i32, i32) {
    %c2_i32 = arith.constant 2 : i32
    %0 = arith.subi %c2_i32, %arg0 : i32
    %c0_i32 = arith.constant 0 : i32
    %c0_i32_0 = arith.constant 0 : i32
    %c0_i32_1 = arith.constant 0 : i32
    return %0, %c0_i32, %c0_i32_0 : i32, i32, i32
  }
  func.func @transform_8(%arg0: i32) -> (i32, i32, i32) {
    %c0_i32 = arith.constant 0 : i32
    %c0_i32_0 = arith.constant 0 : i32
    %c0_i32_1 = arith.constant 0 : i32
    %c0_i32_2 = arith.constant 0 : i32
    return %c0_i32, %c0_i32_0, %c0_i32_1 : i32, i32, i32
  }
}

</mosaic_0001>

<bundles_post_ra>
// kernel: tpu_custom_call.1
= control target key start
LH: loop header
LB: loop body
LE: loop exit
PB: predicated region body
PF: predicated region fallthrough
CT: control target
= control target key end

     0   :  { %s4860_s0 = inlined_call_operand.vmem [shape: bf16[3,64,32], index: 0, kind: input, shape index: {}]   ;;  %s4861_s1 = inlined_call_operand.vmem [shape: bf16[3,64,32], index: 1, kind: input, shape index: {}]   ;;  %s4862_s2 = inlined_call_operand.vmem [shape: bf16[2,32,384], index: 2, kind: input, shape index: {}]   ;;  %s4863_s3 = inlined_call_operand.vmem [shape: f32[2,1,384], index: 3, kind: input, shape index: {}]   ;;  %s4864_s4 = inlined_call_operand.hbm [shape: bf16[2,128,384], index: 4, kind: input, shape index: {}]   ;;  %s4865_s5 = inlined_call_operand.vmem [shape: f32[2,1,384], index: 5, kind: input, shape index: {}]   ;;  %s4866_s6 = inlined_call_operand.hbm [shape: bf16[3,64,128], index: 6, kind: output, shape index: {0}]   ;;  %s4867_s7 = inlined_call_operand.hbm [shape: bf16[3,64,128], index: 7, kind: output, shape index: {1}]   ;;  %s4868_s8 = inlined_call_operand.hbm [shape: f32[2,16,128], index: 8, kind: output, shape index: {2}]  }
   0x1   :  { %4915 = sst [smem:[#allocation61_spill]] %s4864_s4 }
   0x2   :  { %14 = vsyncpa [#allocation5], 0 }
   0x3   :  { %15 = vsyncpa [#allocation6], 0 }
   0x4   :  { %17 = vsyncpa [#allocation6 + $0x1], 0 }
   0x5   :  { %18 = vsyncpa [#allocation9], 0 }
   0x6   :  { %20 = vsyncpa [#allocation9 + $0x1], 0  ;;  %s3837_s27 = smov 0   ;;  %s3839_s28 = smov 0  }
   0x7   :  { %s3841_s29 = smov 0   ;;  %s3843_s30 = smov 0  }
   0x8   :  { %s3845_s9 = smov 0   ;;  %s3847_s10 = smov 0  }
   0x9   :  { %s3849_s11 = smov 0  }
   0xa LB: > { %4916 = sst [smem:[#allocation15_spill]] %s3756_s28  ;;  %s3873_s12 = sadd.s32 4294967295, %s3776_s11   ;;  %s3776_s11 = sphi %s3849_s11, %s5033_s11   ;;  %s3772_s10 = sphi %s3847_s10, %s5038_s10   ;;  %s3768_s9 = sphi %s3845_s9, %s5040_s9   ;;  %s3764_s30 = sphi %s3843_s30, %s5039_s30   ;;  %s3760_s29 = sphi %s3841_s29, %s5036_s29   ;;  %s3756_s28 = sphi %s3839_s28, %s5035_s28   ;;  %s3752_s27 = sphi %s3837_s27, %s5034_s27  }
   0xb   : > { %4917 = sst [smem:[#allocation16_spill]] %s3760_s29  ;;  %s4869_s13 = sadd.s32 4294967294, %s3776_s11  }
   0xc   : > { %4918 = sst [smem:[#allocation17_spill]] %s3772_s10  ;;  %s3877_s14 = sadd.s32 1, %s3776_s11  }
   0xd   : > { %4919 = sst [smem:[#allocation18_spill]] %s3877_s14  ;;  %s171_s15 = sadd.s32 1, %s3772_s10 }
   0xe   : > { %s168_s16 = ssub.s32 %s3776_s11, %s3877_s14  ;;  %p181_p0 = scmp.ne.s32.totalorder %s3772_s10, %s3768_s9 }
   0xf   : > { %p169_p1 = scmp.eq.s32.totalorder %s168_s16, 0  ;;  %p4871_p2 = scmp.eq.s32.totalorder %s3873_s12, 2 }
  0x10   : > { %p187_p3 = scmp.ne.s32.totalorder %s3768_s9, %s3764_s30  ;;  %p3889_p4 = scmp.eq.s32.totalorder %s4869_s13, 2 }
  0x11   : > { %s3894_s18 = scalar_select %p169_p1, %s3772_s10, %s171_s15  }
  0x12   : > { %p3898_p5 = por %p4871_p2, %p181_p0  ;;  %p3904_p6 = por %p3889_p4, %p187_p3 }
  0x13   : > { %4921 = sst [smem:[#allocation19_spill]] %s3894_s18  ;;  %s194_s21 = ssub.s32 2, %s3776_s11 }
  0x14   : > { %s4922_s19 = scalar_select %p3898_p5, 1, 0 }
  0x15   : > { %s4923_s20 = scalar_select %p3904_p6, 1, 0 }
  0x16   : > { %s195_s22 = ssub.s32 2, %s3877_s14  ;;  %s199_s24 = sadd.s32 1, %s3760_s29 }
  0x17   : > { %s196_s23 = ssub.s32 %s194_s21, %s195_s22  ;;  %p209_p8 = scmp.ne.s32.totalorder %s3760_s29, %s3756_s28 }
  0x18   : > { %p197_p7 = scmp.eq.s32.totalorder %s196_s23, 0  ;;  %p215_p9 = scmp.ne.s32.totalorder %s3756_s28, %s3752_s27 }
  0x19   : > { %p2603_p10 = scmp.ge.s32.totalorder %s3776_s11, 1  ;;  %p3921_p11 = por %p209_p8, %p4871_p2 }
  0x1a   : > { %s3917_s25 = scalar_select %p197_p7, %s3760_s29, %s199_s24  }
  0x1b   : > { %s4925_s26 = scalar_select %p3921_p11, 1, 0 }
  0x1c   : > { %4924 = sst [smem:[#allocation20_spill]] %s3917_s25  ;;  %p3927_p12 = por %p215_p9, %p3889_p4 }
  0x1d   : > { %p244_p13 = scmp.lt.s32.totalorder %s3776_s11, 4  ;;  %p4872_p1 = scmp.eq.s32.totalorder %s3873_s12, 0 }
  0x1e   : > { %s4926_s15 = scalar_select %p3927_p12, 1, 0 }
  0x1f   : > { %p3934_p3 = pnand %p2603_p10, %p244_p13  ;;  %s3778_s27 = smov [#allocation4]  }
  0x20   : > { %s262_s21 = sshll.u32 %s3778_s27, 4  ;;  %s4929_s4 = sld [smem:[#allocation61_spill]]  ;;  %s263_s21 = int_to_ptr.vmem [resolvable:$true] %s262_s21 }
  0x21   : > { %s4927_s16 = scalar_select %p3934_p3, 1, 0 }
  0x22   : > { %p3216_p7 = pneg %p3934_p3 }
  0x24   : > { %p3942_p8 = pnand %p4872_p1, %p3216_p7 }
  0x26   : > { %s3596_s24 = scalar_lea.hbm %s4929_s4, 6144  ;;  %p3598_p9 = pneg %p3942_p8 }
  0x27   : > { %p3597_p4 = scmp.ne.s32.totalorder %s4929_s4, %s3596_s24  ;;  %p3603_p7 = scmp.lt.u32.totalorder %s3596_s24, %s4929_s4 }
  0x29   : > { %p3599_p10 = pnand %p3598_p9, %p3597_p4 }
  0x2b   : > { %p3600_p13 = pneg %p3599_p10 }
  0x2d   : > { %p3605_p2 = pnand %p3603_p7, %p3600_p13 }
  0x2f   : > { %3608 = shalt.err (!%p3605_p2)
}
  0x30   : > { %s3609_s25 = scalar_lea.vmem %s263_s21, 6144  ;;  %p3617_p6 = scmp.lt.s32.totalorder %s263_s21, %s263_s21 }
  0x31   : > { %p3610_p0 = scmp.ne.s32.totalorder %s263_s21, %s3609_s25  ;;  %p3618_p5 = scmp.lt.s32.totalorder %s3609_s25, %s3609_s25 }
  0x33   : > { %p3612_p1 = pnand %p3610_p0, %p3598_p9  ;;  %p3619_p11 = por %p3618_p5, %p3617_p6 }
  0x35   : > { %p3613_p12 = pneg %p3612_p1 }
  0x37   : > { %p3620_p3 = pnand %p3619_p11, %p3613_p12 }
  0x39   : > { %3623 = shalt.err (!%p3620_p3)
}
  0x3a   : > { %s3779_s13 = smov 192   ;;  %s3780_s18 = smov 12  }
  0x3b   : > { %3219 = dma.hbm_to_vmem [thread:$0]  (!%p3942_p8), %s4929_s4, 6144, %s263_s21, [#allocation5], %s3779_s13, %s3779_s13, %s3780_s18  }
  0x3c   : > { %p4930_p4 = scmp.ne.s32.totalorder %s4927_s16, 0 }
  0x3e   : > { %299 = sbr.rel (%p4930_p4) target bundleno = 1353 (0x549), region = 44 }
  0x45   : > { %p4931_p2 = scmp.eq.s32.totalorder %s3873_s12, 0 }
  0x47   : > { %3735 = dma.done.wait (%p4931_p2), [#allocation5], 6144   ;;  %p4932_p0 = pmov %p4931_p2 }
  0x48   : > { %s4878_s10 = sand.u32 1, %s3768_s9   ;;  %s339_s25 = sand.u32 1, %s3756_s28  }
  0x49   : > { %3737 = vsyncadd (%p4932_p0), [#allocation5], 4294961152  ;;  %s2608_s17 = sshll.u32 %s4878_s10, 5  ;;  %s2609_s21 = sshll.u32 %s339_s25, 5 }
  0x4a   : > { %p344_p5 = scmp.lt.s32.totalorder %s3873_s12, 2  ;;  %s3974_s16 = ssub.s32 2, %s3873_s12 }
  0x4b   : > { %p350_p6 = scmp.lt.s32.totalorder %s3974_s16, 2  ;;  %s3989_s25 = scalar_lea.vmem [#allocation7], %s2608_s17 }
  0x4c   : > { %s345_s24 = scalar_select %p344_p5, %s3873_s12, 2 }
  0x4d   : > { %s351_s27 = scalar_select %p350_p6, %s3974_s16, 2 }
  0x4e   : > { %s2770_s13 = sshll.u32 %s345_s24, 5  ;;  %s3991_s14 = scalar_lea.vmem [#allocation8], %s2609_s21 }
  0x4f   : > { %s3982_s23 = scalar_lea.vmem %s4860_s0, %s2770_s13  ;;  %s2771_s4 = sshll.u32 %s351_s27, 5 }
  0x50   : > { %s3987_s10 = scalar_lea.vmem %s4861_s1, %s2771_s4  ;;  %p4933_p11 = scmp.ne.s32.totalorder %s3873_s12, 0 }
  0x51   : > { %v3781_v0 = vmov (!%p4933_p11), 0.0  }
  0x52   : > { %361 = sbr.rel (%p4933_p11) target bundleno = 89 (0x59), region = 52  ;;  %362 = vst [vmem:[#allocation2] sm:$0xff] (!%p4933_p11), %v3781_v0  ;;  %363 = vst [vmem:[#allocation2 + $0x8] sm:$0xff] (!%p4933_p11), %v3781_v0 }
  0x53   : > { %364 = vst [vmem:[#allocation3] sm:$0xff] (!%p4933_p11), %v3781_v0  ;;  %365 = vst [vmem:[#allocation3 + $0x8] sm:$0xff] (!%p4933_p11), %v3781_v0 }
  0x59 PF: > { %v3300_v1 = vld [vmem:[%s4862_s2 + $0x4] ss:$12 sps:$4 sm:$0xff]   ;;  %v3302_v2 = vld [vmem:[%s4862_s2] ss:$12 sps:$4 sm:$0xff]   ;;  %v4881_v3 = vmov 0   ;;  %v3307_v7 = vld [vmem:[%s3982_s23 + $0x18] sm:$0xff]  }
  0x5a   : > { %496 = vmatprep.mubr.bf16.mxu0 %v4881_v3  ;;  %526 = vmatprep.mubr.bf16.mxu1 %v4881_v3  ;;  %v3303_v4 = vld [vmem:[%s4862_s2 + $0x1c] ss:$12 sps:$4 sm:$0xff]   ;;  %v3305_v5 = vld [vmem:[%s4862_s2 + $0x18] ss:$12 sps:$4 sm:$0xff]   ;;  %vm451_vm0 = vcmask 261120   ;;  %v3316_v16 = vld [vmem:[%s3982_s23 + $0x10] sm:$0xff]  }
  0x5b   : > { %464 = vmatprep.subr.bf16.mxu0 %v3300_v1  ;;  %3104 = vmatprep.subr.bf16.mxu1 %v3300_v1  ;;  %v3306_v6 = vld [vmem:[%s3982_s23] sm:$0xff]   ;;  %v3308_v8 = vld [vmem:[%s4862_s2 + $0x8] ss:$12 sps:$4 sm:$0xff]   ;;  %v3315_v11 = vld [vmem:[%s4862_s2 + $0x50] ss:$12 sps:$4 sm:$0xff]   ;;  %v4883_v20 = vmov 0.0  }
  0x5c   : > { %465 = vmatpush1.bf16.msra.mxu0 %v3302_v2  ;;  %3106 = vmatpush1.bf16.msra.mxu1 %v3302_v2  ;;  %v3309_v9 = vld [vmem:[%s4862_s2 + $0x38] ss:$12 sps:$4 sm:$0xff]   ;;  %v3310_v10 = vld [vmem:[%s4862_s2 + $0x20] ss:$12 sps:$4 sm:$0xff]   ;;  %v3312_v14 = vld [vmem:[%s4862_s2 + $0x30] ss:$12 sps:$4 sm:$0xff]  }
  0x5d   : > { %466 = vmatprep.subr.bf16.mxu0 %v3303_v4  ;;  %3105 = vmatprep.subr.bf16.mxu1 %v3303_v4  ;;  %v3314_v12 = vld [vmem:[%s4862_s2 + $0x34] ss:$12 sps:$4 sm:$0xff]   ;;  %v3311_v13 = vld [vmem:[%s3982_s23 + $0x8] sm:$0xff]   ;;  %v4034_v15 = vld [vmem:[#allocation4 + $0x4] ss:$12 sps:$4 sm:$0xff]   ;;  %vm3784_vm1 = vmmov 0  }
  0x5e   : > { %v3319_v17 = vld [vmem:[%s4862_s2 + $0x4c] ss:$12 sps:$4 sm:$0xff]   ;;  %v3317_v18 = vld [vmem:[%s4862_s2 + $0x48] ss:$12 sps:$4 sm:$0xff]   ;;  %v3320_v19 = vld [vmem:[%s3987_s10] sm:$0xff]   ;;  %s4393_s24 = sshll.u32 %s3873_s12, 2 }
  0x5f   : > { %v3323_v21 = vld [vmem:[%s3987_s10 + $0x8] sm:$0xff]   ;;  %v4063_v25 = vld [vmem:[#allocation4 + $0x18] ss:$12 sps:$4 sm:$0xff]   ;;  %v3340_v27 = vld [vmem:[%s3987_s10 + $0x10] sm:$0xff]   ;;  %p1454_p12 = scmp.lt.s32.totalorder %s4393_s24, 10  ;;  %s4425_s28 = sshll.u32 %s3974_s16, 2 }
  0x60   : > { %467 = vmatpush1.bf16.msra.mxu0 %v3305_v5  ;;  %3107 = vmatpush1.bf16.msra.mxu1 %v3305_v5  ;;  %v4055_v22 = vld [vmem:[#allocation4] ss:$12 sps:$4 sm:$0xff]   ;;  %v4057_v23 = vld [vmem:[#allocation4 + $0x8] ss:$12 sps:$4 sm:$0xff]   ;;  %v4075_v29 = vld [vmem:[#allocation4 + $0x30] ss:$12 sps:$4 sm:$0xff]  }
  0x61   : > { %2920 = vmatprep.subr.bf16.mxu1 %v3308_v8  ;;  %2932 = vmatprep.subr.bf16.mxu0 %v3309_v9  ;;  %v4059_v24 = vld [vmem:[#allocation4 + $0x1c] ss:$12 sps:$4 sm:$0xff]   ;;  %v4065_v26 = vld [vmem:[#allocation4 + $0x20] ss:$12 sps:$4 sm:$0xff]   ;;  %4934 = vst [vmem:[#allocation21_spill] sm:$0xff] %v4075_v29  ;;  %s1759_s21 = sadd.s32 1, %s4393_s24 }
  0x62   : > { %v4072_v28 = vld [vmem:[#allocation4 + $0x34] ss:$12 sps:$4 sm:$0xff]   ;;  %v3347_v30 = vld [vmem:[%s3987_s10 + $0x18] sm:$0xff]   ;;  %v4097_v35 = vld [vmem:[#allocation4 + $0x64] ss:$12 sps:$4 sm:$0xff]   ;;  %s1459_s10 = sadd.s32 3, %s4425_s28 }
  0x63   : > { %2625 = vmatmul.mubr.msk.bf16.vlgmr.msra.gmra.mrb[0].mxu0 %vm451_vm0, %v3306_v6  ;;  %2628 = vmatmul.mubr.msk.bf16.vlgmr.msra.gmra.mrb[0].mxu1 %vm451_vm0, %v3307_v7  ;;  %v4081_v31 = vld [vmem:[#allocation4 + $0x38] ss:$12 sps:$4 sm:$0xff]   ;;  %v4088_v33 = vld [vmem:[#allocation4 + $0x48] ss:$12 sps:$4 sm:$0xff]   ;;  %v4093_v34 = vld [vmem:[#allocation4 + $0x50] ss:$12 sps:$4 sm:$0xff]  }
  0x64   : > { %2921 = vmatpush3.bf16.msra.mxu1 %v3308_v8  ;;  %2933 = vmatpush3.bf16.msra.mxu0 %v3309_v9  ;;  %4935 = vst [vmem:[#allocation22_spill] sm:$0xff] %v4081_v31  ;;  %v4085_v32 = vld [vmem:[#allocation4 + $0x4c] ss:$12 sps:$4 sm:$0xff]   ;;  %4937 = vst [vmem:[#allocation24_spill] sm:$0xff] %v4088_v33  ;;  %v4105_v37 = vld [vmem:[#allocation4 + $0x68] ss:$12 sps:$4 sm:$0xff]  }
  0x65   : > { %2922 = vmatprep.subr.bf16.mxu1 %v3310_v10  ;;  %506 = vmatprep.mubr.bf16.mxu0 %v4881_v3  ;;  %4936 = vst [vmem:[#allocation23_spill] sm:$0xff] %v4085_v32  ;;  %4938 = vst [vmem:[#allocation25_spill] sm:$0xff] %v4093_v34  ;;  %v4101_v36 = vld [vmem:[#allocation4 + $0x60] ss:$12 sps:$4 sm:$0xff]   ;;  %v4109_v38 = vld [vmem:[#allocation4 + $0x7c] ss:$12 sps:$4 sm:$0xff]  }
  0x66   : > { %2924 = vmatprep.mubr.msk.bf16.mxu1 %vm451_vm0, %v3306_v6  ;;  %2934 = vmatprep.subr.bf16.mxu0 %v3315_v11  ;;  %4939 = vst [vmem:[#allocation26_spill] sm:$0xff] %v4097_v35  ;;  %4940 = vst [vmem:[#allocation27_spill] sm:$0xff] %v4101_v36  ;;  %v4112_v39 = vld [vmem:[#allocation4 + $0x78] ss:$12 sps:$4 sm:$0xff]   ;;  %v4116_v40 = vld [vmem:[#allocation4 + $0x80] ss:$12 sps:$4 sm:$0xff]  }
  0x67   : > { %4941 = vst [vmem:[#allocation28_spill] sm:$0xff] %v4105_v37  ;;  %4942 = vst [vmem:[#allocation29_spill] sm:$0xff] %v4109_v38  ;;  %v4120_v41 = vld [vmem:[#allocation4 + $0x94] ss:$12 sps:$4 sm:$0xff]   ;;  %v4123_v42 = vld [vmem:[#allocation4 + $0x90] ss:$12 sps:$4 sm:$0xff]  }
  0x68   : > { %2923 = vmatpush3.bf16.msra.mxu1 %v3310_v10  ;;  %2935 = vmatpush3.bf16.msra.mxu0 %v3315_v11  ;;  %4943 = vst [vmem:[#allocation30_spill] sm:$0xff] %v4112_v39  ;;  %4944 = vst [vmem:[#allocation31_spill] sm:$0xff] %v4116_v40  ;;  %v4127_v43 = vld [vmem:[#allocation4 + $0x98] ss:$12 sps:$4 sm:$0xff]   ;;  %v4134_v45 = vld [vmem:[#allocation4 + $0xa8] ss:$12 sps:$4 sm:$0xff]  }
  0x69   : > { %701 = vmatprep.subr.bf16.mxu1 %v3314_v12  ;;  %1056 = vmatprep.subr.bf16.mxu0 %v4034_v15  ;;  %4945 = vst [vmem:[#allocation32_spill] sm:$0xff] %v4120_v41  ;;  %4946 = vst [vmem:[#allocation33_spill] sm:$0xff] %v4123_v42  ;;  %v4131_v44 = vld [vmem:[#allocation4 + $0xac] ss:$12 sps:$4 sm:$0xff]   ;;  %v4138_v46 = vld [vmem:[#allocation4 + $0xb0] ss:$12 sps:$4 sm:$0xff]  }
  0x6a   : > { %4947 = vst [vmem:[#allocation34_spill] sm:$0xff] %v4127_v43  ;;  %4948 = vst [vmem:[#allocation35_spill] sm:$0xff] %v4131_v44  ;;  %v4140_v47 = vld [vmem:[#allocation2] sm:$0xff]  ;;  %v4142_v48 = vld [vmem:[#allocation2 + $0x8] sm:$0xff]  ;;  %s1455_s27 = scalar_select %p1454_p12, 1, 0 }
  0x6b   : > { %2626 = vmatmul.mubr.msk.bf16.gmra.mrb[4].mxu0 %vm451_vm0, %v3311_v13  ;;  %2925 = vmatmul.mubr.msk.bf16.vlgmr.msra.gmra.mrb[4].mxu1 %vm451_vm0, %v3311_v13  ;;  %4949 = vst [vmem:[#allocation36_spill] sm:$0xff] %v4134_v45  ;;  %4950 = vst [vmem:[#allocation37_spill] sm:$0xff] %v4138_v46  ;;  %v4146_v49 = vld [vmem:[#allocation4 + $0xc4] ss:$12 sps:$4 sm:$0xff]   ;;  %v911_v50 = vpack.c.bf16 %v4142_v48, %v4140_v47  ;;  %v4154_v51 = vld [vmem:[#allocation4 + $0xc0] ss:$12 sps:$4 sm:$0xff]  }
  0x6c   : > { %702 = vmatpush1.bf16.msra.mxu1 %v3312_v14  ;;  %516 = vmatprep.mubr.bf16.mxu0 %v4881_v3  ;;  %4951 = vst [vmem:[#allocation38_spill] sm:$0xff] %v4146_v49  ;;  %v4156_v52 = vld [vmem:[#allocation4 + $0xc8] ss:$12 sps:$4 sm:$0xff]   ;;  %v4163_v54 = vld [vmem:[#allocation4 + $0xd8] ss:$12 sps:$4 sm:$0xff]   ;;  %v384_v14 = vlaneseq  ;;  %s1456_s4 = scvt.s32.f32 %s1455_s27  ;;  %p4438_p1 = scmp.lt.s32.totalorder %s1459_s10, 10 }
  0x6d   : > { %2928 = vmatprep.mubr.msk.bf16.mxu1 %vm451_vm0, %v3316_v16  ;;  %703 = vmatprep.subr.bf16.mxu1 %v3319_v17  ;;  %v4159_v53 = vld [vmem:[#allocation4 + $0xdc] ss:$12 sps:$4 sm:$0xff]   ;;  %v4166_v55 = vld [vmem:[#allocation4 + $0xe0] ss:$12 sps:$4 sm:$0xff]   ;;  %v4179_v58 = vld [vmem:[#allocation4 + $0xf8] ss:$12 sps:$4 sm:$0xff]  }
  0x6e   : > { %v4169_v56 = vld [vmem:[#allocation4 + $0xf4] ss:$12 sps:$4 sm:$0xff]   ;;  %v4176_v57 = vld [vmem:[#allocation4 + $0xf0] ss:$12 sps:$4 sm:$0xff]   ;;  %v4182_v59 = vld [vmem:[#allocation4 + $0x10c] ss:$12 sps:$4 sm:$0xff]  }
  0x6f   : > { %v4186_v60 = vld [vmem:[#allocation4 + $0x108] ss:$12 sps:$4 sm:$0xff]   ;;  %v4189_v61 = vld [vmem:[#allocation4 + $0x110] ss:$12 sps:$4 sm:$0xff]   ;;  %v4196_v63 = vld [vmem:[#allocation4 + $0x120] ss:$12 sps:$4 sm:$0xff]  }
  0x70   : > { %704 = vmatpush1.bf16.msra.mxu1 %v3317_v18  ;;  %v4192_v62 = vld [vmem:[#allocation4 + $0x124] ss:$12 sps:$4 sm:$0xff]   ;;  %v4199_v0 = vld [vmem:[#allocation4 + $0x128] ss:$12 sps:$4 sm:$0xff]   ;;  %v4209_v4 = vld [vmem:[#allocation4 + $0x140] ss:$12 sps:$4 sm:$0xff]  }
  0x71   : > { %2944 = vmatprep.subr.bf16.mxu1 %v4883_v20  ;;  %v4202_v1 = vld [vmem:[#allocation4 + $0x13c] ss:$12 sps:$4 sm:$0xff]   ;;  %v4206_v2 = vld [vmem:[#allocation4 + $0x138] ss:$12 sps:$4 sm:$0xff]   ;;  %v4212_v5 = vld [vmem:[#allocation4 + $0x154] ss:$12 sps:$4 sm:$0xff]  }
  0x72   : > { %v4216_v6 = vld [vmem:[#allocation4 + $0x150] ss:$12 sps:$4 sm:$0xff]   ;;  %v4222_v8 = vld [vmem:[#allocation4 + $0x16c] ss:$12 sps:$4 sm:$0xff]   ;;  %v4225_v9 = vld [vmem:[#allocation4 + $0x168] ss:$12 sps:$4 sm:$0xff]  }
  0x73   : > { %2627 = vmatmul.mubr.msk.bf16.gmra.mrb[8].mxu0 %vm451_vm0, %v3316_v16  ;;  %2929 = vmatmul.mubr.msk.bf16.gmra.mrb[8].mxu1 %vm451_vm0, %v3307_v7  ;;  %v4219_v7 = vld [vmem:[#allocation4 + $0x158] ss:$12 sps:$4 sm:$0xff]   ;;  %v4228_v10 = vld [vmem:[#allocation3] sm:$0xff]  ;;  %v385_v16 = vshrl.u32 %v384_v14, 7  ;;  %s1461_s29 = scalar_select %p4438_p1, 1, 0 }
  0x74   : > { %733 = vmatprep.mubr.bf16.mxu1 %v4881_v3  ;;  %2936 = vmatprep.mubr.msk.bf16.mxu0 %vm451_vm0, %v3320_v19  ;;  %v4230_v11 = vld [vmem:[#allocation3 + $0x8] sm:$0xff]  ;;  %p4526_p3 = scmp.lt.s32.totalorder %s1759_s21, 10  ;;  %s1763_s27 = sadd.s32 2, %s4425_s28 }
  0x75   : > { %v4233_v12 = vld [vmem:[#allocation4 + $0x170] ss:$12 sps:$4 sm:$0xff]   ;;  %v1182_v13 = vpack.c.bf16 %v4230_v11, %v4228_v10  ;;  %v4280_v18 = vsub.s32 2, %v385_v16  ;;  %s1462_s17 = scvt.s32.f32 %s1461_s29  ;;  %p4564_p8 = scmp.lt.s32.totalorder %s1763_s27, 10 }
  0x76   : > { %s1761_s18 = scalar_select %p4526_p3, 1, 0 }
  0x77   : > { %s1765_s10 = scalar_select %p4564_p8, 1, 0 }
  0x78   : > { %s1762_s22 = scvt.s32.f32 %s1761_s18  ;;  %s2063_s29 = sadd.s32 2, %s4393_s24 }
  0x79   : > { %s1766_s23 = scvt.s32.f32 %s1765_s10  ;;  %p4627_p9 = scmp.lt.s32.totalorder %s2063_s29, 10 }
  0x7a   : > { %s2067_s18 = sadd.s32 1, %s4425_s28  ;;  %s2367_s10 = sadd.s32 3, %s4393_s24 }
  0x7b   : > { %2652 = vmatmul.mubr.msk.bf16.vlgmr.msra.gmra.mrb[12].mxu1 %vm451_vm0, %v3320_v19  ;;  %2937 = vmatmul.mubr.msk.bf16.vlgmr.msra.gmra.mrb[12].mxu0 %vm451_vm0, %v3323_v21  ;;  %s2065_s21 = scalar_select %p4627_p9, 1, 0 }
  0x7c   : > { %1057 = vmatpush1.bf16.msra.mxu0 %v4055_v22  ;;  %2945 = vmatpush3.bf16.msra.mxu1 %v4057_v23  ;;  %p4659_p10 = scmp.lt.s32.totalorder %s2067_s18, 10  ;;  %p4704_p13 = scmp.lt.s32.totalorder %s2367_s10, 10 }
  0x7d   : > { %1058 = vmatprep.subr.bf16.mxu0 %v4059_v24  ;;  %2946 = vmatprep.subr.bf16.mxu1 %v4883_v20  ;;  %s2066_s13 = scvt.s32.f32 %s2065_s21  ;;  %p2371_p7 = scmp.lt.s32.totalorder %s4425_s28, 10 }
  0x7e   : > { %743 = vmatprep.mubr.bf16.mxu1 %v4881_v3  ;;  %2940 = vmatprep.mubr.msk.bf16.mxu0 %vm451_vm0, %v3340_v27  ;;  %s2069_s27 = scalar_select %p4659_p10, 1, 0 }
  0x7f   : > { %s2369_s24 = scalar_select %p4704_p13, 1, 0 }
  0x80   : > { %1059 = vmatpush1.bf16.msra.mxu0 %v4063_v25  ;;  %2947 = vmatpush3.bf16.msra.mxu1 %v4065_v26  ;;  %p2759_p4 = scmp.ne.s32.totalorder %s3873_s12, 2 }
  0x81   : > { %1060 = vmatprep.subr.bf16.mxu0 %v4072_v28  ;;  %2948 = vmatprep.subr.bf16.mxu1 %v4883_v20  ;;  %s2370_s29 = scvt.s32.f32 %s2369_s24 }
  0x83   : > { %2653 = vmatmul.mubr.msk.bf16.gmra.mrb[16].mxu1 %vm451_vm0, %v3323_v21  ;;  %2941 = vmatmul.mubr.msk.bf16.gmra.mrb[16].mxu0 %vm451_vm0, %v3347_v30 }
  0x84   : > { %1061 = vmatpush1.bf16.msra.mxu0 %v4075_v29  ;;  %2949 = vmatpush3.bf16.msra.mxu1 %v4081_v31 }
  0x85   : > { %1062 = vmatprep.subr.bf16.mxu0 %v4085_v32  ;;  %2950 = vmatprep.subr.bf16.mxu1 %v4883_v20 }
  0x86   : > { %753 = vmatprep.mubr.bf16.mxu1 %v4881_v3  ;;  %1088 = vmatprep.mubr.bf16.mxu0 %v4881_v3 }
  0x88   : > { %1063 = vmatpush1.bf16.msra.mxu0 %v4088_v33  ;;  %2951 = vmatpush3.bf16.msra.mxu1 %v4093_v34 }
  0x89   : > { %1064 = vmatprep.subr.bf16.mxu0 %v4097_v35  ;;  %2952 = vmatprep.subr.bf16.mxu1 %v4883_v20 }
  0x8b   : > { %2654 = vmatmul.mubr.msk.bf16.gmra.mrb[20].mxu1 %vm451_vm0, %v3340_v27 }
  0x8c   : > { %1065 = vmatpush1.bf16.msra.mxu0 %v4101_v36  ;;  %2953 = vmatpush3.bf16.msra.mxu1 %v4105_v37 }
  0x8d   : > { %1066 = vmatprep.subr.bf16.mxu0 %v4109_v38  ;;  %2954 = vmatprep.subr.bf16.mxu1 %v4883_v20 }
  0x8e   : > { %763 = vmatprep.mubr.bf16.mxu1 %v4881_v3 }
  0x90   : > { %1067 = vmatpush1.bf16.msra.mxu0 %v4112_v39  ;;  %2955 = vmatpush3.bf16.msra.mxu1 %v4116_v40 }
  0x91   : > { %1068 = vmatprep.subr.bf16.mxu0 %v4120_v41  ;;  %2956 = vmatprep.subr.bf16.mxu1 %v4883_v20 }
  0x93   : > { %2655 = vmatmul.mubr.msk.bf16.gmra.mrb[24].mxu1 %vm451_vm0, %v3347_v30  ;;  %v382_v30 = vld [vmem:[%s4863_s3] sm:$0x7] }
  0x94   : > { %1069 = vmatpush1.bf16.msra.mxu0 %v4123_v42  ;;  %2957 = vmatpush3.bf16.msra.mxu1 %v4127_v43 }
  0x95   : > { %1070 = vmatprep.subr.bf16.mxu0 %v4131_v44  ;;  %2958 = vmatprep.subr.bf16.mxu1 %v4883_v20 }
  0x96   : > { %2960 = vmatprep.mubr.msk.bf16.mxu1 %vm3784_vm1, %v4883_v20 }
  0x98   : > { %1071 = vmatpush1.bf16.msra.mxu0 %v4134_v45  ;;  %2959 = vmatpush3.bf16.msra.mxu1 %v4138_v46 }
  0x99   : > { %1327 = vmatprep.subr.bf16.mxu1 %v4146_v49  ;;  %2964 = vmatprep.subr.bf16.mxu0 %v4883_v20 }
  0x9b   : > { %1089 = vmatmul.mubr.bf16.vlgmr.msra.gmra.mrb[0].mxu0 %v911_v50  ;;  %2961 = vmatmul.mubr.bf16.vlgmr.msra.gmra.mrb[28].mxu1 %v911_v50  ;;  %v4292_v50 = vrot.slane %v382_v30, %v4280_v18 }
  0x9c   : > { %1328 = vmatpush1.bf16.msra.mxu1 %v4154_v51  ;;  %2965 = vmatpush3.bf16.msra.mxu0 %v4156_v52 }
  0x9d   : > { %1329 = vmatprep.subr.bf16.mxu1 %v4159_v53  ;;  %2966 = vmatprep.subr.bf16.mxu0 %v4883_v20 }
  0x9e   : > { %1359 = vmatprep.mubr.bf16.mxu1 %v4881_v3  ;;  %2980 = vmatprep.mubr.msk.bf16.mxu0 %vm3784_vm1, %v4883_v20 }
  0xa0   : > { %1330 = vmatpush1.bf16.msra.mxu1 %v4163_v54  ;;  %2967 = vmatpush3.bf16.msra.mxu0 %v4166_v55 }
  0xa1   : > { %1331 = vmatprep.subr.bf16.mxu1 %v4169_v56  ;;  %2968 = vmatprep.subr.bf16.mxu0 %v4883_v20 }
  0xa4   : > { %1332 = vmatpush1.bf16.msra.mxu1 %v4176_v57  ;;  %2969 = vmatpush3.bf16.msra.mxu0 %v4179_v58 }
  0xa5   : > { %1333 = vmatprep.subr.bf16.mxu1 %v4182_v59  ;;  %2970 = vmatprep.subr.bf16.mxu0 %v4883_v20 }
  0xa8   : > { %1334 = vmatpush1.bf16.msra.mxu1 %v4186_v60  ;;  %2971 = vmatpush3.bf16.msra.mxu0 %v4189_v61 }
  0xa9   : > { %1335 = vmatprep.subr.bf16.mxu1 %v4192_v62  ;;  %2972 = vmatprep.subr.bf16.mxu0 %v4883_v20 }
  0xac   : > { %1336 = vmatpush1.bf16.msra.mxu1 %v4196_v63  ;;  %2973 = vmatpush3.bf16.msra.mxu0 %v4199_v0 }
  0xad   : > { %1337 = vmatprep.subr.bf16.mxu1 %v4202_v1  ;;  %2974 = vmatprep.subr.bf16.mxu0 %v4883_v20 }
  0xb0   : > { %1338 = vmatpush1.bf16.msra.mxu1 %v4206_v2  ;;  %2975 = vmatpush3.bf16.msra.mxu0 %v4209_v4 }
  0xb1   : > { %1339 = vmatprep.subr.bf16.mxu1 %v4212_v5  ;;  %2976 = vmatprep.subr.bf16.mxu0 %v4883_v20 }
  0xb4   : > { %1340 = vmatpush1.bf16.msra.mxu1 %v4216_v6  ;;  %2977 = vmatpush3.bf16.msra.mxu0 %v4219_v7 }
  0xb5   : > { %1341 = vmatprep.subr.bf16.mxu1 %v4222_v8  ;;  %2978 = vmatprep.subr.bf16.mxu0 %v4883_v20 }
  0xb8   : > { %1342 = vmatpush1.bf16.msra.mxu1 %v4225_v9  ;;  %2979 = vmatpush3.bf16.msra.mxu0 %v4233_v12 }
  0xb9   : > { %1506 = vmatprep.subr.bf16.mxu0 %v4034_v15  ;;  %2984 = vmatprep.subr.bf16.mxu1 %v4883_v20 }
  0xbb   : > { %1360 = vmatmul.mubr.bf16.vlgmr.msra.gmra.mrb[24].mxu1 %v1182_v13  ;;  %2981 = vmatmul.mubr.bf16.vlgmr.msra.gmra.mrb[20].mxu0 %v1182_v13 }
  0xbc   : > { %1507 = vmatpush1.bf16.msra.mxu0 %v4055_v22  ;;  %2985 = vmatpush3.bf16.msra.mxu1 %v4057_v23 }
  0xbd   : > { %1508 = vmatprep.subr.bf16.mxu0 %v4059_v24  ;;  %2986 = vmatprep.subr.bf16.mxu1 %v4883_v20 }
  0xbe   : > { %1538 = vmatprep.mubr.bf16.mxu0 %v4881_v3  ;;  %3000 = vmatprep.mubr.msk.bf16.mxu1 %vm3784_vm1, %v4883_v20 }
  0xc0   : > { %1509 = vmatpush1.bf16.msra.mxu0 %v4063_v25  ;;  %2987 = vmatpush3.bf16.msra.mxu1 %v4065_v26 }
  0xc1   : > { %1510 = vmatprep.subr.bf16.mxu0 %v4072_v28  ;;  %2988 = vmatprep.subr.bf16.mxu1 %v4883_v20 }
  0xc4   : > { %1511 = vmatpush1.bf16.msra.mxu0 %v4075_v29  ;;  %2989 = vmatpush3.bf16.msra.mxu1 %v4081_v31 }
  0xc5   : > { %1512 = vmatprep.subr.bf16.mxu0 %v4085_v32  ;;  %2990 = vmatprep.subr.bf16.mxu1 %v4883_v20 }
  0xc8   : > { %1513 = vmatpush1.bf16.msra.mxu0 %v4088_v33  ;;  %2991 = vmatpush3.bf16.msra.mxu1 %v4093_v34 }
  0xc9   : > { %1514 = vmatprep.subr.bf16.mxu0 %v4097_v35  ;;  %2992 = vmatprep.subr.bf16.mxu1 %v4883_v20 }
  0xcc   : > { %1515 = vmatpush1.bf16.msra.mxu0 %v4101_v36  ;;  %2993 = vmatpush3.bf16.msra.mxu1 %v4105_v37 }
  0xcd   : > { %1516 = vmatprep.subr.bf16.mxu0 %v4109_v38  ;;  %2994 = vmatprep.subr.bf16.mxu1 %v4883_v20 }
  0xd0   : > { %1517 = vmatpush1.bf16.msra.mxu0 %v4112_v39  ;;  %2995 = vmatpush3.bf16.msra.mxu1 %v4116_v40 }
  0xd1   : > { %1518 = vmatprep.subr.bf16.mxu0 %v4120_v41  ;;  %2996 = vmatprep.subr.bf16.mxu1 %v4883_v20 }
  0xd4   : > { %1519 = vmatpush1.bf16.msra.mxu0 %v4123_v42  ;;  %2997 = vmatpush3.bf16.msra.mxu1 %v4127_v43 }
  0xd5   : > { %1520 = vmatprep.subr.bf16.mxu0 %v4131_v44  ;;  %2998 = vmatprep.subr.bf16.mxu1 %v4883_v20 }
  0xd8   : > { %1521 = vmatpush1.bf16.msra.mxu0 %v4134_v45  ;;  %2999 = vmatpush3.bf16.msra.mxu1 %v4138_v46  ;;  %v4310_v46 = vld [vmem:[%s4863_s3 + $0x3] sm:$0x7] }
  0xd9   : > { %1633 = vmatprep.subr.bf16.mxu1 %v4146_v49  ;;  %3004 = vmatprep.subr.bf16.mxu0 %v4883_v20 }
 0x136   : > { %v4278_v17 = vpop.f32.mrb[0].mxu1 }
 0x137   : > { %4952 = vst [vmem:[#allocation39_spill] sm:$0xff] %v4278_v17  ;;  %v4282_v19 = vpop.f32.mrb[1].mxu1 }
 0x138   : > { %4953 = vst [vmem:[#allocation40_spill] sm:$0xff] %v4282_v19  ;;  %v4284_v21 = vpop.f32.mrb[2].mxu1 }
 0x139   : > { %4954 = vst [vmem:[#allocation41_spill] sm:$0xff] %v4284_v21  ;;  %v4286_v27 = vpop.f32.mrb[3].mxu1 }
 0x13a   : > { %4955 = vst [vmem:[#allocation42_spill] sm:$0xff] %v4286_v27 }
 0x13e   : > { %v2926_v13 = vpop.f32.mrb[4].mxu1 }
 0x13f   : > { %v4295_v14 = vadd.f32 %v2926_v13, %v4292_v50  ;;  %v4297_v3 = vpop.f32.mrb[5].mxu1 }
 0x140   : > { %v2927_v20 = vpop.f32.mrb[6].mxu1 }
 0x141   : > { %4956 = vst [vmem:[#allocation43_spill] sm:$0xff] %v4295_v14  ;;  %v4300_v19 = vadd.f32 %v2927_v20, %v4292_v50  ;;  %v4302_v21 = vpop.f32.mrb[7].mxu1 }
 0x143   : > { %4957 = vst [vmem:[#allocation44_spill] sm:$0xff] %v4300_v19 }
 0x146   : > { %v2930_v27 = vpop.f32.mrb[8].mxu1 }
 0x147   : > { %v4305_v17 = vadd.f32 %v2930_v27, %v4292_v50  ;;  %v587_v49 = vpop.f32.mrb[9].mxu1  ;;  %v4323_v27 = vrot.slane %v4310_v46, %v4280_v18 }
 0x148   : > { %v4313_v13 = vadd.f32 %v587_v49, %v4292_v50  ;;  %v2931_v14 = vpop.f32.mrb[10].mxu1 }
 0x149   : > { %4958 = vst [vmem:[#allocation45_spill] sm:$0xff] %v4305_v17  ;;  %v4316_v45 = vadd.f32 %v2931_v14, %v4292_v50  ;;  %v590_v20 = vpop.f32.mrb[11].mxu1 }
 0x14a   : > { %4959 = vst [vmem:[#allocation46_spill] sm:$0xff] %v4313_v13  ;;  %v4319_v19 = vadd.f32 %v590_v20, %v4292_v50 }
 0x14b   : > { %4960 = vst [vmem:[#allocation47_spill] sm:$0xff] %v4316_v45 }
 0x14c   : > { %4961 = vst [vmem:[#allocation48_spill] sm:$0xff] %v4319_v19 }
 0x14e   : > { %v2938_v17 = vpop.f32.mrb[12].mxu0 }
 0x14f   : > { %v4326_v44 = vadd.f32 %v2938_v17, %v4323_v27  ;;  %v808_v43 = vpop.f32.mrb[13].mxu0 }
 0x150   : > { %v4329_v49 = vadd.f32 %v808_v43, %v4323_v27  ;;  %v2939_v13 = vpop.f32.mrb[14].mxu0 }
 0x151   : > { %4962 = vst [vmem:[#allocation49_spill] sm:$0xff] %v4326_v44  ;;  %v4332_v14 = vadd.f32 %v2939_v13, %v4323_v27  ;;  %v811_v45 = vpop.f32.mrb[15].mxu0  ;;  %v904_v13 = vld [vmem:[%s4865_s5] sm:$0x7] }
 0x152   : > { %4963 = vst [vmem:[#allocation50_spill] sm:$0xff] %v4329_v49  ;;  %v4335_v20 = vadd.f32 %v811_v45, %v4323_v27  ;;  %v386_v49 = vsub.s32 0, %v385_v16 }
 0x153   : > { %4964 = vst [vmem:[#allocation51_spill] sm:$0xff] %v4332_v14  ;;  %v390_v14 = vsub.s32 1, %v385_v16 }
 0x154   : > { %4965 = vst [vmem:[#allocation52_spill] sm:$0xff] %v4335_v20  ;;  %v4350_v45 = vrot.slane %v382_v30, %v386_v49  ;;  %v4352_v20 = vrot.slane %v904_v13, %v386_v49 }
 0x155   : > { %v4360_v40 = vrot.slane %v904_v13, %v390_v14 }
 0x156   : > { %v4337_v19 = vpop.f32.mrb[16].mxu0  ;;  %4968 = vst [vmem:[#allocation55_spill] sm:$0xff] %v4350_v45  ;;  %4969 = vst [vmem:[#allocation56_spill] sm:$0xff] %v4352_v20 }
 0x157   : > { %v824_v42 = vpop.f32.mrb[17].mxu0  ;;  %4971 = vst [vmem:[#allocation58_spill] sm:$0xff] %v4360_v40 }
 0x158   : > { %v4340_v41 = vadd.f32 %v824_v42, %v4323_v27  ;;  %v4342_v17 = vpop.f32.mrb[18].mxu0  ;;  %v4356_v42 = vadd.f32 %v4352_v20, %v4350_v45 }
 0x159   : > { %v827_v44 = vpop.f32.mrb[19].mxu0 }
 0x15a   : > { %4966 = vst [vmem:[#allocation53_spill] sm:$0xff] %v4340_v41  ;;  %v4345_v43 = vadd.f32 %v827_v44, %v4323_v27  ;;  %v4358_v41 = vrot.slane %v382_v30, %v390_v14 }
 0x15c   : > { %4967 = vst [vmem:[#allocation54_spill] sm:$0xff] %v4345_v43  ;;  %4970 = vst [vmem:[#allocation57_spill] sm:$0xff] %v4358_v41  ;;  %v4364_v44 = vadd.f32 %v4360_v40, %v4358_v41 }
 0x16e   : > { %v1090_v43 = vpop.f32.mrb[0].mxu0  ;;  %v1133_v39 = vpop.f32.mrb[28].mxu1 }
 0x16f   : > { %v3109_v16 = vadd.f32 %v4356_v42, %v1090_v43  ;;  %v1092_v38 = vpop.f32.mrb[1].mxu0  ;;  %v2962_v37 = vpop.f32.mrb[29].mxu1 }
 0x170   : > { %v1094_v36 = vpop.f32.mrb[2].mxu0  ;;  %v1136_v35 = vpop.f32.mrb[30].mxu1  ;;  %v3111_v33 = vadd.f32 %v4364_v44, %v1092_v38  ;;  %v4376_v38 = vrot.slane %v904_v13, %v4280_v18  ;;  %v572_v13 = vadd.f32 %v4297_v3, %v4292_v50 }
 0x171   : > { %v2685_v34 = vmul.f32 -1.442695, %v3109_v16  ;;  %v3113_v20 = vadd.f32 %v4356_v42, %v1094_v36  ;;  %v1096_v45 = vpop.f32.mrb[3].mxu0  ;;  %v2963_v30 = vpop.f32.mrb[31].mxu1  ;;  %v4373_v36 = vld [vmem:[%s4865_s5 + $0x3] sm:$0x7] }
 0x172   : > { %v3115_v40 = vadd.f32 %v4364_v44, %v1096_v45  ;;  %v2687_v41 = vmul.f32 -1.442695, %v3111_v33  ;;  %v625_v33 = vrot.slane %v4310_v46, %v386_v49  ;;  %v629_v30 = vrot.slane %v4310_v46, %v390_v14 }
 0x173   : > { %3388 = vpow2.f32 %v2685_v34  ;;  %v2686_v32 = vmul.f32 -1.442695, %v3113_v20 }
 0x174   : > { %v2688_v31 = vmul.f32 -1.442695, %v3115_v40 }
 0x175   : > { %3390 = vpow2.f32 %v2686_v32 }
 0x176   : > { %3392 = vpow2.f32 %v2687_v41  ;;  %v1134_v41 = vadd.f32 %v1133_v39, %v4376_v38  ;;  %v575_v39 = vadd.f32 %v4302_v21, %v4292_v50 }
 0x177   : > { %3394 = vpow2.f32 %v2688_v31  ;;  %v1187_v31 = vrot.slane %v4373_v36, %v386_v49 }
 0x179   : > { %v4381_v45 = vadd.f32 %v1187_v31, %v625_v33 }
 0x17b   : > { %4972 = vst [vmem:[#allocation59_spill] sm:$0xff] %v4381_v45 }
 0x17d   : > { %v3389_v43 = vpop.eup %3388 }
 0x17e   : > { %v1148_v37 = vadd.f32 1.0, %v3389_v43  ;;  %v1191_v43 = vrot.slane %v4373_v36, %v390_v14 }
 0x17f   : > { %v3391_v29 = vpop.eup %3390 }
 0x180   : > { %3396 = vrcp.f32 %v1148_v37  ;;  %v1149_v16 = vadd.f32 1.0, %v3391_v29  ;;  %v3393_v34 = vpop.eup %3392  ;;  %v4390_v33 = vadd.f32 %v1191_v43, %v629_v30 }
 0x181   : > { %v3395_v32 = vpop.eup %3394  ;;  %v1162_v40 = vadd.f32 1.0, %v3393_v34 }
 0x182   : > { %3398 = vrcp.f32 %v1149_v16  ;;  %v1163_v29 = vadd.f32 1.0, %v3395_v32  ;;  %v1137_v16 = vadd.f32 %v1136_v35, %v4376_v38  ;;  %4973 = vst [vmem:[#allocation60_spill] sm:$0xff] %v4390_v33 }
 0x183   : > { %3400 = vrcp.f32 %v1162_v40 }
 0x184   : > { %3402 = vrcp.f32 %v1163_v29 }
 0x18a   : > { %v3397_v20 = vpop.eup %3396 }
 0x18b   : > { %v1168_v37 = vmul.f32 %v3397_v20, %v1134_v41 }
 0x18c   : > { %v3399_v49 = vpop.eup %3398 }
 0x18d   : > { %v1170_v34 = vadd.f32 %v1168_v37, %v572_v13  ;;  %v1169_v32 = vmul.f32 %v3399_v49, %v1137_v16  ;;  %v3401_v16 = vpop.eup %3400 }
 0x18e   : > { %v1361_v46 = vpop.f32.mrb[24].mxu1  ;;  %v1404_v14 = vpop.f32.mrb[20].mxu0 }
 0x18f   : > { %3404 = vtanh.f32 %v1170_v34  ;;  %v1171_v3 = vadd.f32 %v1169_v32, %v575_v39  ;;  %v3169_v31 = vadd.f32 %v4381_v45, %v1361_v46  ;;  %v1363_v40 = vpop.f32.mrb[25].mxu1  ;;  %v2982_v35 = vpop.f32.mrb[21].mxu0  ;;  %v1174_v34 = vsub.f32 1.0, %v3401_v16 }
 0x190   : > { %v1365_v41 = vpop.f32.mrb[26].mxu1  ;;  %v1407_v20 = vpop.f32.mrb[22].mxu0  ;;  %v3171_v43 = vadd.f32 %v4390_v33, %v1363_v40 }
 0x191   : > { %3406 = vtanh.f32 %v1171_v3  ;;  %v2713_v21 = vmul.f32 -1.442695, %v3169_v31  ;;  %v3173_v50 = vadd.f32 %v4381_v45, %v1365_v41  ;;  %v1367_v29 = vpop.f32.mrb[27].mxu1  ;;  %v2983_v30 = vpop.f32.mrb[23].mxu0  ;;  %v1178_v3 = vmul.f32 %v3401_v16, %v4140_v47 }
 0x192   : > { %v3175_v37 = vadd.f32 %v4390_v33, %v1367_v29  ;;  %v2715_v49 = vmul.f32 -1.442695, %v3171_v43  ;;  %v3403_v39 = vpop.eup %3402  ;;  %v1465_v30 = vstv %s1456_s4  ;;  %s4667_s4 = scvt.s32.f32 %s2069_s27 }
 0x193   : > { %3408 = vpow2.f32 %v2713_v21  ;;  %v2714_v13 = vmul.f32 -1.442695, %v3173_v50  ;;  %v1175_v35 = vsub.f32 1.0, %v3403_v39  ;;  %v1179_v21 = vmul.f32 %v3403_v39, %v4142_v48 }
 0x194   : > { %v2716_v32 = vmul.f32 -1.442695, %v3175_v37  ;;  %v4406_v39 = vrot.slane %v4373_v36, %v4280_v18  ;;  %v833_v36 = vadd.f32 %v4337_v19, %v4323_v27 }
 0x195   : > { %3410 = vpow2.f32 %v2714_v13 }
 0x196   : > { %3412 = vpow2.f32 %v2715_v49 }
 0x197   : > { %3414 = vpow2.f32 %v2716_v32 }
 0x199   : > { %v3405_v46 = vpop.eup %3404 }
 0x19a   : > { %v1176_v31 = vmul.f32 %v3405_v46, %v1174_v34 }
 0x19b   : > { %v3407_v41 = vpop.eup %3406 }
 0x19c   : > { %v1180_v40 = vadd.f32 %v1178_v3, %v1176_v31  ;;  %v1177_v50 = vmul.f32 %v3407_v41, %v1175_v35  ;;  %v1405_v41 = vadd.f32 %v1404_v14, %v4406_v39  ;;  %v1408_v14 = vadd.f32 %v1407_v20, %v4406_v39 }
 0x19d   : > { %v3409_v29 = vpop.eup %3408 }
 0x19e   : > { %v1463_v43 = vsub.f32 %v1180_v40, %v4140_v47  ;;  %v1181_v13 = vadd.f32 %v1179_v21, %v1177_v50  ;;  %v1419_v33 = vadd.f32 1.0, %v3409_v29  ;;  %v4975_v40 = vmov 0  }
 0x19f   : > { %v3411_v37 = vpop.eup %3410  ;;  %v836_v50 = vadd.f32 %v4342_v17, %v4323_v27 }
 0x1a0   : > { %v1466_v45 = vmul.f32 %v1465_v30, %v1463_v43  ;;  %v1464_v16 = vsub.f32 %v1181_v13, %v4142_v48  ;;  %3416 = vrcp.f32 %v1419_v33  ;;  %v1420_v34 = vadd.f32 1.0, %v3411_v37  ;;  %v3413_v32 = vpop.eup %3412 }
 0x1a1   : > { %v3415_v31 = vpop.eup %3414  ;;  %v1433_v33 = vadd.f32 1.0, %v3413_v32 }
 0x1a2   : > { %v1467_v49 = vmul.f32 %v1465_v30, %v1464_v16  ;;  %3418 = vrcp.f32 %v1420_v34  ;;  %v4409_v46 = vadd.f32 %v1466_v45, %v4140_v47  ;;  %v1434_v18 = vadd.f32 1.0, %v3415_v31 }
 0x1a3   : > { %3420 = vrcp.f32 %v1433_v33 }
 0x1a4   : > { %v4412_v3 = vadd.f32 %v1467_v49, %v4142_v48  ;;  %v4974_v48 = vmov 0.0   ;;  %3422 = vrcp.f32 %v1434_v18 }
 0x1a6   : > { %v2793_v35 = vpack.c.bf16 %v4412_v3, %v4409_v46 }
 0x1a8   : > { %2794 = vst [vmem:[%s3989_s25] sm:$0xff] %v2793_v35   ;;  %1539 = vmatmul.mubr.bf16.vlgmr.msra.gmra.mrb[4].mxu0 %v2793_v35  ;;  %3001 = vmatmul.mubr.bf16.vlgmr.msra.gmra.mrb[32].mxu1 %v2793_v35  ;;  %v1472_v35 = vstv %s1462_s17  ;;  %s2372_s17 = scalar_select %p2371_p7, 1, 0 }
 0x1a9   : > { %1634 = vmatpush1.bf16.msra.mxu1 %v4154_v51  ;;  %3005 = vmatpush3.bf16.msra.mxu0 %v4156_v52 }
 0x1aa   : > { %v3417_v47 = vpop.eup %3416  ;;  %1635 = vmatprep.subr.bf16.mxu1 %v4159_v53  ;;  %3006 = vmatprep.subr.bf16.mxu0 %v4974_v48  ;;  %s2373_s21 = scvt.s32.f32 %s2372_s17 }
 0x1ab   : > { %v1439_v45 = vmul.f32 %v3417_v47, %v1405_v41  ;;  %1665 = vmatprep.mubr.bf16.mxu1 %v4975_v40  ;;  %3020 = vmatprep.mubr.msk.bf16.mxu0 %vm3784_vm1, %v4974_v48 }
 0x1ac   : > { %v3419_v21 = vpop.eup %3418 }
 0x1ad   : > { %v1441_v29 = vadd.f32 %v1439_v45, %v833_v36  ;;  %v1440_v30 = vmul.f32 %v3419_v21, %v1408_v14  ;;  %1636 = vmatpush1.bf16.msra.mxu1 %v4163_v54  ;;  %3007 = vmatpush3.bf16.msra.mxu0 %v4166_v55  ;;  %v3421_v27 = vpop.eup %3420 }
 0x1ae   : > { %1637 = vmatprep.subr.bf16.mxu1 %v4169_v56  ;;  %3008 = vmatprep.subr.bf16.mxu0 %v4974_v48  ;;  %v3423_v17 = vpop.eup %3422  ;;  %v1445_v20 = vsub.f32 1.0, %v3421_v27  ;;  %v1449_v13 = vmul.f32 %v3421_v27, %v4228_v10  ;;  %v4990_v27 = vld [vmem:[#allocation34_spill] sm:$0xff] }
 0x1af   : > { %3424 = vtanh.f32 %v1441_v29  ;;  %v1442_v19 = vadd.f32 %v1440_v30, %v836_v50  ;;  %v1446_v37 = vsub.f32 1.0, %v3423_v17  ;;  %v1450_v49 = vmul.f32 %v3423_v17, %v4230_v11  ;;  %v4986_v50 = vld [vmem:[#allocation30_spill] sm:$0xff]  ;;  %v4987_v29 = vld [vmem:[#allocation31_spill] sm:$0xff]  ;;  %v4988_v30 = vld [vmem:[#allocation32_spill] sm:$0xff] }
 0x1b0   : > { %v4991_v17 = vld [vmem:[#allocation35_spill] sm:$0xff] }
 0x1b1   : > { %3426 = vtanh.f32 %v1442_v19  ;;  %1638 = vmatpush1.bf16.msra.mxu1 %v4176_v57  ;;  %3009 = vmatpush3.bf16.msra.mxu0 %v4179_v58  ;;  %v4989_v19 = vld [vmem:[#allocation33_spill] sm:$0xff] }
 0x1b2   : > { %1639 = vmatprep.subr.bf16.mxu1 %v4182_v59  ;;  %3010 = vmatprep.subr.bf16.mxu0 %v4974_v48 }
 0x1b5   : > { %1640 = vmatpush1.bf16.msra.mxu1 %v4186_v60  ;;  %3011 = vmatpush3.bf16.msra.mxu0 %v4189_v61 }
 0x1b6   : > { %1641 = vmatprep.subr.bf16.mxu1 %v4192_v62  ;;  %3012 = vmatprep.subr.bf16.mxu0 %v4974_v48 }
 0x1b9   : > { %v3425_v43 = vpop.eup %3424  ;;  %1642 = vmatpush1.bf16.msra.mxu1 %v4196_v63  ;;  %3013 = vmatpush3.bf16.msra.mxu0 %v4199_v0 }
 0x1ba   : > { %v1447_v16 = vmul.f32 %v3425_v43, %v1445_v20  ;;  %1643 = vmatprep.subr.bf16.mxu1 %v4202_v1  ;;  %3014 = vmatprep.subr.bf16.mxu0 %v4974_v48  ;;  %v4992_v20 = vld [vmem:[#allocation36_spill] sm:$0xff]  ;;  %v4993_v43 = vld [vmem:[#allocation37_spill] sm:$0xff] }
 0x1bb   : > { %v3427_v34 = vpop.eup %3426 }
 0x1bc   : > { %v1451_v32 = vadd.f32 %v1449_v13, %v1447_v16  ;;  %v1448_v31 = vmul.f32 %v3427_v34, %v1446_v37  ;;  %v4994_v13 = vld [vmem:[#allocation38_spill] sm:$0xff] }
 0x1bd   : > { %1644 = vmatpush1.bf16.msra.mxu1 %v4206_v2  ;;  %3015 = vmatpush3.bf16.msra.mxu0 %v4209_v4 }
 0x1be   : > { %v1470_v33 = vsub.f32 %v1451_v32, %v4228_v10  ;;  %v1452_v41 = vadd.f32 %v1450_v49, %v1448_v31  ;;  %1645 = vmatprep.subr.bf16.mxu1 %v4212_v5  ;;  %3016 = vmatprep.subr.bf16.mxu0 %v4974_v48 }
 0x1c0   : > { %v1473_v18 = vmul.f32 %v1472_v35, %v1470_v33  ;;  %v1471_v47 = vsub.f32 %v1452_v41, %v4230_v11 }
 0x1c1   : > { %1646 = vmatpush1.bf16.msra.mxu1 %v4216_v6  ;;  %3017 = vmatpush3.bf16.msra.mxu0 %v4219_v7 }
 0x1c2   : > { %v1474_v36 = vmul.f32 %v1472_v35, %v1471_v47  ;;  %1647 = vmatprep.subr.bf16.mxu1 %v4222_v8  ;;  %3018 = vmatprep.subr.bf16.mxu0 %v4974_v48  ;;  %v4469_v45 = vadd.f32 %v1473_v18, %v4228_v10  ;;  %v4981_v10 = vld [vmem:[#allocation25_spill] sm:$0xff] }
 0x1c4   : > { %v4472_v14 = vadd.f32 %v1474_v36, %v4230_v11  ;;  %v4982_v11 = vld [vmem:[#allocation26_spill] sm:$0xff] }
 0x1c5   : > { %1648 = vmatpush1.bf16.msra.mxu1 %v4225_v9  ;;  %3019 = vmatpush3.bf16.msra.mxu0 %v4233_v12 }
 0x1c6   : > { %v2798_v21 = vpack.c.bf16 %v4472_v14, %v4469_v45  ;;  %1810 = vmatprep.subr.bf16.mxu0 %v4034_v15  ;;  %3024 = vmatprep.subr.bf16.mxu1 %v4974_v48  ;;  %v4977_v15 = vld [vmem:[#allocation21_spill] sm:$0xff] }
 0x1c8   : > { %2830 = vst [vmem:[%s3991_s14 + $0x18] sm:$0xff] %v2798_v21   ;;  %1666 = vmatmul.mubr.bf16.vlgmr.msra.gmra.mrb[20].mxu1 %v2798_v21  ;;  %3021 = vmatmul.mubr.bf16.vlgmr.msra.gmra.mrb[24].mxu0 %v2798_v21 }
 0x1c9   : > { %1811 = vmatpush1.bf16.msra.mxu0 %v4055_v22  ;;  %3025 = vmatpush3.bf16.msra.mxu1 %v4057_v23  ;;  %v4978_v22 = vld [vmem:[#allocation22_spill] sm:$0xff]  ;;  %v4979_v23 = vld [vmem:[#allocation23_spill] sm:$0xff] }
 0x1ca   : > { %1812 = vmatprep.subr.bf16.mxu0 %v4059_v24  ;;  %3026 = vmatprep.subr.bf16.mxu1 %v4974_v48  ;;  %v4980_v24 = vld [vmem:[#allocation24_spill] sm:$0xff] }
 0x1cb   : > { %1842 = vmatprep.mubr.bf16.mxu0 %v4975_v40  ;;  %3040 = vmatprep.mubr.msk.bf16.mxu1 %vm3784_vm1, %v4974_v48 }
 0x1cd   : > { %1813 = vmatpush1.bf16.msra.mxu0 %v4063_v25  ;;  %3027 = vmatpush3.bf16.msra.mxu1 %v4065_v26  ;;  %v4983_v25 = vld [vmem:[#allocation27_spill] sm:$0xff]  ;;  %v4984_v26 = vld [vmem:[#allocation28_spill] sm:$0xff] }
 0x1ce   : > { %1814 = vmatprep.subr.bf16.mxu0 %v4072_v28  ;;  %3028 = vmatprep.subr.bf16.mxu1 %v4974_v48  ;;  %v4985_v28 = vld [vmem:[#allocation29_spill] sm:$0xff] }
 0x1d1   : > { %1815 = vmatpush1.bf16.msra.mxu0 %v4977_v15  ;;  %3029 = vmatpush3.bf16.msra.mxu1 %v4978_v22 }
 0x1d2   : > { %1816 = vmatprep.subr.bf16.mxu0 %v4979_v23  ;;  %3030 = vmatprep.subr.bf16.mxu1 %v4974_v48 }
 0x1d5   : > { %1817 = vmatpush1.bf16.msra.mxu0 %v4980_v24  ;;  %3031 = vmatpush3.bf16.msra.mxu1 %v4981_v10 }
 0x1d6   : > { %1818 = vmatprep.subr.bf16.mxu0 %v4982_v11  ;;  %3032 = vmatprep.subr.bf16.mxu1 %v4974_v48 }
 0x1d9   : > { %1819 = vmatpush1.bf16.msra.mxu0 %v4983_v25  ;;  %3033 = vmatpush3.bf16.msra.mxu1 %v4984_v26 }
 0x1da   : > { %1820 = vmatprep.subr.bf16.mxu0 %v4985_v28  ;;  %3034 = vmatprep.subr.bf16.mxu1 %v4974_v48 }
 0x1dd   : > { %1821 = vmatpush1.bf16.msra.mxu0 %v4986_v50  ;;  %3035 = vmatpush3.bf16.msra.mxu1 %v4987_v29 }
 0x1de   : > { %1822 = vmatprep.subr.bf16.mxu0 %v4988_v30  ;;  %3036 = vmatprep.subr.bf16.mxu1 %v4974_v48 }
 0x1e1   : > { %1823 = vmatpush1.bf16.msra.mxu0 %v4989_v19  ;;  %3037 = vmatpush3.bf16.msra.mxu1 %v4990_v27 }
 0x1e2   : > { %1824 = vmatprep.subr.bf16.mxu0 %v4991_v17  ;;  %3038 = vmatprep.subr.bf16.mxu1 %v4974_v48 }
 0x1e5   : > { %1825 = vmatpush1.bf16.msra.mxu0 %v4992_v20  ;;  %3039 = vmatpush3.bf16.msra.mxu1 %v4993_v43  ;;  %v4995_v43 = vld [vmem:[#allocation43_spill] sm:$0xff] }
 0x1e6   : > { %1937 = vmatprep.subr.bf16.mxu1 %v4994_v13  ;;  %3044 = vmatprep.subr.bf16.mxu0 %v4974_v48 }
 0x27b   : > { %v1540_v37 = vpop.f32.mrb[4].mxu0  ;;  %v1583_v16 = vpop.f32.mrb[32].mxu1 }
 0x27c   : > { %v3117_v34 = vadd.f32 %v4356_v42, %v1540_v37  ;;  %v1542_v49 = vpop.f32.mrb[5].mxu0  ;;  %v3002_v32 = vpop.f32.mrb[33].mxu1  ;;  %v1584_v29 = vadd.f32 %v1583_v16, %v4376_v38 }
 0x27d   : > { %v1544_v31 = vpop.f32.mrb[6].mxu0  ;;  %v1586_v35 = vpop.f32.mrb[34].mxu1  ;;  %v3119_v36 = vadd.f32 %v4364_v44, %v1542_v49  ;;  %v4996_v32 = vld [vmem:[#allocation44_spill] sm:$0xff] }
 0x27e   : > { %v2723_v33 = vmul.f32 -1.442695, %v3117_v34  ;;  %v3121_v41 = vadd.f32 %v4356_v42, %v1544_v31  ;;  %v1546_v18 = vpop.f32.mrb[7].mxu0  ;;  %v3003_v47 = vpop.f32.mrb[35].mxu1  ;;  %v1587_v17 = vadd.f32 %v1586_v35, %v4376_v38 }
 0x27f   : > { %v3123_v15 = vadd.f32 %v4364_v44, %v1546_v18  ;;  %v2725_v22 = vmul.f32 -1.442695, %v3119_v36 }
 0x280   : > { %3428 = vpow2.f32 %v2723_v33  ;;  %v2724_v21 = vmul.f32 -1.442695, %v3121_v41  ;;  %v4997_v33 = vld [vmem:[#allocation59_spill] sm:$0xff] }
 0x281   : > { %v2726_v23 = vmul.f32 -1.442695, %v3123_v15 }
 0x282   : > { %3430 = vpow2.f32 %v2724_v21 }
 0x283   : > { %3432 = vpow2.f32 %v2725_v22 }
 0x284   : > { %3434 = vpow2.f32 %v2726_v23  ;;  %v4999_v23 = vld [vmem:[#allocation60_spill] sm:$0xff] }
 0x28a   : > { %v3429_v24 = vpop.eup %3428 }
 0x28b   : > { %v1598_v10 = vadd.f32 1.0, %v3429_v24 }
 0x28c   : > { %v3431_v11 = vpop.eup %3430 }
 0x28d   : > { %3436 = vrcp.f32 %v1598_v10  ;;  %v1599_v25 = vadd.f32 1.0, %v3431_v11  ;;  %v3433_v26 = vpop.eup %3432 }
 0x28e   : > { %v3435_v28 = vpop.eup %3434  ;;  %v1612_v50 = vadd.f32 1.0, %v3433_v26 }
 0x28f   : > { %3438 = vrcp.f32 %v1599_v25  ;;  %v1613_v30 = vadd.f32 1.0, %v3435_v28 }
 0x290   : > { %3440 = vrcp.f32 %v1612_v50 }
 0x291   : > { %3442 = vrcp.f32 %v1613_v30 }
 0x297   : > { %v3437_v19 = vpop.eup %3436 }
 0x298   : > { %v1618_v27 = vmul.f32 %v3437_v19, %v1584_v29 }
 0x299   : > { %v3439_v20 = vpop.eup %3438 }
 0x29a   : > { %v1620_v13 = vadd.f32 %v1618_v27, %v4995_v43  ;;  %v1619_v37 = vmul.f32 %v3439_v20, %v1587_v17  ;;  %v3441_v25 = vpop.eup %3440 }
 0x29b   : > { %v1667_v34 = vpop.f32.mrb[20].mxu1  ;;  %v1710_v49 = vpop.f32.mrb[24].mxu0  ;;  %v1624_v50 = vsub.f32 1.0, %v3441_v25  ;;  %v1628_v27 = vmul.f32 %v3441_v25, %v4409_v46 }
 0x29c   : > { %3444 = vtanh.f32 %v1620_v13  ;;  %v1621_v31 = vadd.f32 %v1619_v37, %v4996_v32  ;;  %v3161_v41 = vadd.f32 %v4997_v33, %v1667_v34  ;;  %v1669_v16 = vpop.f32.mrb[21].mxu1  ;;  %v3022_v18 = vpop.f32.mrb[25].mxu0  ;;  %v1769_v32 = vstv %s1762_s22 }
 0x29d   : > { %v1671_v47 = vpop.f32.mrb[22].mxu1  ;;  %v1713_v36 = vpop.f32.mrb[26].mxu0  ;;  %v3163_v24 = vadd.f32 %v4999_v23, %v1669_v16 }
 0x29e   : > { %3446 = vtanh.f32 %v1621_v31  ;;  %v2727_v35 = vmul.f32 -1.442695, %v3161_v41  ;;  %v3165_v21 = vadd.f32 %v4997_v33, %v1671_v47  ;;  %v1673_v15 = vpop.f32.mrb[23].mxu1  ;;  %v3023_v22 = vpop.f32.mrb[27].mxu0 }
 0x29f   : > { %v3167_v11 = vadd.f32 %v4999_v23, %v1673_v15  ;;  %v2729_v26 = vmul.f32 -1.442695, %v3163_v24  ;;  %v3443_v28 = vpop.eup %3442 }
 0x2a0   : > { %3448 = vpow2.f32 %v2727_v35  ;;  %v2728_v10 = vmul.f32 -1.442695, %v3165_v21  ;;  %v1625_v17 = vsub.f32 1.0, %v3443_v28  ;;  %v1629_v37 = vmul.f32 %v3443_v28, %v4412_v3 }
 0x2a1   : > { %v2730_v29 = vmul.f32 -1.442695, %v3167_v11  ;;  %v1711_v28 = vadd.f32 %v1710_v49, %v4406_v39 }
 0x2a2   : > { %3450 = vpow2.f32 %v2728_v10 }
 0x2a3   : > { %3452 = vpow2.f32 %v2729_v26 }
 0x2a4   : > { %3454 = vpow2.f32 %v2730_v29  ;;  %v1714_v29 = vadd.f32 %v1713_v36, %v4406_v39 }
 0x2a6   : > { %v3445_v30 = vpop.eup %3444 }
 0x2a7   : > { %v1626_v19 = vmul.f32 %v3445_v30, %v1624_v50  ;;  %v5000_v30 = vld [vmem:[#allocation53_spill] sm:$0xff] }
 0x2a8   : > { %v3447_v20 = vpop.eup %3446 }
 0x2a9   : > { %v1630_v43 = vadd.f32 %v1628_v27, %v1626_v19  ;;  %v1627_v13 = vmul.f32 %v3447_v20, %v1625_v17  ;;  %v1776_v17 = vstv %s1766_s23 }
 0x2aa   : > { %v3449_v34 = vpop.eup %3448 }
 0x2ab   : > { %v1767_v31 = vsub.f32 %v1630_v43, %v4409_v46  ;;  %v1631_v41 = vadd.f32 %v1629_v37, %v1627_v13  ;;  %v1725_v16 = vadd.f32 1.0, %v3449_v34  ;;  %v3555_v13 = vld [vmem:[#allocation4 + $0x30] ss:$12 sps:$4 sm:$0xff]   ;;  %v3556_v37 = vld [vmem:[#allocation4 + $0x38] ss:$12 sps:$4 sm:$0xff]  }
 0x2ac   : > { %v3451_v18 = vpop.eup %3450  ;;  %v3557_v34 = vld [vmem:[#allocation4 + $0x4c] ss:$12 sps:$4 sm:$0xff]  }
 0x2ad   : > { %v1770_v47 = vmul.f32 %v1769_v32, %v1767_v31  ;;  %v1768_v35 = vsub.f32 %v1631_v41, %v4412_v3  ;;  %3456 = vrcp.f32 %v1725_v16  ;;  %v1726_v21 = vadd.f32 1.0, %v3451_v18  ;;  %v3453_v22 = vpop.eup %3452  ;;  %v3559_v31 = vld [vmem:[#allocation4 + $0x50] ss:$12 sps:$4 sm:$0xff]   ;;  %v3561_v16 = vld [vmem:[#allocation4 + $0x60] ss:$12 sps:$4 sm:$0xff]  }
 0x2ae   : > { %v3455_v11 = vpop.eup %3454  ;;  %v1739_v26 = vadd.f32 1.0, %v3453_v22  ;;  %v3560_v41 = vld [vmem:[#allocation4 + $0x64] ss:$12 sps:$4 sm:$0xff]   ;;  %v3562_v18 = vld [vmem:[#allocation4 + $0x68] ss:$12 sps:$4 sm:$0xff]  }
 0x2af   : > { %v1771_v15 = vmul.f32 %v1769_v32, %v1768_v35  ;;  %3458 = vrcp.f32 %v1726_v21  ;;  %v4540_v24 = vadd.f32 %v1770_v47, %v4409_v46  ;;  %v1740_v50 = vadd.f32 1.0, %v3455_v11  ;;  %v3558_v32 = vld [vmem:[#allocation4 + $0x48] ss:$12 sps:$4 sm:$0xff]   ;;  %v3564_v35 = vld [vmem:[#allocation4 + $0x78] ss:$12 sps:$4 sm:$0xff]  }
 0x2b0   : > { %3460 = vrcp.f32 %v1739_v26  ;;  %v3563_v47 = vld [vmem:[#allocation4 + $0x7c] ss:$12 sps:$4 sm:$0xff]   ;;  %v3565_v21 = vld [vmem:[#allocation4 + $0x80] ss:$12 sps:$4 sm:$0xff]   ;;  %v3568_v11 = vld [vmem:[#allocation4 + $0x98] ss:$12 sps:$4 sm:$0xff]  }
 0x2b1   : > { %v4543_v10 = vadd.f32 %v1771_v15, %v4412_v3  ;;  %3462 = vrcp.f32 %v1740_v50  ;;  %v3566_v15 = vld [vmem:[#allocation4 + $0x94] ss:$12 sps:$4 sm:$0xff]   ;;  %v3567_v22 = vld [vmem:[#allocation4 + $0x90] ss:$12 sps:$4 sm:$0xff]  }
 0x2b2   : > { %v3570_v26 = vld [vmem:[#allocation4 + $0xa8] ss:$12 sps:$4 sm:$0xff]   ;;  %v3572_v50 = vld [vmem:[#allocation4 + $0xc4] ss:$12 sps:$4 sm:$0xff]  }
 0x2b3   : > { %v2803_v25 = vpack.c.bf16 %v4543_v10, %v4540_v24 }
 0x2b5   : > { %2831 = vst [vmem:[%s3989_s25 + $0x8] sm:$0xff] %v2803_v25   ;;  %1843 = vmatmul.mubr.bf16.vlgmr.msra.gmra.mrb[8].mxu0 %v2803_v25  ;;  %3041 = vmatmul.mubr.bf16.vlgmr.msra.gmra.mrb[36].mxu1 %v2803_v25  ;;  %v3569_v25 = vld [vmem:[#allocation4 + $0xac] ss:$12 sps:$4 sm:$0xff]  }
 0x2b6   : > { %1938 = vmatpush1.bf16.msra.mxu1 %v4154_v51  ;;  %3045 = vmatpush3.bf16.msra.mxu0 %v4156_v52  ;;  %v5001_v52 = vld [vmem:[#allocation54_spill] sm:$0xff] }
 0x2b7   : > { %v3457_v46 = vpop.eup %3456  ;;  %1939 = vmatprep.subr.bf16.mxu1 %v4159_v53  ;;  %3046 = vmatprep.subr.bf16.mxu0 %v4974_v48 }
 0x2b8   : > { %v1745_v3 = vmul.f32 %v3457_v46, %v1711_v28  ;;  %1969 = vmatprep.mubr.bf16.mxu1 %v4975_v40  ;;  %3060 = vmatprep.mubr.msk.bf16.mxu0 %vm3784_vm1, %v4974_v48  ;;  %v3571_v28 = vld [vmem:[#allocation4 + $0xb0] ss:$12 sps:$4 sm:$0xff]  }
 0x2b9   : > { %v3459_v49 = vpop.eup %3458 }
 0x2ba   : > { %v1747_v51 = vadd.f32 %v1745_v3, %v5000_v30  ;;  %v1746_v19 = vmul.f32 %v3459_v49, %v1714_v29  ;;  %1940 = vmatpush1.bf16.msra.mxu1 %v4163_v54  ;;  %3047 = vmatpush3.bf16.msra.mxu0 %v4166_v55  ;;  %v3461_v54 = vpop.eup %3460 }
 0x2bb   : > { %1941 = vmatprep.subr.bf16.mxu1 %v4169_v56  ;;  %3048 = vmatprep.subr.bf16.mxu0 %v4974_v48  ;;  %v3463_v55 = vpop.eup %3462  ;;  %v1751_v56 = vsub.f32 1.0, %v3461_v54 }
 0x2bc   : > { %3464 = vtanh.f32 %v1747_v51  ;;  %v1748_v53 = vadd.f32 %v1746_v19, %v5001_v52  ;;  %v1752_v36 = vsub.f32 1.0, %v3463_v55  ;;  %v1756_v27 = vmul.f32 %v3463_v55, %v4472_v14 }
 0x2be   : > { %3466 = vtanh.f32 %v1748_v53  ;;  %1942 = vmatpush1.bf16.msra.mxu1 %v4176_v57  ;;  %3049 = vmatpush3.bf16.msra.mxu0 %v4179_v58 }
 0x2bf   : > { %1943 = vmatprep.subr.bf16.mxu1 %v4182_v59  ;;  %3050 = vmatprep.subr.bf16.mxu0 %v4974_v48  ;;  %v1755_v59 = vmul.f32 %v3461_v54, %v4469_v45 }
 0x2c2   : > { %1944 = vmatpush1.bf16.msra.mxu1 %v4186_v60  ;;  %3051 = vmatpush3.bf16.msra.mxu0 %v4189_v61 }
 0x2c3   : > { %1945 = vmatprep.subr.bf16.mxu1 %v4192_v62  ;;  %3052 = vmatprep.subr.bf16.mxu0 %v4974_v48 }
 0x2c6   : > { %v3465_v57 = vpop.eup %3464  ;;  %1946 = vmatpush1.bf16.msra.mxu1 %v4196_v63  ;;  %3053 = vmatpush3.bf16.msra.mxu0 %v4199_v0 }
 0x2c7   : > { %v1753_v58 = vmul.f32 %v3465_v57, %v1751_v56  ;;  %1947 = vmatprep.subr.bf16.mxu1 %v4202_v1  ;;  %3054 = vmatprep.subr.bf16.mxu0 %v4974_v48 }
 0x2c8   : > { %v3467_v60 = vpop.eup %3466 }
 0x2c9   : > { %v1757_v61 = vadd.f32 %v1755_v59, %v1753_v58  ;;  %v1754_v62 = vmul.f32 %v3467_v60, %v1752_v36 }
 0x2ca   : > { %1948 = vmatpush1.bf16.msra.mxu1 %v4206_v2  ;;  %3055 = vmatpush3.bf16.msra.mxu0 %v4209_v4 }
 0x2cb   : > { %v1774_v63 = vsub.f32 %v1757_v61, %v4469_v45  ;;  %v1758_v0 = vadd.f32 %v1756_v27, %v1754_v62  ;;  %1949 = vmatprep.subr.bf16.mxu1 %v4212_v5  ;;  %3056 = vmatprep.subr.bf16.mxu0 %v4974_v48 }
 0x2cd   : > { %v1777_v1 = vmul.f32 %v1776_v17, %v1774_v63  ;;  %v1775_v20 = vsub.f32 %v1758_v0, %v4472_v14 }
 0x2ce   : > { %1950 = vmatpush1.bf16.msra.mxu1 %v4216_v6  ;;  %3057 = vmatpush3.bf16.msra.mxu0 %v4219_v7  ;;  %v3548_v6 = vld [vmem:[#allocation4 + $0x4] ss:$12 sps:$4 sm:$0xff]   ;;  %v3549_v7 = vld [vmem:[#allocation4] ss:$12 sps:$4 sm:$0xff]  }
 0x2cf   : > { %v1778_v43 = vmul.f32 %v1776_v17, %v1775_v20  ;;  %1951 = vmatprep.subr.bf16.mxu1 %v4222_v8  ;;  %3058 = vmatprep.subr.bf16.mxu0 %v4974_v48  ;;  %v4595_v2 = vadd.f32 %v1777_v1, %v4469_v45  ;;  %v3550_v8 = vld [vmem:[#allocation4 + $0x8] ss:$12 sps:$4 sm:$0xff]  }
 0x2d0   : > { %v3551_v45 = vld [vmem:[#allocation4 + $0x1c] ss:$12 sps:$4 sm:$0xff]  }
 0x2d1   : > { %v4598_v4 = vadd.f32 %v1778_v43, %v4472_v14  ;;  %v3554_v14 = vld [vmem:[#allocation4 + $0x34] ss:$12 sps:$4 sm:$0xff]  }
 0x2d2   : > { %1952 = vmatpush1.bf16.msra.mxu1 %v4225_v9  ;;  %3059 = vmatpush3.bf16.msra.mxu0 %v4233_v12  ;;  %v3552_v9 = vld [vmem:[#allocation4 + $0x18] ss:$12 sps:$4 sm:$0xff]   ;;  %v3553_v12 = vld [vmem:[#allocation4 + $0x20] ss:$12 sps:$4 sm:$0xff]  }
 0x2d3   : > { %v2808_v5 = vpack.c.bf16 %v4598_v4, %v4595_v2  ;;  %2114 = vmatprep.subr.bf16.mxu0 %v3548_v6  ;;  %3064 = vmatprep.subr.bf16.mxu1 %v4974_v48  ;;  %v5003_v6 = vld [vmem:[#allocation46_spill] sm:$0xff] }
 0x2d5   : > { %2832 = vst [vmem:[%s3991_s14 + $0x10] sm:$0xff] %v2808_v5   ;;  %1970 = vmatmul.mubr.bf16.vlgmr.msra.gmra.mrb[16].mxu1 %v2808_v5  ;;  %3061 = vmatmul.mubr.bf16.vlgmr.msra.gmra.mrb[28].mxu0 %v2808_v5 }
 0x2d6   : > { %2115 = vmatpush1.bf16.msra.mxu0 %v3549_v7  ;;  %3065 = vmatpush3.bf16.msra.mxu1 %v3550_v8 }
 0x2d7   : > { %2116 = vmatprep.subr.bf16.mxu0 %v3551_v45  ;;  %3066 = vmatprep.subr.bf16.mxu1 %v4974_v48 }
 0x2d8   : > { %2146 = vmatprep.mubr.bf16.mxu0 %v4975_v40  ;;  %3080 = vmatprep.mubr.msk.bf16.mxu1 %vm3784_vm1, %v4974_v48 }
 0x2da   : > { %2117 = vmatpush1.bf16.msra.mxu0 %v3552_v9  ;;  %3067 = vmatpush3.bf16.msra.mxu1 %v3553_v12  ;;  %v5004_v12 = vld [vmem:[#allocation48_spill] sm:$0xff] }
 0x2db   : > { %2118 = vmatprep.subr.bf16.mxu0 %v3554_v14  ;;  %3068 = vmatprep.subr.bf16.mxu1 %v4974_v48 }
 0x2de   : > { %2119 = vmatpush1.bf16.msra.mxu0 %v3555_v13  ;;  %3069 = vmatpush3.bf16.msra.mxu1 %v3556_v37 }
 0x2df   : > { %2120 = vmatprep.subr.bf16.mxu0 %v3557_v34  ;;  %3070 = vmatprep.subr.bf16.mxu1 %v4974_v48 }
 0x2e2   : > { %2121 = vmatpush1.bf16.msra.mxu0 %v3558_v32  ;;  %3071 = vmatpush3.bf16.msra.mxu1 %v3559_v31 }
 0x2e3   : > { %2122 = vmatprep.subr.bf16.mxu0 %v3560_v41  ;;  %3072 = vmatprep.subr.bf16.mxu1 %v4974_v48 }
 0x2e6   : > { %2123 = vmatpush1.bf16.msra.mxu0 %v3561_v16  ;;  %3073 = vmatpush3.bf16.msra.mxu1 %v3562_v18 }
 0x2e7   : > { %2124 = vmatprep.subr.bf16.mxu0 %v3563_v47  ;;  %3074 = vmatprep.subr.bf16.mxu1 %v4974_v48 }
 0x2ea   : > { %2125 = vmatpush1.bf16.msra.mxu0 %v3564_v35  ;;  %3075 = vmatpush3.bf16.msra.mxu1 %v3565_v21 }
 0x2eb   : > { %2126 = vmatprep.subr.bf16.mxu0 %v3566_v15  ;;  %3076 = vmatprep.subr.bf16.mxu1 %v4974_v48 }
 0x2ee   : > { %2127 = vmatpush1.bf16.msra.mxu0 %v3567_v22  ;;  %3077 = vmatpush3.bf16.msra.mxu1 %v3568_v11 }
 0x2ef   : > { %2128 = vmatprep.subr.bf16.mxu0 %v3569_v25  ;;  %3078 = vmatprep.subr.bf16.mxu1 %v4974_v48 }
 0x2f2   : > { %2129 = vmatpush1.bf16.msra.mxu0 %v3570_v26  ;;  %3079 = vmatpush3.bf16.msra.mxu1 %v3571_v28 }
 0x2f3   : > { %2241 = vmatprep.subr.bf16.mxu1 %v3572_v50  ;;  %3084 = vmatprep.subr.bf16.mxu0 %v4974_v48 }
 0x388   : > { %v1844_v46 = vpop.f32.mrb[8].mxu0  ;;  %v1887_v3 = vpop.f32.mrb[36].mxu1 }
 0x389   : > { %v3125_v29 = vadd.f32 %v4356_v42, %v1844_v46  ;;  %v1846_v49 = vpop.f32.mrb[9].mxu0  ;;  %v3042_v30 = vpop.f32.mrb[37].mxu1  ;;  %v1888_v0 = vadd.f32 %v1887_v3, %v4376_v38 }
 0x38a   : > { %v1848_v51 = vpop.f32.mrb[10].mxu0  ;;  %v1890_v19 = vpop.f32.mrb[38].mxu1  ;;  %v3127_v56 = vadd.f32 %v4364_v44, %v1846_v49 }
 0x38b   : > { %v2735_v52 = vmul.f32 -1.442695, %v3125_v29  ;;  %v3129_v53 = vadd.f32 %v4356_v42, %v1848_v51  ;;  %v1850_v54 = vpop.f32.mrb[11].mxu0  ;;  %v3043_v55 = vpop.f32.mrb[39].mxu1  ;;  %v1891_v43 = vadd.f32 %v1890_v19, %v4376_v38 }
 0x38c   : > { %v3131_v58 = vadd.f32 %v4364_v44, %v1850_v54  ;;  %v2737_v59 = vmul.f32 -1.442695, %v3127_v56 }
 0x38d   : > { %3468 = vpow2.f32 %v2735_v52  ;;  %v2736_v57 = vmul.f32 -1.442695, %v3129_v53  ;;  %v2073_v53 = vstv %s2066_s13 }
 0x38e   : > { %v2738_v36 = vmul.f32 -1.442695, %v3131_v58 }
 0x38f   : > { %3470 = vpow2.f32 %v2736_v57 }
 0x390   : > { %3472 = vpow2.f32 %v2737_v59 }
 0x391   : > { %3474 = vpow2.f32 %v2738_v36 }
 0x397   : > { %v3469_v60 = vpop.eup %3468 }
 0x398   : > { %v1902_v61 = vadd.f32 1.0, %v3469_v60 }
 0x399   : > { %v3471_v62 = vpop.eup %3470 }
 0x39a   : > { %3476 = vrcp.f32 %v1902_v61  ;;  %v1903_v27 = vadd.f32 1.0, %v3471_v62  ;;  %v3473_v42 = vpop.eup %3472 }
 0x39b   : > { %v3475_v17 = vpop.eup %3474  ;;  %v1916_v63 = vadd.f32 1.0, %v3473_v42 }
 0x39c   : > { %3478 = vrcp.f32 %v1903_v27  ;;  %v1917_v1 = vadd.f32 1.0, %v3475_v17 }
 0x39d   : > { %3480 = vrcp.f32 %v1916_v63 }
 0x39e   : > { %3482 = vrcp.f32 %v1917_v1 }
 0x3a4   : > { %v3477_v20 = vpop.eup %3476 }
 0x3a5   : > { %v1922_v44 = vmul.f32 %v3477_v20, %v1888_v0  ;;  %v3573_v20 = vld [vmem:[#allocation4 + $0xc0] ss:$12 sps:$4 sm:$0xff]  }
 0x3a6   : > { %v3479_v5 = vpop.eup %3478 }
 0x3a7   : > { %v1924_v7 = vadd.f32 %v1922_v44, %v5003_v6  ;;  %v1923_v8 = vmul.f32 %v3479_v5, %v1891_v43  ;;  %v3481_v22 = vpop.eup %3480  ;;  %v3574_v44 = vld [vmem:[#allocation4 + $0xc8] ss:$12 sps:$4 sm:$0xff]  }
 0x3a8   : > { %v1971_v45 = vpop.f32.mrb[16].mxu1  ;;  %v2014_v9 = vpop.f32.mrb[28].mxu0  ;;  %v1928_v26 = vsub.f32 1.0, %v3481_v22  ;;  %v1932_v3 = vmul.f32 %v3481_v22, %v4540_v24  ;;  %v3575_v43 = vld [vmem:[#allocation4 + $0xdc] ss:$12 sps:$4 sm:$0xff]  }
 0x3a9   : > { %3484 = vtanh.f32 %v1924_v7  ;;  %v1925_v14 = vadd.f32 %v1923_v8, %v5004_v12  ;;  %v3153_v13 = vadd.f32 %v4997_v33, %v1971_v45  ;;  %v1973_v37 = vpop.f32.mrb[17].mxu1  ;;  %v3062_v34 = vpop.f32.mrb[29].mxu0  ;;  %v2015_v0 = vadd.f32 %v2014_v9, %v4406_v39  ;;  %v5006_v7 = vld [vmem:[#allocation49_spill] sm:$0xff]  ;;  %v3586_v22 = vld [vmem:[#allocation4 + $0x128] ss:$12 sps:$4 sm:$0xff]  }
 0x3aa   : > { %v1975_v32 = vpop.f32.mrb[18].mxu1  ;;  %v2017_v31 = vpop.f32.mrb[30].mxu0  ;;  %v3155_v35 = vadd.f32 %v4999_v23, %v1973_v37  ;;  %v3576_v9 = vld [vmem:[#allocation4 + $0xd8] ss:$12 sps:$4 sm:$0xff]   ;;  %v3577_v12 = vld [vmem:[#allocation4 + $0xe0] ss:$12 sps:$4 sm:$0xff]  }
 0x3ab   : > { %3486 = vtanh.f32 %v1925_v14  ;;  %v2739_v41 = vmul.f32 -1.442695, %v3153_v13  ;;  %v3157_v16 = vadd.f32 %v4997_v33, %v1975_v32  ;;  %v1977_v18 = vpop.f32.mrb[19].mxu1  ;;  %v3063_v47 = vpop.f32.mrb[31].mxu0  ;;  %v2018_v5 = vadd.f32 %v2017_v31, %v4406_v39  ;;  %v3578_v14 = vld [vmem:[#allocation4 + $0xf4] ss:$12 sps:$4 sm:$0xff]  }
 0x3ac   : > { %v3159_v15 = vadd.f32 %v4999_v23, %v1977_v18  ;;  %v2741_v11 = vmul.f32 -1.442695, %v3155_v35  ;;  %v3483_v25 = vpop.eup %3482  ;;  %v5007_v13 = vld [vmem:[#allocation51_spill] sm:$0xff]  ;;  %v3580_v34 = vld [vmem:[#allocation4 + $0xf8] ss:$12 sps:$4 sm:$0xff]  }
 0x3ad   : > { %3488 = vpow2.f32 %v2739_v41  ;;  %v2740_v21 = vmul.f32 -1.442695, %v3157_v16  ;;  %v1929_v29 = vsub.f32 1.0, %v3483_v25  ;;  %v1933_v19 = vmul.f32 %v3483_v25, %v4543_v10  ;;  %v3579_v37 = vld [vmem:[#allocation4 + $0xf0] ss:$12 sps:$4 sm:$0xff]  }
 0x3ae   : > { %v2742_v28 = vmul.f32 -1.442695, %v3159_v15  ;;  %v3581_v32 = vld [vmem:[#allocation4 + $0x10c] ss:$12 sps:$4 sm:$0xff]   ;;  %v3582_v41 = vld [vmem:[#allocation4 + $0x108] ss:$12 sps:$4 sm:$0xff]  }
 0x3af   : > { %3490 = vpow2.f32 %v2740_v21  ;;  %v3583_v16 = vld [vmem:[#allocation4 + $0x110] ss:$12 sps:$4 sm:$0xff]   ;;  %v3585_v15 = vld [vmem:[#allocation4 + $0x120] ss:$12 sps:$4 sm:$0xff]  }
 0x3b0   : > { %3492 = vpow2.f32 %v2741_v11  ;;  %v3584_v18 = vld [vmem:[#allocation4 + $0x124] ss:$12 sps:$4 sm:$0xff]  }
 0x3b1   : > { %3494 = vpow2.f32 %v2742_v28  ;;  %v3587_v28 = vld [vmem:[#allocation4 + $0x13c] ss:$12 sps:$4 sm:$0xff]  }
 0x3b3   : > { %v3485_v50 = vpop.eup %3484 }
 0x3b4   : > { %v1930_v46 = vmul.f32 %v3485_v50, %v1928_v26 }
 0x3b5   : > { %v3487_v49 = vpop.eup %3486 }
 0x3b6   : > { %v1934_v30 = vadd.f32 %v1932_v3, %v1930_v46  ;;  %v1931_v51 = vmul.f32 %v3487_v49, %v1929_v29  ;;  %v2080_v49 = vstv %s4667_s4 }
 0x3b7   : > { %v3489_v52 = vpop.eup %3488 }
 0x3b8   : > { %v2071_v54 = vsub.f32 %v1934_v30, %v4540_v24  ;;  %v1935_v55 = vadd.f32 %v1933_v19, %v1931_v51  ;;  %v2029_v56 = vadd.f32 1.0, %v3489_v52  ;;  %v3588_v30 = vld [vmem:[#allocation4 + $0x138] ss:$12 sps:$4 sm:$0xff]   ;;  %v3589_v51 = vld [vmem:[#allocation4 + $0x140] ss:$12 sps:$4 sm:$0xff]  }
 0x3b9   : > { %v3491_v57 = vpop.eup %3490 }
 0x3ba   : > { %v2074_v58 = vmul.f32 %v2073_v53, %v2071_v54  ;;  %v2072_v59 = vsub.f32 %v1935_v55, %v4543_v10  ;;  %3496 = vrcp.f32 %v2029_v56  ;;  %v2030_v36 = vadd.f32 1.0, %v3491_v57  ;;  %v3493_v61 = vpop.eup %3492  ;;  %v3591_v56 = vld [vmem:[#allocation4 + $0x150] ss:$12 sps:$4 sm:$0xff]   ;;  %v3592_v57 = vld [vmem:[#allocation4 + $0x158] ss:$12 sps:$4 sm:$0xff]  }
 0x3bb   : > { %v3495_v42 = vpop.eup %3494  ;;  %v2043_v63 = vadd.f32 1.0, %v3493_v61  ;;  %v3594_v61 = vld [vmem:[#allocation4 + $0x168] ss:$12 sps:$4 sm:$0xff]  }
 0x3bc   : > { %v2075_v60 = vmul.f32 %v2073_v53, %v2072_v59  ;;  %3498 = vrcp.f32 %v2030_v36  ;;  %v4641_v62 = vadd.f32 %v2074_v58, %v4540_v24  ;;  %v2044_v1 = vadd.f32 1.0, %v3495_v42  ;;  %v3590_v53 = vld [vmem:[#allocation4 + $0x154] ss:$12 sps:$4 sm:$0xff]   ;;  %v3593_v59 = vld [vmem:[#allocation4 + $0x16c] ss:$12 sps:$4 sm:$0xff]  }
 0x3bd   : > { %3500 = vrcp.f32 %v2043_v63  ;;  %v3595_v42 = vld [vmem:[#allocation4 + $0x170] ss:$12 sps:$4 sm:$0xff]  }
 0x3be   : > { %v4644_v27 = vadd.f32 %v2075_v60, %v4543_v10  ;;  %3502 = vrcp.f32 %v2044_v1  ;;  %v5009_v63 = vld [vmem:[#allocation55_spill] sm:$0xff] }
 0x3c0   : > { %v2813_v17 = vpack.c.bf16 %v4644_v27, %v4641_v62 }
 0x3c2   : > { %2833 = vst [vmem:[%s3989_s25 + $0x10] sm:$0xff] %v2813_v17   ;;  %2147 = vmatmul.mubr.bf16.vlgmr.msra.gmra.mrb[32].mxu0 %v2813_v17  ;;  %3081 = vmatmul.mubr.bf16.vlgmr.msra.gmra.mrb[40].mxu1 %v2813_v17 }
 0x3c3   : > { %2242 = vmatpush1.bf16.msra.mxu1 %v3573_v20  ;;  %3085 = vmatpush3.bf16.msra.mxu0 %v3574_v44  ;;  %v5012_v20 = vld [vmem:[#allocation40_spill] sm:$0xff]  ;;  %v5013_v44 = vld [vmem:[#allocation41_spill] sm:$0xff] }
 0x3c4   : > { %v3497_v24 = vpop.eup %3496  ;;  %2243 = vmatprep.subr.bf16.mxu1 %v3575_v43  ;;  %3086 = vmatprep.subr.bf16.mxu0 %v4974_v48 }
 0x3c5   : > { %v2049_v10 = vmul.f32 %v3497_v24, %v2015_v0  ;;  %2273 = vmatprep.mubr.bf16.mxu1 %v4975_v40  ;;  %3100 = vmatprep.mubr.msk.bf16.mxu0 %vm3784_vm1, %v4974_v48  ;;  %v5010_v0 = vld [vmem:[#allocation39_spill] sm:$0xff]  ;;  %v5014_v24 = vld [vmem:[#allocation42_spill] sm:$0xff] }
 0x3c6   : > { %v3499_v6 = vpop.eup %3498  ;;  %v529_v1 = vadd.f32 %v5010_v0, %v5009_v63 }
 0x3c7   : > { %v2051_v8 = vadd.f32 %v2049_v10, %v5006_v7  ;;  %v2050_v45 = vmul.f32 %v3499_v6, %v2018_v5  ;;  %2244 = vmatpush1.bf16.msra.mxu1 %v3576_v9  ;;  %3087 = vmatpush3.bf16.msra.mxu0 %v3577_v12  ;;  %v3501_v31 = vpop.eup %3500  ;;  %v5015_v10 = vld [vmem:[#allocation56_spill] sm:$0xff] }
 0x3c8   : > { %2245 = vmatprep.subr.bf16.mxu1 %v3578_v14  ;;  %3088 = vmatprep.subr.bf16.mxu0 %v4974_v48  ;;  %v3503_v47 = vpop.eup %3502  ;;  %v2055_v35 = vsub.f32 1.0, %v3501_v31  ;;  %v2059_v25 = vmul.f32 %v3501_v31, %v4595_v2  ;;  %v3133_v5 = vadd.f32 %v5015_v10, %v529_v1 }
 0x3c9   : > { %3504 = vtanh.f32 %v2051_v8  ;;  %v2052_v40 = vadd.f32 %v2050_v45, %v5007_v13  ;;  %v2056_v26 = vsub.f32 1.0, %v3503_v47  ;;  %v2060_v29 = vmul.f32 %v3503_v47, %v4598_v4  ;;  %v5016_v8 = vld [vmem:[#allocation58_spill] sm:$0xff] }
 0x3cb   : > { %3506 = vtanh.f32 %v2052_v40  ;;  %2246 = vmatpush1.bf16.msra.mxu1 %v3579_v37  ;;  %3089 = vmatpush3.bf16.msra.mxu0 %v3580_v34 }
 0x3cc   : > { %2247 = vmatprep.subr.bf16.mxu1 %v3581_v32  ;;  %3090 = vmatprep.subr.bf16.mxu0 %v4974_v48 }
 0x3cf   : > { %2248 = vmatpush1.bf16.msra.mxu1 %v3582_v41  ;;  %3091 = vmatpush3.bf16.msra.mxu0 %v3583_v16 }
 0x3d0   : > { %2249 = vmatprep.subr.bf16.mxu1 %v3584_v18  ;;  %3092 = vmatprep.subr.bf16.mxu0 %v4974_v48 }
 0x3d3   : > { %v3505_v21 = vpop.eup %3504  ;;  %2250 = vmatpush1.bf16.msra.mxu1 %v3585_v15  ;;  %3093 = vmatpush3.bf16.msra.mxu0 %v3586_v22 }
 0x3d4   : > { %v2057_v11 = vmul.f32 %v3505_v21, %v2055_v35  ;;  %2251 = vmatprep.subr.bf16.mxu1 %v3587_v28  ;;  %3094 = vmatprep.subr.bf16.mxu0 %v4974_v48 }
 0x3d5   : > { %v3507_v50 = vpop.eup %3506 }
 0x3d6   : > { %v2061_v46 = vadd.f32 %v2059_v25, %v2057_v11  ;;  %v2058_v3 = vmul.f32 %v3507_v50, %v2056_v26 }
 0x3d7   : > { %2252 = vmatpush1.bf16.msra.mxu1 %v3588_v30  ;;  %3095 = vmatpush3.bf16.msra.mxu0 %v3589_v51 }
 0x3d8   : > { %v2078_v19 = vsub.f32 %v2061_v46, %v4595_v2  ;;  %v2062_v52 = vadd.f32 %v2060_v29, %v2058_v3  ;;  %2253 = vmatprep.subr.bf16.mxu1 %v3590_v53  ;;  %3096 = vmatprep.subr.bf16.mxu0 %v4974_v48 }
 0x3da   : > { %v2081_v54 = vmul.f32 %v2080_v49, %v2078_v19  ;;  %v2079_v55 = vsub.f32 %v2062_v52, %v4598_v4  ;;  %v5017_v52 = vld [vmem:[#allocation45_spill] sm:$0xff] }
 0x3db   : > { %2254 = vmatpush1.bf16.msra.mxu1 %v3591_v56  ;;  %3097 = vmatpush3.bf16.msra.mxu0 %v3592_v57  ;;  %v5018_v57 = vld [vmem:[#allocation47_spill] sm:$0xff] }
 0x3dc   : > { %v2082_v58 = vmul.f32 %v2080_v49, %v2079_v55  ;;  %2255 = vmatprep.subr.bf16.mxu1 %v3593_v59  ;;  %3098 = vmatprep.subr.bf16.mxu0 %v4974_v48  ;;  %v4678_v36 = vadd.f32 %v2081_v54, %v4595_v2  ;;  %v5011_v48 = vld [vmem:[#allocation57_spill] sm:$0xff] }
 0x3dd   : > { %v531_v2 = vadd.f32 %v5012_v20, %v5011_v48  ;;  %v535_v43 = vadd.f32 %v5014_v24, %v5011_v48 }
 0x3de   : > { %v4681_v60 = vadd.f32 %v2082_v58, %v4598_v4  ;;  %v533_v4 = vadd.f32 %v5013_v44, %v5009_v63 }
 0x3df   : > { %2256 = vmatpush1.bf16.msra.mxu1 %v3594_v61  ;;  %3099 = vmatpush3.bf16.msra.mxu0 %v3595_v42  ;;  %v3136_v45 = vadd.f32 %v5016_v8, %v531_v2  ;;  %v3142_v32 = vadd.f32 %v5016_v8, %v535_v43 }
 0x3e0   : > { %v2818_v17 = vpack.c.bf16 %v4681_v60, %v4678_v36  ;;  %v3139_v13 = vadd.f32 %v5015_v10, %v533_v4 }
 0x3e2   : > { %2834 = vst [vmem:[%s3991_s14 + $0x8] sm:$0xff] %v2818_v17   ;;  %2274 = vmatmul.mubr.bf16.vlgmr.msra.gmra.mrb[12].mxu1 %v2818_v17  ;;  %3101 = vmatmul.mubr.bf16.vlgmr.msra.gmra.mrb[36].mxu0 %v2818_v17 }
 0x495   : > { %v2148_v6 = vpop.f32.mrb[32].mxu0  ;;  %v2191_v7 = vpop.f32.mrb[40].mxu1 }
 0x496   : > { %v3134_v9 = vadd.f32 %v3133_v5, %v2148_v6  ;;  %v2150_v12 = vpop.f32.mrb[33].mxu0  ;;  %v3082_v14 = vpop.f32.mrb[41].mxu1  ;;  %v2192_v3 = vadd.f32 %v2191_v7, %v4376_v38 }
 0x497   : > { %v3137_v40 = vadd.f32 %v3136_v45, %v2150_v12  ;;  %v2152_v37 = vpop.f32.mrb[34].mxu0  ;;  %v2194_v34 = vpop.f32.mrb[42].mxu1 }
 0x498   : > { %v2747_v31 = vmul.f32 -1.442695, %v3134_v9  ;;  %v3140_v41 = vadd.f32 %v3139_v13, %v2152_v37  ;;  %v2154_v16 = vpop.f32.mrb[35].mxu0  ;;  %v3083_v18 = vpop.f32.mrb[43].mxu1  ;;  %v2195_v51 = vadd.f32 %v2194_v34, %v4376_v38  ;;  %v2376_v13 = vstv %s2370_s29 }
 0x499   : > { %v3143_v47 = vadd.f32 %v3142_v32, %v2154_v16  ;;  %v2749_v21 = vmul.f32 -1.442695, %v3137_v40 }
 0x49a   : > { %3508 = vpow2.f32 %v2747_v31  ;;  %v2748_v35 = vmul.f32 -1.442695, %v3140_v41 }
 0x49b   : > { %v2750_v15 = vmul.f32 -1.442695, %v3143_v47 }
 0x49c   : > { %3510 = vpow2.f32 %v2748_v35 }
 0x49d   : > { %3512 = vpow2.f32 %v2749_v21 }
 0x49e   : > { %3514 = vpow2.f32 %v2750_v15 }
 0x4a4   : > { %v3509_v22 = vpop.eup %3508 }
 0x4a5   : > { %v2206_v11 = vadd.f32 1.0, %v3509_v22 }
 0x4a6   : > { %v3511_v25 = vpop.eup %3510 }
 0x4a7   : > { %3516 = vrcp.f32 %v2206_v11  ;;  %v2207_v26 = vadd.f32 1.0, %v3511_v25  ;;  %v3513_v28 = vpop.eup %3512 }
 0x4a8   : > { %v3515_v50 = vpop.eup %3514  ;;  %v2220_v46 = vadd.f32 1.0, %v3513_v28 }
 0x4a9   : > { %3518 = vrcp.f32 %v2207_v26  ;;  %v2221_v29 = vadd.f32 1.0, %v3515_v50 }
 0x4aa   : > { %3520 = vrcp.f32 %v2220_v46 }
 0x4ab   : > { %3522 = vrcp.f32 %v2221_v29 }
 0x4b1   : > { %v3517_v49 = vpop.eup %3516 }
 0x4b2   : > { %v2226_v30 = vmul.f32 %v3517_v49, %v2192_v3  ;;  %v5020_v3 = vld [vmem:[#allocation50_spill] sm:$0xff] }
 0x4b3   : > { %v3519_v19 = vpop.eup %3518 }
 0x4b4   : > { %v2228_v53 = vadd.f32 %v2226_v30, %v5017_v52  ;;  %v2227_v54 = vmul.f32 %v3519_v19, %v2195_v51  ;;  %v3521_v4 = vpop.eup %3520 }
 0x4b5   : > { %v2275_v55 = vpop.f32.mrb[12].mxu1  ;;  %v2318_v56 = vpop.f32.mrb[36].mxu0  ;;  %v2232_v10 = vsub.f32 1.0, %v3521_v4 }
 0x4b6   : > { %3524 = vtanh.f32 %v2228_v53  ;;  %v2229_v58 = vadd.f32 %v2227_v54, %v5018_v57  ;;  %v3145_v59 = vadd.f32 %v4997_v33, %v2275_v55  ;;  %v2277_v61 = vpop.f32.mrb[13].mxu1  ;;  %v3102_v42 = vpop.f32.mrb[37].mxu0  ;;  %v2319_v25 = vadd.f32 %v2318_v56, %v4406_v39 }
 0x4b7   : > { %v2279_v17 = vpop.f32.mrb[14].mxu1  ;;  %v2321_v63 = vpop.f32.mrb[38].mxu0  ;;  %v3147_v20 = vadd.f32 %v4999_v23, %v2277_v61  ;;  %v2383_v61 = vstv %s2373_s21 }
 0x4b8   : > { %3526 = vtanh.f32 %v2229_v58  ;;  %v2751_v38 = vmul.f32 -1.442695, %v3145_v59  ;;  %v3149_v0 = vadd.f32 %v4997_v33, %v2279_v17  ;;  %v2281_v1 = vpop.f32.mrb[15].mxu1  ;;  %v3103_v48 = vpop.f32.mrb[39].mxu0  ;;  %v2236_v33 = vmul.f32 %v3521_v4, %v4641_v62 }
 0x4b9   : > { %v3151_v44 = vadd.f32 %v4999_v23, %v2281_v1  ;;  %v2753_v24 = vmul.f32 -1.442695, %v3147_v20  ;;  %v3523_v43 = vpop.eup %3522 }
 0x4ba   : > { %3528 = vpow2.f32 %v2751_v38  ;;  %v2752_v2 = vmul.f32 -1.442695, %v3149_v0  ;;  %v2233_v8 = vsub.f32 1.0, %v3523_v43  ;;  %v2237_v23 = vmul.f32 %v3523_v43, %v4644_v27 }
 0x4bb   : > { %v2754_v5 = vmul.f32 -1.442695, %v3151_v44 }
 0x4bc   : > { %3530 = vpow2.f32 %v2752_v2 }
 0x4bd   : > { %3532 = vpow2.f32 %v2753_v24 }
 0x4be   : > { %3534 = vpow2.f32 %v2754_v5 }
 0x4c0   : > { %v3525_v6 = vpop.eup %3524 }
 0x4c1   : > { %v2234_v7 = vmul.f32 %v3525_v6, %v2232_v10 }
 0x4c2   : > { %v3527_v45 = vpop.eup %3526 }
 0x4c3   : > { %v2238_v9 = vadd.f32 %v2236_v33, %v2234_v7  ;;  %v2235_v12 = vmul.f32 %v3527_v45, %v2233_v8 }
 0x4c4   : > { %v3529_v14 = vpop.eup %3528 }
 0x4c5   : > { %v2374_v40 = vsub.f32 %v2238_v9, %v4641_v62  ;;  %v2239_v37 = vadd.f32 %v2237_v23, %v2235_v12  ;;  %v2333_v34 = vadd.f32 1.0, %v3529_v14 }
 0x4c6   : > { %v3531_v32 = vpop.eup %3530 }
 0x4c7   : > { %v2377_v31 = vmul.f32 %v2376_v13, %v2374_v40  ;;  %v2375_v41 = vsub.f32 %v2239_v37, %v4644_v27  ;;  %3536 = vrcp.f32 %v2333_v34  ;;  %v2334_v16 = vadd.f32 1.0, %v3531_v32  ;;  %v3533_v35 = vpop.eup %3532 }
 0x4c8   : > { %v3535_v15 = vpop.eup %3534  ;;  %v2347_v11 = vadd.f32 1.0, %v3533_v35 }
 0x4c9   : > { %v2379_v18 = vadd.f32 %v2377_v31, %v4641_v62  ;;  %v2378_v47 = vmul.f32 %v2376_v13, %v2375_v41  ;;  %3538 = vrcp.f32 %v2334_v16  ;;  %v2348_v26 = vadd.f32 1.0, %v3535_v15 }
 0x4ca   : > { %3540 = vrcp.f32 %v2347_v11  ;;  %v2322_v62 = vadd.f32 %v2321_v63, %v4406_v39 }
 0x4cb   : > { %2388 = vst [vmem:[#allocation2] sm:$0xff] %v2379_v18  ;;  %v2380_v21 = vadd.f32 %v2378_v47, %v4644_v27  ;;  %3542 = vrcp.f32 %v2348_v26  ;;  %v5021_v27 = vld [vmem:[#allocation52_spill] sm:$0xff] }
 0x4cd   : > { %2389 = vst [vmem:[#allocation2 + $0x8] sm:$0xff] %v2380_v21  ;;  %v2823_v22 = vpack.c.bf16 %v2380_v21, %v2379_v18 }
 0x4cf   : > { %2835 = vst [vmem:[%s3989_s25 + $0x18] sm:$0xff] %v2823_v22  }
 0x4d1   : > { %v3537_v28 = vpop.eup %3536 }
 0x4d2   : > { %v2353_v50 = vmul.f32 %v3537_v28, %v2319_v25  ;;  %v2416_v2 = vld [vmem:[#allocation2] sm:$0xff] (!%p2759_p4) }
 0x4d3   : > { %v3539_v46 = vpop.eup %3538  ;;  %2418 = vst [vmem:[#allocation10] sm:$0xff] (!%p2759_p4), %v2416_v2 }
 0x4d4   : > { %v2355_v29 = vadd.f32 %v2353_v50, %v5020_v3  ;;  %v2354_v49 = vmul.f32 %v3539_v46, %v2322_v62  ;;  %v3541_v51 = vpop.eup %3540  ;;  %v2417_v44 = vld [vmem:[#allocation2 + $0x8] sm:$0xff] (!%p2759_p4) }
 0x4d5   : > { %v3543_v19 = vpop.eup %3542  ;;  %v2359_v52 = vsub.f32 1.0, %v3541_v51  ;;  %v2363_v55 = vmul.f32 %v3541_v51, %v4678_v36  ;;  %2419 = vst [vmem:[#allocation10 + $0x8] sm:$0xff] (!%p2759_p4), %v2417_v44 }
 0x4d6   : > { %3544 = vtanh.f32 %v2355_v29  ;;  %v2356_v30 = vadd.f32 %v2354_v49, %v5021_v27  ;;  %v2360_v39 = vsub.f32 1.0, %v3543_v19  ;;  %v2364_v59 = vmul.f32 %v3543_v19, %v4681_v60 }
 0x4d8   : > { %3546 = vtanh.f32 %v2356_v30 }
 0x4e0   : > { %v3545_v53 = vpop.eup %3544 }
 0x4e1   : > { %v2361_v54 = vmul.f32 %v3545_v53, %v2359_v52 }
 0x4e2   : > { %v3547_v56 = vpop.eup %3546 }
 0x4e3   : > { %v2365_v57 = vadd.f32 %v2363_v55, %v2361_v54  ;;  %v2362_v58 = vmul.f32 %v3547_v56, %v2360_v39 }
 0x4e5   : > { %v2381_v42 = vsub.f32 %v2365_v57, %v4678_v36  ;;  %v2366_v17 = vadd.f32 %v2364_v59, %v2362_v58 }
 0x4e7   : > { %v2384_v63 = vmul.f32 %v2383_v61, %v2381_v42  ;;  %v2382_v38 = vsub.f32 %v2366_v17, %v4681_v60 }
 0x4e9   : > { %v2386_v0 = vadd.f32 %v2384_v63, %v4678_v36  ;;  %v2385_v1 = vmul.f32 %v2383_v61, %v2382_v38  ;;  %2415 = sbr.rel (%p2759_p4) target bundleno = 1270 (0x4f6), region = 56 }
 0x4eb   : > { %2390 = vst [vmem:[#allocation3] sm:$0xff] %v2386_v0  ;;  %v2387_v48 = vadd.f32 %v2385_v1, %v4681_v60 }
 0x4ed   : > { %2391 = vst [vmem:[#allocation3 + $0x8] sm:$0xff] %v2387_v48  ;;  %v2828_v20 = vpack.c.bf16 %v2387_v48, %v2386_v0 }
 0x4ef   : > { %2829 = vst [vmem:[%s3991_s14] sm:$0xff] %v2828_v20  }
 0x4f2   : > { %v2420_v4 = vld [vmem:[#allocation3] sm:$0xff] }
 0x4f3   : > { %2423 = vst [vmem:[#allocation10 + $0x10] sm:$0xff] %v2420_v4 }
 0x4f4   : > { %v2421_v24 = vld [vmem:[#allocation3 + $0x8] sm:$0xff] }
 0x4f5   : > { %2424 = vst [vmem:[#allocation10 + $0x18] sm:$0xff] %v2421_v24 }
 0x4f6 PF: > { %s2430_s28 = sand.u32 1, %s3873_s12   ;;  %s2789_s13 = sshll.u32 %s3974_s16, 9 }
 0x4f7   : > { %s2461_s18 = sshll.u32 %s3991_s14, 4  ;;  %s4739_s4 = scalar_lea.hbm %s4867_s7, %s2789_s13  ;;  %s4741_s18 = int_to_ptr.vmem [resolvable:$true] %s2461_s18 }
 0x4f8   : > { %s4743_s10 = scalar_lea.sflag [#allocation9], %s2430_s28  ;;  %s3624_s23 = scalar_lea.vmem %s4741_s18, 512 }
 0x4f9   : > { %p3625_p2 = scmp.ne.s32.totalorder %s4741_s18, %s3624_s23  ;;  %p5022_p0 = scmp.ne.s32.totalorder %s4925_s26, 0 }
 0x4fa   : > { %s3785_s24 = smov [#allocation8]  }
 0x4fb   : > { %p3626_p5 = pnand %p3625_p2, %p5022_p0  ;;  %s3628_s16 = sshll.u32 %s3785_s24, 4  ;;  %s3629_s16 = int_to_ptr.vmem [resolvable:$false] %s3628_s16 }
 0x4fc   : > { %s3630_s14 = scalar_lea.vmem %s3629_s16, 1024  ;;  %p3631_p11 = scmp.lt.s32.totalorder %s4741_s18, %s3629_s16 }
 0x4fd   : > { %p3627_p6 = pneg %p3626_p5  ;;  %p3632_p12 = scmp.lt.s32.totalorder %s3630_s14, %s3624_s23 }
 0x4ff   : > { %p3633_p1 = por %p3632_p12, %p3631_p11 }
 0x501   : > { %p3634_p3 = pnand %p3633_p1, %p3627_p6 }
 0x503   : > { %3637 = shalt.err (!%p3634_p3)
}
 0x504   : > { %s3638_s29 = scalar_lea.hbm %s4739_s4, 512  ;;  %s3642_s28 = scalar_lea.hbm %s4867_s7, 1536 }
 0x505   : > { %p3639_p8 = scmp.ne.s32.totalorder %s4739_s4, %s3638_s29  ;;  %p3643_p13 = scmp.lt.u32.totalorder %s4739_s4, %s4867_s7 }
 0x506   : > { %p3644_p7 = scmp.lt.u32.totalorder %s3642_s28, %s3638_s29  ;;  %p3646_p2 = scmp.lt.u32.totalorder %s3638_s29, %s4739_s4 }
 0x507   : > { %p3640_p9 = pnand %p3639_p8, %p5022_p0 }
 0x508   : > { %p3645_p4 = por %p3644_p7, %p3643_p13 }
 0x509   : > { %p3641_p10 = pneg %p3640_p9 }
 0x50a   : > { %p3647_p5 = por %p3646_p2, %p3645_p4 }
 0x50c   : > { %p3648_p6 = pnand %p3647_p5, %p3641_p10 }
 0x50e   : > { %3651 = shalt.err (!%p3648_p6)
}
 0x50f   : > { %s3786_s27 = smov 64   ;;  %s3787_s23 = smov 4  }
 0x510   : > { %3209 = dma.vmem_to_hbm [thread:$0]  (%p5022_p0), %s4741_s18, 512, %s4739_s4, %s4743_s10, %s3786_s27, %s3786_s27, %s3787_s23  }
 0x511   : > { %s2788_s24 = sshll.u32 %s3873_s12, 9  ;;  %s2444_s17 = sshll.u32 %s3989_s25, 4  ;;  %s4777_s17 = int_to_ptr.vmem [resolvable:$true] %s2444_s17 }
 0x512   : > { %s4774_s29 = scalar_lea.hbm %s4866_s6, %s2788_s24  ;;  %s5023_s21 = sand.u32 1, %s3768_s9  }
 0x513   : > { %s4781_s28 = scalar_lea.sflag [#allocation6], %s5023_s21  ;;  %s3652_s26 = scalar_lea.vmem %s4777_s17, 512 }
 0x514   : > { %p3653_p11 = scmp.ne.s32.totalorder %s4777_s17, %s3652_s26  ;;  %p5024_p12 = scmp.ne.s32.totalorder %s4922_s19, 0 }
 0x515   : > { %s3788_s18 = smov [#allocation7]  }
 0x516   : > { %p3654_p1 = pnand %p3653_p11, %p5024_p12  ;;  %s3656_s4 = sshll.u32 %s3788_s18, 4  ;;  %s3657_s4 = int_to_ptr.vmem [resolvable:$false] %s3656_s4 }
 0x517   : > { %s3658_s10 = scalar_lea.vmem %s3657_s4, 1024  ;;  %p3659_p3 = scmp.lt.s32.totalorder %s4777_s17, %s3657_s4 }
 0x518   : > { %p3655_p0 = pneg %p3654_p1  ;;  %p3660_p8 = scmp.lt.s32.totalorder %s3658_s10, %s3652_s26 }
 0x51a   : > { %p3661_p9 = por %p3660_p8, %p3659_p3 }
 0x51c   : > { %p3662_p10 = pnand %p3661_p9, %p3655_p0 }
 0x51e   : > { %3665 = shalt.err (!%p3662_p10)
}
 0x51f   : > { %s3666_s25 = scalar_lea.hbm %s4774_s29, 512  ;;  %s3670_s24 = scalar_lea.hbm %s4866_s6, 1536 }
 0x520   : > { %p3667_p13 = scmp.ne.s32.totalorder %s4774_s29, %s3666_s25  ;;  %p3671_p2 = scmp.lt.u32.totalorder %s4774_s29, %s4866_s6 }
 0x521   : > { %p3672_p5 = scmp.lt.u32.totalorder %s3670_s24, %s3666_s25  ;;  %p3674_p11 = scmp.lt.u32.totalorder %s3666_s25, %s4774_s29 }
 0x522   : > { %p3668_p7 = pnand %p3667_p13, %p5024_p12 }
 0x523   : > { %p3673_p6 = por %p3672_p5, %p3671_p2 }
 0x524   : > { %p3669_p4 = pneg %p3668_p7 }
 0x525   : > { %p3675_p1 = por %p3674_p11, %p3673_p6 }
 0x527   : > { %p3676_p0 = pnand %p3675_p1, %p3669_p4 }
 0x529   : > { %3679 = shalt.err (!%p3676_p0)
}
 0x52a   : > { %3208 = dma.vmem_to_hbm [thread:$0]  (%p5024_p12), %s4777_s17, 512, %s4774_s29, %s4781_s28, %s3786_s27, %s3786_s27, %s3787_s23  }
 0x52b   : > { %s3789_s21 = smov [#allocation10]   ;;  %p5025_p8 = scmp.eq.s32.totalorder %s3873_s12, 2 }
 0x52c   : > { %s2474_s26 = sshll.u32 %s3789_s21, 4  ;;  %s2475_s26 = int_to_ptr.vmem [resolvable:$true] %s2474_s26 }
 0x52d   : > { %s3680_s18 = scalar_lea.vmem %s2475_s26, 512  ;;  %p3687_p13 = scmp.lt.s32.totalorder %s2475_s26, %s2475_s26 }
 0x52e   : > { %p3681_p3 = scmp.ne.s32.totalorder %s2475_s26, %s3680_s18  ;;  %p3688_p7 = scmp.lt.s32.totalorder %s3680_s18, %s3680_s18 }
 0x530   : > { %p3682_p9 = pnand %p3681_p3, %p5025_p8  ;;  %p3689_p4 = por %p3688_p7, %p3687_p13 }
 0x532   : > { %p3683_p10 = pneg %p3682_p9 }
 0x534   : > { %p3690_p2 = pnand %p3689_p4, %p3683_p10 }
 0x536   : > { %3693 = shalt.err (!%p3690_p2)
}
 0x537   : > { %s3694_s10 = scalar_lea.hbm %s4868_s8, 512  ;;  %p5026_p5 = pmov %p5025_p8 }
 0x538   : > { %p3695_p12 = scmp.ne.s32.totalorder %s4868_s8, %s3694_s10  ;;  %p3700_p1 = scmp.lt.u32.totalorder %s3694_s10, %s4868_s8 }
 0x53a   : > { %p3696_p6 = pnand %p3695_p12, %p5026_p5 }
 0x53c   : > { %p3697_p11 = pneg %p3696_p6 }
 0x53e   : > { %p3702_p0 = pnand %p3700_p1, %p3697_p11 }
 0x540   : > { %3705 = shalt.err (!%p3702_p0)
}
 0x541   : > { %s3790_s17 = smov 128   ;;  %s3791_s28 = smov 8  }
 0x542   : > { %p5027_p3 = pmov %p5026_p5 }
 0x544   : > { %3211 = dma.vmem_to_hbm [thread:$0]  (%p5027_p3), %s2475_s26, 512, %s4868_s8, [#allocation9], %s3790_s17, %s3790_s17, %s3791_s28  }
 0x545   : > { %p5028_p8 = pmov %p5027_p3 }
 0x546   : > { %p5029_p9 = pmov %p5027_p3 }
 0x547   : > { %3739 = dma.done.wait (%p5028_p8), [#allocation9], 512  }
 0x548   : > { %3741 = vsyncadd (%p5029_p9), [#allocation9], 4294966784 }
 0x549 PF: > { %p3231_p10 = scmp.ge.s32.totalorder %s3776_s11, 2  ;;  %s2493_s24 = sand.u32 1, %s3764_s30  }
 0x54a   : > { %p5030_p13 = scmp.ne.s32.totalorder %s4923_s20, 0  ;;  %s2494_s16 = scalar_lea.sflag [#allocation6], %s2493_s24 }
 0x54c   : > { %p3221_p7 = pnand %p3231_p10, %p5030_p13 }
 0x54e   : > { %3743 = dma.done.wait (!%p3221_p7), %s2494_s16, 512  }
 0x54f   : > { %3745 = vsyncadd (!%p3221_p7), %s2494_s16, 4294966784  ;;  %s5031_s14 = sadd.s32 4294967294, %s3776_s11   ;;  %p5032_p4 = scmp.ne.s32.totalorder %s4926_s15, 0 }
 0x550   : > { %s2502_s21 = sand.u32 1, %s5031_s14  }
 0x551   : > { %p3224_p2 = pnand %p3231_p10, %p5032_p4  ;;  %s2503_s26 = scalar_lea.sflag [#allocation9], %s2502_s21 }
 0x553   : > { %3747 = dma.done.wait (!%p3224_p2), %s2503_s26, 512  }
 0x554   : > { %3749 = vsyncadd (!%p3224_p2), %s2503_s26, 4294966784  ;;  %s5033_s11 = sld [smem:[#allocation18_spill]]  ;;  %s5034_s27 = sld [smem:[#allocation15_spill]] }
 0x555   : > { %s5035_s28 = sld [smem:[#allocation16_spill]]  ;;  %s5036_s29 = sld [smem:[#allocation20_spill]] }
 0x556   : > { %s5037_s12 = sld [smem:[#allocation17_spill]]  ;;  %s5038_s10 = sld [smem:[#allocation19_spill]] }
 0x557   : > { %s5039_s30 = smov %s3768_s9 }
 0x55a   : > { %p23_p12 = scmp.ge.s32.totalorder %s5033_s11, 5  }
 0x55c   : > { %s5040_s9 = smov %s5037_s12  ;;  %25 = sbr.rel (!%p23_p12) target bundleno = 10 (0xa), region = 125 }
 0x563   :  { %2508 = vsyncpa [#allocation5], 1 }
 0x564   :  { %2510 = vsyncpa [#allocation5 + $0x1], 1 }
 0x565   :  { %2511 = vsyncpa [#allocation6], 1 }
 0x566   :  { %2513 = vsyncpa [#allocation6 + $0x1], 1 }
 0x567   :  { %2514 = vsyncpa [#allocation9], 1 }
 0x568   :  { %2516 = vsyncpa [#allocation9 + $0x1], 1 }

</bundles_post_ra>
